<compile_context>
chip_gen: v7x
topology: tpu7x:2x2x1
jax: 0.10.0
libtpu: 0.0.40
codegen_flags: <defaults>
</compile_context>

<pallas_src>
import jax
import jax.numpy as jnp
from jax.experimental import pallas as pl
from jax.experimental.pallas import tpu as pltpu


def _surviving_taps(rate, H, W):
    """Non-center 3x3 taps whose shifted window can overlap the image."""
    taps = []
    for ky in range(3):
        for kx in range(3):
            if ky == 1 and kx == 1:
                continue
            dy, dx = (ky - 1) * rate, (kx - 1) * rate
            if abs(dy) < H and abs(dx) < W:
                taps.append((ky, kx, dy, dx))
    return taps


def _choose_row_tile(H, W, target_rows=256):
    """Largest divisor of H with TH*W <= target_rows (fallback 1)."""
    best = 1
    for d in range(1, H + 1):
        if H % d == 0 and d * W <= target_rows:
            best = d
    return best


def _make_aspp_kernel(H, W, Cin, R, TH, pad, branch_taps):
    """Builds the ASPP kernel specialized for static shapes / rates / tiling."""
    n_wrest = sum(1 for t in branch_taps if t)

    def kernel(*refs):
        # inputs
        x_ref, wc_ref, wimg_ref, shift_ref = refs[:4]       # x: (1,H,W,Cin) bf16
        wrest_refs = refs[4:4 + n_wrest]                    # packed tap weights
        # output
        out_ref = refs[4 + n_wrest]                         # (1,5,TH,W,R) f32
        # scratch
        scratch = refs[5 + n_wrest:]
        xp_ref, img_ref = scratch[0], scratch[1]            # padded frame, img vec
        slab_ref = scratch[2] if n_wrest else None          # im2col slab

        rt = pl.program_id(1)

        @pl.when(rt == 0)
        def _prologue():
            # Zero-pad the bf16 frame into VMEM scratch (no padded HBM array).
            xp_ref[...] = jnp.zeros_like(xp_ref)
            xp_ref[pad:pad + H, pad:pad + W, :] = x_ref[0]
            # Image-pooling branch: global mean (f32) -> 1x1 conv -> BN -> ReLU.
            xm = jnp.mean(x_ref[0].astype(jnp.float32).reshape(H * W, Cin),
                          axis=0, keepdims=True)                       # (1, Cin)
            img = jnp.dot(xm.astype(jnp.bfloat16), wimg_ref[...],
                          preferred_element_type=jnp.float32)          # (1, R)
            img_ref[...] = jnp.maximum(img + shift_ref[0:1, :], 0.0)

        row0 = pad + pl.multiple_of(rt * TH, TH)

        # Branch 0: image pooling, upsample(1x1, bilinear, align_corners) == broadcast.
        out_ref[0, 0, :, :, :] = jnp.broadcast_to(
            img_ref[...].reshape(1, 1, R), (TH, W, R))

        # Center window of this row tile, flattened to (TH*W, Cin) bf16.
        x_c = xp_ref[pl.ds(row0, TH), pad:pad + W, :].reshape(TH * W, Cin)

        # Fused center matmul: 1x1 conv + the (1,1) tap of each dilated conv.
        # (TH*W, Cin) x (Cin, 4R) -> f32 accumulation.
        yc = jnp.dot(x_c, wc_ref[...], preferred_element_type=jnp.float32)

        # Branch 1: 1x1 conv.
        y0 = jnp.maximum(yc[:, 0:R] + shift_ref[1:2, :], 0.0)
        out_ref[0, 1, :, :, :] = y0.reshape(TH, W, R)

        # Branches 2..4: dilated 3x3 convs, remaining taps packed along K.
        wr_i = 0
        for bi, taps in enumerate(branch_taps):
            acc = yc[:, (bi + 1) * R:(bi + 2) * R]
            if taps:
                for t, (_, _, dy, dx) in enumerate(taps):
                    win = xp_ref[pl.ds(row0 + dy, TH),
                                 pad + dx:pad + dx + W, :]
                    slab_ref[:, t * Cin:(t + 1) * Cin] = win.reshape(TH * W, Cin)
                acc = acc + jnp.dot(slab_ref[:, :len(taps) * Cin],
                                    wrest_refs[wr_i][...],
                                    preferred_element_type=jnp.float32)
                wr_i += 1
            y = jnp.maximum(acc + shift_ref[2 + bi:3 + bi, :], 0.0)
            out_ref[0, 2 + bi, :, :, :] = y.reshape(TH, W, R)

    return kernel


def aspp_forward(x_nchw, params, rates=(6, 12, 18), row_tile_h=None,
                 layout="NCHW"):
    """ASPP forward. Input NCHW; output NCHW (N, 5*R, H, W) or native (N,5,H,W,R)."""
    N, Cin, H, W = x_nchw.shape
    R = params["w1"].shape[1]

    # ---- static tap analysis (trace time) ----
    branch_taps = [_surviving_taps(r, H, W) for r in rates]
    shifts_abs = [abs(s) for taps in branch_taps
                  for (_, _, dy, dx) in taps for s in (dy, dx)]
    pad = max(shifts_abs) if shifts_abs else 0
    Hp, Wp = H + 2 * pad, W + 2 * pad
    max_taps = max((len(t) for t in branch_taps), default=0)

    if row_tile_h is None:
        row_tile_h = _choose_row_tile(H, W)
    TH = int(row_tile_h)
    assert H % TH == 0, (H, TH)
    RT = H // TH

    # ---- fold eval-mode BN scale into conv weights; keep shift as a bias ----
    sc = params["bn_scale"]                               # (5, R): [img,1x1,d6,d12,d18]
    shift = params["bn_shift"].astype(jnp.float32)        # (5, R)
    wimg_s = (params["wimg"] * sc[0][None, :]).astype(jnp.bfloat16)
    w1_s = params["w1"] * sc[1][None, :]
    centers = [params["w3"][b][1, 1] * sc[2 + b][None, :] for b in range(3)]
    w_center = jnp.concatenate([w1_s] + centers, axis=1).astype(jnp.bfloat16)
    wrest = []
    for b, taps in enumerate(branch_taps):
        if not taps:
            continue
        wk = jnp.concatenate(
            [params["w3"][b][ky, kx] * sc[2 + b][None, :]
             for (ky, kx, _, _) in taps], axis=0)          # (n_taps*Cin, R)
        wrest.append(wk.astype(jnp.bfloat16))

    # bf16 NHWC input for the MXU (f32 accumulation in-kernel).
    x_nhwc = jnp.transpose(x_nchw.astype(jnp.bfloat16), (0, 2, 3, 1))

    kernel = _make_aspp_kernel(H, W, Cin, R, TH, pad, branch_taps)

    in_specs = [
        pl.BlockSpec((1, H, W, Cin), lambda n, rt: (n, 0, 0, 0)),
        pl.BlockSpec((Cin, 4 * R), lambda n, rt: (0, 0)),
        pl.BlockSpec((Cin, R), lambda n, rt: (0, 0)),
        pl.BlockSpec((5, R), lambda n, rt: (0, 0)),
    ] + [pl.BlockSpec(w.shape, lambda n, rt: (0, 0)) for w in wrest]

    scratch_shapes = [
        pltpu.VMEM((Hp, Wp, Cin), jnp.bfloat16),   # zero-padded frame
        pltpu.VMEM((1, R), jnp.float32),           # image-pooling vector
    ]
    if max_taps:
        scratch_shapes.append(pltpu.VMEM((TH * W, max_taps * Cin), jnp.bfloat16))

    # Rough VMEM budget (double-buffered blocks + scratch) with headroom,
    # capped conservatively below every chip's physical VMEM.
    est_bytes = (2 * H * W * Cin * 2
                 + 2 * 5 * TH * W * R * 4
                 + Hp * Wp * Cin * 2
                 + TH * W * max_taps * Cin * 2
                 + (4 * R + R) * Cin * 2 + 5 * R * 4
                 + sum(int(w.size) for w in wrest) * 2)
    vmem_limit = int(min(40 * 2**20, max(16 * 2**20, 3 * est_bytes)))

    out = pl.pallas_call(
        kernel,
        out_shape=jax.ShapeDtypeStruct((N, 5, H, W, R), jnp.float32),
        grid=(N, RT),
        in_specs=in_specs,
        out_specs=pl.BlockSpec((1, 5, TH, W, R),
                               lambda n, rt: (n, 0, rt, 0, 0)),
        scratch_shapes=scratch_shapes,
        compiler_params=pltpu.CompilerParams(
            dimension_semantics=("parallel", "arbitrary"),
            vmem_limit_bytes=vmem_limit),
    )(x_nhwc, w_center, wimg_s, shift, *wrest)

    if layout == "native":
        # Lane-dense (N, 5, H, W, R): avoids the full-output HBM transpose;
        # preferred when the consumer can take channels-last.
        return out
    # PyTorch-style NCHW (glue outside the kernel), order [img, 1x1, d6, d12, d18].
    return jnp.transpose(out, (0, 1, 4, 2, 3)).reshape(N, 5 * R, H, W)


def init_params(key, in_dim, R):
    """Deterministic synthetic parameters (conv weights + folded eval-mode BN)."""
    ks = jax.random.split(key, 9)
    w1 = 0.10 * jax.random.normal(ks[0], (in_dim, R), jnp.float32)
    w3 = [0.05 * jax.random.normal(ks[1 + i], (3, 3, in_dim, R), jnp.float32)
          for i in range(3)]
    wimg = 0.10 * jax.random.normal(ks[4], (in_dim, R), jnp.float32)
    # Per-branch BN params, order: [img_pool, 1x1, d6, d12, d18]
    gamma = 1.0 + 0.1 * jax.random.normal(ks[5], (5, R), jnp.float32)
    beta = 0.1 * jax.random.normal(ks[6], (5, R), jnp.float32)
    mean = 0.1 * jax.random.normal(ks[7], (5, R), jnp.float32)
    var = 0.5 + jax.random.uniform(ks[8], (5, R), jnp.float32)
    eps = 1e-5
    scale = gamma / jnp.sqrt(var + eps)
    shift = beta - mean * scale
    return dict(w1=w1, w3=w3, wimg=wimg, bn_scale=scale, bn_shift=shift)


def aspp_reference(x_nchw, params, rates=(6, 12, 18)):
    """Pure-JAX reference (numerical verification only; full f32)."""
    x = jnp.transpose(x_nchw, (0, 2, 3, 1)).astype(jnp.float32)  # NHWC
    N, H, W, Cin = x.shape
    R = params["w1"].shape[1]
    sc, sh = params["bn_scale"], params["bn_shift"]

    def bn_relu(y, i):
        return jnp.maximum(y * sc[i] + sh[i], 0.0)

    xmean = jnp.mean(x, axis=(1, 2))                                     # (N, Cin)
    img = bn_relu(jnp.dot(xmean, params["wimg"],
                          precision=jax.lax.Precision.HIGHEST), 0)       # (N, R)
    img = jnp.broadcast_to(img[:, None, None, :], (N, H, W, R))

    b0 = bn_relu(jnp.einsum("nhwc,cr->nhwr", x, params["w1"],
                            precision=jax.lax.Precision.HIGHEST), 1)

    outs = [img, b0]
    dn = jax.lax.conv_dimension_numbers(x.shape, (3, 3, Cin, R),
                                        ("NHWC", "HWIO", "NHWC"))
    for bi, r in enumerate(rates):
        y = jax.lax.conv_general_dilated(
            x, params["w3"][bi], window_strides=(1, 1),
            padding=[(r, r), (r, r)], rhs_dilation=(r, r),
            dimension_numbers=dn, precision=jax.lax.Precision.HIGHEST)
        outs.append(bn_relu(y, 2 + bi))
    out = jnp.concatenate(outs, axis=-1)                                 # NHWC
    return jnp.transpose(out, (0, 3, 1, 2))                              # NCHW


if __name__ == "__main__":
    # Small shapes consistent with the module: NCHW input.
    N, Cin, H, W = 2, 32, 16, 16
    R = 128  # reduction_dim (lane-friendly)

    key = jax.random.PRNGKey(0)
    kx, kp = jax.random.split(key)
    x = jax.random.normal(kx, (N, Cin, H, W), jnp.float32)
    params = init_params(kp, Cin, R)

    # row_tile_h=8 -> two row tiles per image, exercising the spatial grid axis.
    out = aspp_forward(x, params, row_tile_h=8)
    out = jax.block_until_ready(out)
    assert out.shape == (N, 5 * R, H, W), out.shape

    ref = aspp_reference(x, params)
    err = float(jnp.max(jnp.abs(out - ref)))
    # bf16 MXU inputs with f32 accumulation vs. an f32 HIGHEST-precision reference.
    assert err < 3e-2, f"max abs err {err}"

    print("KERNEL_OK")
</pallas_src>

<mosaic_0001>
module attributes {stable_mosaic.version = 11 : i64} {
  func.func @kernel(%arg0: i32, %arg1: i32, %arg2: memref<1x16x16x32xbf16, #tpu.memory_space<vmem>>, %arg3: memref<32x512xbf16, #tpu.memory_space<vmem>>, %arg4: memref<32x128xbf16, #tpu.memory_space<vmem>>, %arg5: memref<5x128xf32, #tpu.memory_space<vmem>>, %arg6: memref<256x128xbf16, #tpu.memory_space<vmem>>, %arg7: memref<256x128xbf16, #tpu.memory_space<vmem>>, %arg8: memref<1x5x8x16x128xf32, #tpu.memory_space<vmem>>, %arg9: memref<40x40x32xbf16, #tpu.memory_space<vmem>>, %arg10: memref<1x128xf32, #tpu.memory_space<vmem>>, %arg11: memref<128x256xbf16, #tpu.memory_space<vmem>>) attributes {dimension_semantics = [#tpu.dimension_semantics<parallel>, #tpu.dimension_semantics<arbitrary>], iteration_bounds = array<i64: 2, 2>, scalar_prefetch = 0 : i64, scratch_operands = 3 : i64, tpu.core_type = #tpu.core_type<tc>, window_params = [{transform_indices = @transform_0, window_bounds = array<i64: 1, 16, 16, 32>}, {pipeline_mode = #tpu.pipeline_mode<synchronous>, transform_indices = @transform_1, window_bounds = array<i64: 32, 512>}, {pipeline_mode = #tpu.pipeline_mode<synchronous>, transform_indices = @transform_2, window_bounds = array<i64: 32, 128>}, {pipeline_mode = #tpu.pipeline_mode<synchronous>, transform_indices = @transform_3, window_bounds = array<i64: 5, 128>}, {pipeline_mode = #tpu.pipeline_mode<synchronous>, transform_indices = @transform_4, window_bounds = array<i64: 256, 128>}, {pipeline_mode = #tpu.pipeline_mode<synchronous>, transform_indices = @transform_5, window_bounds = array<i64: 256, 128>}, {transform_indices = @transform_6, window_bounds = array<i64: 1, 5, 8, 16, 128>}]} {
    %c0_i32 = arith.constant 0 : i32
    %0 = arith.cmpi eq, %arg1, %c0_i32 : i32
    %1 = arith.extui %0 : i1 to i32
    %c0_i32_0 = arith.constant 0 : i32
    %2 = arith.cmpi ne, %1, %c0_i32_0 : i32
    scf.if %2 {
      %cst_115 = arith.constant 0.000000e+00 : bf16
      %146 = vector.broadcast %cst_115 : bf16 to vector<40x40x32xbf16>
      %c0_116 = arith.constant 0 : index
      %c0_117 = arith.constant 0 : index
      %c0_118 = arith.constant 0 : index
      %147 = vector.load %arg9[%c0_116, %c0_117, %c0_118] : memref<40x40x32xbf16, #tpu.memory_space<vmem>>, vector<40x40x32xbf16>
      tpu.vector_store %arg9[%c0_116, %c0_117, %c0_118], %146 {strides = array<i32>} : memref<40x40x32xbf16, #tpu.memory_space<vmem>>, vector<40x40x32xbf16>,
      %c0_119 = arith.constant 0 : index
      %c0_120 = arith.constant 0 : index
      %c0_121 = arith.constant 0 : index
      %c0_122 = arith.constant 0 : index
      %148 = vector.load %arg2[%c0_119, %c0_120, %c0_121, %c0_122] : memref<1x16x16x32xbf16, #tpu.memory_space<vmem>>, vector<1x16x16x32xbf16>
      %149 = vector.shape_cast %148 : vector<1x16x16x32xbf16> to vector<16x16x32xbf16>
      %c12_123 = arith.constant 12 : index
      %c12_124 = arith.constant 12 : index
      %c0_125 = arith.constant 0 : index
      %150 = vector.load %arg9[%c12_123, %c12_124, %c0_125] : memref<40x40x32xbf16, #tpu.memory_space<vmem>>, vector<16x16x32xbf16>
      tpu.vector_store %arg9[%c12_123, %c12_124, %c0_125], %149 {strides = array<i32>} : memref<40x40x32xbf16, #tpu.memory_space<vmem>>, vector<16x16x32xbf16>,
      %c0_126 = arith.constant 0 : index
      %c0_127 = arith.constant 0 : index
      %c0_128 = arith.constant 0 : index
      %c0_129 = arith.constant 0 : index
      %151 = vector.load %arg2[%c0_126, %c0_127, %c0_128, %c0_129] : memref<1x16x16x32xbf16, #tpu.memory_space<vmem>>, vector<1x16x16x32xbf16>
      %152 = vector.shape_cast %151 : vector<1x16x16x32xbf16> to vector<16x16x32xbf16>
      %153 = arith.extf %152 : vector<16x16x32xbf16> to vector<16x16x32xf32>
      %154 = vector.shape_cast %153 : vector<16x16x32xf32> to vector<256x32xf32>
      %cst_130 = arith.constant dense<0.000000e+00> : vector<32xf32>
      %155 = vector.multi_reduction <add>, %154, %cst_130 [0] : vector<256x32xf32> to vector<32xf32>
      %156 = vector.shape_cast %155 : vector<32xf32> to vector<1x32xf32>
      %cst_131 = arith.constant 2.560000e+02 : f32
      %157 = vector.broadcast %cst_131 : f32 to vector<1x32xf32>
      %158 = arith.divf %156, %157 : vector<1x32xf32>
      %159 = arith.truncf %158 : vector<1x32xf32> to vector<1x32xbf16>
      %c0_132 = arith.constant 0 : index
      %c0_133 = arith.constant 0 : index
      %160 = vector.load %arg4[%c0_132, %c0_133] : memref<32x128xbf16, #tpu.memory_space<vmem>>, vector<32x128xbf16>
      %cst_134 = arith.constant dense<0.000000e+00> : vector<1x128xf32>
      %161 = tpu.matmul %159, %160, %cst_134 {dimension_numbers = #tpu.dot_dimension_numbers<[1], [0], [0], [1], [0, 0, 1, 1], [], []>} : vector<1x32xbf16>, vector<32x128xbf16>, vector<1x128xf32> -> vector<1x128xf32>
      %c0_135 = arith.constant 0 : index
      %c0_136 = arith.constant 0 : index
      %162 = vector.load %arg5[%c0_135, %c0_136] : memref<5x128xf32, #tpu.memory_space<vmem>>, vector<1x128xf32>
      %163 = arith.addf %161, %162 : vector<1x128xf32>
      %cst_137 = arith.constant 0.000000e+00 : f32
      %164 = vector.broadcast %cst_137 : f32 to vector<1x128xf32>
      %165 = arith.maximumf %163, %164 : vector<1x128xf32>
      %c0_138 = arith.constant 0 : index
      %c0_139 = arith.constant 0 : index
      %166 = vector.load %arg10[%c0_138, %c0_139] : memref<1x128xf32, #tpu.memory_space<vmem>>, vector<1x128xf32>
      tpu.vector_store %arg10[%c0_138, %c0_139], %165 {strides = array<i32>} : memref<1x128xf32, #tpu.memory_space<vmem>>, vector<1x128xf32>,
    } else {
    }
    %c8_i32 = arith.constant 8 : i32
    %3 = arith.muli %arg1, %c8_i32 : i32
    %4 = tpu.assume_multiple %3, 8 : i32
    %c12_i32 = arith.constant 12 : i32
    %5 = arith.addi %c12_i32, %4 : i32
    %c0 = arith.constant 0 : index
    %c0_1 = arith.constant 0 : index
    %6 = vector.load %arg10[%c0, %c0_1] : memref<1x128xf32, #tpu.memory_space<vmem>>, vector<1x128xf32>
    %7 = vector.shape_cast %6 : vector<1x128xf32> to vector<1x1x128xf32>
    %8 = vector.shape_cast %7 : vector<1x1x128xf32> to vector<1x1x128xf32>
    %9 = vector.broadcast %8 : vector<1x1x128xf32> to vector<8x16x128xf32>
    %c0_2 = arith.constant 0 : index
    %c0_3 = arith.constant 0 : index
    %c0_4 = arith.constant 0 : index
    %c0_5 = arith.constant 0 : index
    %c0_6 = arith.constant 0 : index
    %10 = vector.load %arg8[%c0_2, %c0_3, %c0_4, %c0_5, %c0_6] : memref<1x5x8x16x128xf32, #tpu.memory_space<vmem>>, vector<1x1x8x16x128xf32>
    %11 = vector.shape_cast %10 : vector<1x1x8x16x128xf32> to vector<8x16x128xf32>
    %12 = vector.shape_cast %9 : vector<8x16x128xf32> to vector<1x1x8x16x128xf32>
    tpu.vector_store %arg8[%c0_2, %c0_3, %c0_4, %c0_5, %c0_6], %12 {strides = array<i32>} : memref<1x5x8x16x128xf32, #tpu.memory_space<vmem>>, vector<1x1x8x16x128xf32>,
    %13 = arith.index_cast %5 : i32 to index
    %c12 = arith.constant 12 : index
    %c0_7 = arith.constant 0 : index
    %14 = vector.load %arg9[%13, %c12, %c0_7] : memref<40x40x32xbf16, #tpu.memory_space<vmem>>, vector<8x16x32xbf16>
    %15 = vector.shape_cast %14 : vector<8x16x32xbf16> to vector<128x32xbf16>
    %c0_8 = arith.constant 0 : index
    %c0_9 = arith.constant 0 : index
    %16 = vector.load %arg3[%c0_8, %c0_9] : memref<32x512xbf16, #tpu.memory_space<vmem>>, vector<32x512xbf16>
    %cst = arith.constant dense<0.000000e+00> : vector<128x512xf32>
    %17 = tpu.matmul %15, %16, %cst {dimension_numbers = #tpu.dot_dimension_numbers<[1], [0], [0], [1], [0, 0, 1, 1], [], []>} : vector<128x32xbf16>, vector<32x512xbf16>, vector<128x512xf32> -> vector<128x512xf32>
    %18 = vector.extract_strided_slice %17 {offsets = [0, 0], sizes = [128, 128], strides = [1, 1]} : vector<128x512xf32> to vector<128x128xf32>
    %c1 = arith.constant 1 : index
    %c0_10 = arith.constant 0 : index
    %19 = vector.load %arg5[%c1, %c0_10] : memref<5x128xf32, #tpu.memory_space<vmem>>, vector<1x128xf32>
    %20 = vector.broadcast %19 : vector<1x128xf32> to vector<128x128xf32>
    %21 = arith.addf %18, %20 : vector<128x128xf32>
    %cst_11 = arith.constant 0.000000e+00 : f32
    %22 = vector.broadcast %cst_11 : f32 to vector<128x128xf32>
    %23 = arith.maximumf %21, %22 : vector<128x128xf32>
    %24 = vector.shape_cast %23 : vector<128x128xf32> to vector<8x16x128xf32>
    %c0_12 = arith.constant 0 : index
    %c1_13 = arith.constant 1 : index
    %c0_14 = arith.constant 0 : index
    %c0_15 = arith.constant 0 : index
    %c0_16 = arith.constant 0 : index
    %25 = vector.load %arg8[%c0_12, %c1_13, %c0_14, %c0_15, %c0_16] : memref<1x5x8x16x128xf32, #tpu.memory_space<vmem>>, vector<1x1x8x16x128xf32>
    %26 = vector.shape_cast %25 : vector<1x1x8x16x128xf32> to vector<8x16x128xf32>
    %27 = vector.shape_cast %24 : vector<8x16x128xf32> to vector<1x1x8x16x128xf32>
    tpu.vector_store %arg8[%c0_12, %c1_13, %c0_14, %c0_15, %c0_16], %27 {strides = array<i32>} : memref<1x5x8x16x128xf32, #tpu.memory_space<vmem>>, vector<1x1x8x16x128xf32>,
    %28 = vector.extract_strided_slice %17 {offsets = [0, 128], sizes = [128, 128], strides = [1, 1]} : vector<128x512xf32> to vector<128x128xf32>
    %c-6_i32 = arith.constant -6 : i32
    %29 = arith.addi %5, %c-6_i32 : i32
    %30 = arith.index_cast %29 : i32 to index
    %c6 = arith.constant 6 : index
    %c0_17 = arith.constant 0 : index
    %31 = vector.load %arg9[%30, %c6, %c0_17] : memref<40x40x32xbf16, #tpu.memory_space<vmem>>, vector<8x16x32xbf16>
    %32 = vector.shape_cast %31 : vector<8x16x32xbf16> to vector<128x32xbf16>
    %c0_18 = arith.constant 0 : index
    %c0_19 = arith.constant 0 : index
    %33 = vector.load %arg11[%c0_18, %c0_19] : memref<128x256xbf16, #tpu.memory_space<vmem>>, vector<128x32xbf16>
    tpu.vector_store %arg11[%c0_18, %c0_19], %32 {strides = array<i32>} : memref<128x256xbf16, #tpu.memory_space<vmem>>, vector<128x32xbf16>,
    %c-6_i32_20 = arith.constant -6 : i32
    %34 = arith.addi %5, %c-6_i32_20 : i32
    %35 = arith.index_cast %34 : i32 to index
    %c12_21 = arith.constant 12 : index
    %c0_22 = arith.constant 0 : index
    %36 = vector.load %arg9[%35, %c12_21, %c0_22] : memref<40x40x32xbf16, #tpu.memory_space<vmem>>, vector<8x16x32xbf16>
    %37 = vector.shape_cast %36 : vector<8x16x32xbf16> to vector<128x32xbf16>
    %c0_23 = arith.constant 0 : index
    %c32 = arith.constant 32 : index
    %38 = vector.load %arg11[%c0_23, %c32] : memref<128x256xbf16, #tpu.memory_space<vmem>>, vector<128x32xbf16>
    tpu.vector_store %arg11[%c0_23, %c32], %37 {strides = array<i32>} : memref<128x256xbf16, #tpu.memory_space<vmem>>, vector<128x32xbf16>,
    %c-6_i32_24 = arith.constant -6 : i32
    %39 = arith.addi %5, %c-6_i32_24 : i32
    %40 = arith.index_cast %39 : i32 to index
    %c18 = arith.constant 18 : index
    %c0_25 = arith.constant 0 : index
    %41 = vector.load %arg9[%40, %c18, %c0_25] : memref<40x40x32xbf16, #tpu.memory_space<vmem>>, vector<8x16x32xbf16>
    %42 = vector.shape_cast %41 : vector<8x16x32xbf16> to vector<128x32xbf16>
    %c0_26 = arith.constant 0 : index
    %c64 = arith.constant 64 : index
    %43 = vector.load %arg11[%c0_26, %c64] : memref<128x256xbf16, #tpu.memory_space<vmem>>, vector<128x32xbf16>
    tpu.vector_store %arg11[%c0_26, %c64], %42 {strides = array<i32>} : memref<128x256xbf16, #tpu.memory_space<vmem>>, vector<128x32xbf16>,
    %c0_i32_27 = arith.constant 0 : i32
    %44 = arith.addi %5, %c0_i32_27 : i32
    %45 = arith.index_cast %44 : i32 to index
    %c6_28 = arith.constant 6 : index
    %c0_29 = arith.constant 0 : index
    %46 = vector.load %arg9[%45, %c6_28, %c0_29] : memref<40x40x32xbf16, #tpu.memory_space<vmem>>, vector<8x16x32xbf16>
    %47 = vector.shape_cast %46 : vector<8x16x32xbf16> to vector<128x32xbf16>
    %c0_30 = arith.constant 0 : index
    %c96 = arith.constant 96 : index
    %48 = vector.load %arg11[%c0_30, %c96] : memref<128x256xbf16, #tpu.memory_space<vmem>>, vector<128x32xbf16>
    tpu.vector_store %arg11[%c0_30, %c96], %47 {strides = array<i32>} : memref<128x256xbf16, #tpu.memory_space<vmem>>, vector<128x32xbf16>,
    %c0_i32_31 = arith.constant 0 : i32
    %49 = arith.addi %5, %c0_i32_31 : i32
    %50 = arith.index_cast %49 : i32 to index
    %c18_32 = arith.constant 18 : index
    %c0_33 = arith.constant 0 : index
    %51 = vector.load %arg9[%50, %c18_32, %c0_33] : memref<40x40x32xbf16, #tpu.memory_space<vmem>>, vector<8x16x32xbf16>
    %52 = vector.shape_cast %51 : vector<8x16x32xbf16> to vector<128x32xbf16>
    %c0_34 = arith.constant 0 : index
    %c128 = arith.constant 128 : index
    %53 = vector.load %arg11[%c0_34, %c128] : memref<128x256xbf16, #tpu.memory_space<vmem>>, vector<128x32xbf16>
    tpu.vector_store %arg11[%c0_34, %c128], %52 {strides = array<i32>} : memref<128x256xbf16, #tpu.memory_space<vmem>>, vector<128x32xbf16>,
    %c6_i32 = arith.constant 6 : i32
    %54 = arith.addi %5, %c6_i32 : i32
    %55 = arith.index_cast %54 : i32 to index
    %c6_35 = arith.constant 6 : index
    %c0_36 = arith.constant 0 : index
    %56 = vector.load %arg9[%55, %c6_35, %c0_36] : memref<40x40x32xbf16, #tpu.memory_space<vmem>>, vector<8x16x32xbf16>
    %57 = vector.shape_cast %56 : vector<8x16x32xbf16> to vector<128x32xbf16>
    %c0_37 = arith.constant 0 : index
    %c160 = arith.constant 160 : index
    %58 = vector.load %arg11[%c0_37, %c160] : memref<128x256xbf16, #tpu.memory_space<vmem>>, vector<128x32xbf16>
    tpu.vector_store %arg11[%c0_37, %c160], %57 {strides = array<i32>} : memref<128x256xbf16, #tpu.memory_space<vmem>>, vector<128x32xbf16>,
    %c6_i32_38 = arith.constant 6 : i32
    %59 = arith.addi %5, %c6_i32_38 : i32
    %60 = arith.index_cast %59 : i32 to index
    %c12_39 = arith.constant 12 : index
    %c0_40 = arith.constant 0 : index
    %61 = vector.load %arg9[%60, %c12_39, %c0_40] : memref<40x40x32xbf16, #tpu.memory_space<vmem>>, vector<8x16x32xbf16>
    %62 = vector.shape_cast %61 : vector<8x16x32xbf16> to vector<128x32xbf16>
    %c0_41 = arith.constant 0 : index
    %c192 = arith.constant 192 : index
    %63 = vector.load %arg11[%c0_41, %c192] : memref<128x256xbf16, #tpu.memory_space<vmem>>, vector<128x32xbf16>
    tpu.vector_store %arg11[%c0_41, %c192], %62 {strides = array<i32>} : memref<128x256xbf16, #tpu.memory_space<vmem>>, vector<128x32xbf16>,
    %c6_i32_42 = arith.constant 6 : i32
    %64 = arith.addi %5, %c6_i32_42 : i32
    %65 = arith.index_cast %64 : i32 to index
    %c18_43 = arith.constant 18 : index
    %c0_44 = arith.constant 0 : index
    %66 = vector.load %arg9[%65, %c18_43, %c0_44] : memref<40x40x32xbf16, #tpu.memory_space<vmem>>, vector<8x16x32xbf16>
    %67 = vector.shape_cast %66 : vector<8x16x32xbf16> to vector<128x32xbf16>
    %c0_45 = arith.constant 0 : index
    %c224 = arith.constant 224 : index
    %68 = vector.load %arg11[%c0_45, %c224] : memref<128x256xbf16, #tpu.memory_space<vmem>>, vector<128x32xbf16>
    tpu.vector_store %arg11[%c0_45, %c224], %67 {strides = array<i32>} : memref<128x256xbf16, #tpu.memory_space<vmem>>, vector<128x32xbf16>,
    %c0_46 = arith.constant 0 : index
    %c0_47 = arith.constant 0 : index
    %69 = vector.load %arg11[%c0_46, %c0_47] : memref<128x256xbf16, #tpu.memory_space<vmem>>, vector<128x256xbf16>
    %c0_48 = arith.constant 0 : index
    %c0_49 = arith.constant 0 : index
    %70 = vector.load %arg6[%c0_48, %c0_49] : memref<256x128xbf16, #tpu.memory_space<vmem>>, vector<256x128xbf16>
    %cst_50 = arith.constant dense<0.000000e+00> : vector<128x128xf32>
    %71 = tpu.matmul %69, %70, %cst_50 {dimension_numbers = #tpu.dot_dimension_numbers<[1], [0], [0], [1], [0, 0, 1, 1], [], []>} : vector<128x256xbf16>, vector<256x128xbf16>, vector<128x128xf32> -> vector<128x128xf32>
    %72 = arith.addf %28, %71 : vector<128x128xf32>
    %c2 = arith.constant 2 : index
    %c0_51 = arith.constant 0 : index
    %73 = vector.load %arg5[%c2, %c0_51] : memref<5x128xf32, #tpu.memory_space<vmem>>, vector<1x128xf32>
    %74 = vector.broadcast %73 : vector<1x128xf32> to vector<128x128xf32>
    %75 = arith.addf %72, %74 : vector<128x128xf32>
    %cst_52 = arith.constant 0.000000e+00 : f32
    %76 = vector.broadcast %cst_52 : f32 to vector<128x128xf32>
    %77 = arith.maximumf %75, %76 : vector<128x128xf32>
    %78 = vector.shape_cast %77 : vector<128x128xf32> to vector<8x16x128xf32>
    %c0_53 = arith.constant 0 : index
    %c2_54 = arith.constant 2 : index
    %c0_55 = arith.constant 0 : index
    %c0_56 = arith.constant 0 : index
    %c0_57 = arith.constant 0 : index
    %79 = vector.load %arg8[%c0_53, %c2_54, %c0_55, %c0_56, %c0_57] : memref<1x5x8x16x128xf32, #tpu.memory_space<vmem>>, vector<1x1x8x16x128xf32>
    %80 = vector.shape_cast %79 : vector<1x1x8x16x128xf32> to vector<8x16x128xf32>
    %81 = vector.shape_cast %78 : vector<8x16x128xf32> to vector<1x1x8x16x128xf32>
    tpu.vector_store %arg8[%c0_53, %c2_54, %c0_55, %c0_56, %c0_57], %81 {strides = array<i32>} : memref<1x5x8x16x128xf32, #tpu.memory_space<vmem>>, vector<1x1x8x16x128xf32>,
    %82 = vector.extract_strided_slice %17 {offsets = [0, 256], sizes = [128, 128], strides = [1, 1]} : vector<128x512xf32> to vector<128x128xf32>
    %c-12_i32 = arith.constant -12 : i32
    %83 = arith.addi %5, %c-12_i32 : i32
    %84 = arith.index_cast %83 : i32 to index
    %c0_58 = arith.constant 0 : index
    %c0_59 = arith.constant 0 : index
    %85 = vector.load %arg9[%84, %c0_58, %c0_59] : memref<40x40x32xbf16, #tpu.memory_space<vmem>>, vector<8x16x32xbf16>
    %86 = vector.shape_cast %85 : vector<8x16x32xbf16> to vector<128x32xbf16>
    %c0_60 = arith.constant 0 : index
    %c0_61 = arith.constant 0 : index
    %87 = vector.load %arg11[%c0_60, %c0_61] : memref<128x256xbf16, #tpu.memory_space<vmem>>, vector<128x32xbf16>
    tpu.vector_store %arg11[%c0_60, %c0_61], %86 {strides = array<i32>} : memref<128x256xbf16, #tpu.memory_space<vmem>>, vector<128x32xbf16>,
    %c-12_i32_62 = arith.constant -12 : i32
    %88 = arith.addi %5, %c-12_i32_62 : i32
    %89 = arith.index_cast %88 : i32 to index
    %c12_63 = arith.constant 12 : index
    %c0_64 = arith.constant 0 : index
    %90 = vector.load %arg9[%89, %c12_63, %c0_64] : memref<40x40x32xbf16, #tpu.memory_space<vmem>>, vector<8x16x32xbf16>
    %91 = vector.shape_cast %90 : vector<8x16x32xbf16> to vector<128x32xbf16>
    %c0_65 = arith.constant 0 : index
    %c32_66 = arith.constant 32 : index
    %92 = vector.load %arg11[%c0_65, %c32_66] : memref<128x256xbf16, #tpu.memory_space<vmem>>, vector<128x32xbf16>
    tpu.vector_store %arg11[%c0_65, %c32_66], %91 {strides = array<i32>} : memref<128x256xbf16, #tpu.memory_space<vmem>>, vector<128x32xbf16>,
    %c-12_i32_67 = arith.constant -12 : i32
    %93 = arith.addi %5, %c-12_i32_67 : i32
    %94 = arith.index_cast %93 : i32 to index
    %c24 = arith.constant 24 : index
    %c0_68 = arith.constant 0 : index
    %95 = vector.load %arg9[%94, %c24, %c0_68] : memref<40x40x32xbf16, #tpu.memory_space<vmem>>, vector<8x16x32xbf16>
    %96 = vector.shape_cast %95 : vector<8x16x32xbf16> to vector<128x32xbf16>
    %c0_69 = arith.constant 0 : index
    %c64_70 = arith.constant 64 : index
    %97 = vector.load %arg11[%c0_69, %c64_70] : memref<128x256xbf16, #tpu.memory_space<vmem>>, vector<128x32xbf16>
    tpu.vector_store %arg11[%c0_69, %c64_70], %96 {strides = array<i32>} : memref<128x256xbf16, #tpu.memory_space<vmem>>, vector<128x32xbf16>,
    %c0_i32_71 = arith.constant 0 : i32
    %98 = arith.addi %5, %c0_i32_71 : i32
    %99 = arith.index_cast %98 : i32 to index
    %c0_72 = arith.constant 0 : index
    %c0_73 = arith.constant 0 : index
    %100 = vector.load %arg9[%99, %c0_72, %c0_73] : memref<40x40x32xbf16, #tpu.memory_space<vmem>>, vector<8x16x32xbf16>
    %101 = vector.shape_cast %100 : vector<8x16x32xbf16> to vector<128x32xbf16>
    %c0_74 = arith.constant 0 : index
    %c96_75 = arith.constant 96 : index
    %102 = vector.load %arg11[%c0_74, %c96_75] : memref<128x256xbf16, #tpu.memory_space<vmem>>, vector<128x32xbf16>
    tpu.vector_store %arg11[%c0_74, %c96_75], %101 {strides = array<i32>} : memref<128x256xbf16, #tpu.memory_space<vmem>>, vector<128x32xbf16>,
    %c0_i32_76 = arith.constant 0 : i32
    %103 = arith.addi %5, %c0_i32_76 : i32
    %104 = arith.index_cast %103 : i32 to index
    %c24_77 = arith.constant 24 : index
    %c0_78 = arith.constant 0 : index
    %105 = vector.load %arg9[%104, %c24_77, %c0_78] : memref<40x40x32xbf16, #tpu.memory_space<vmem>>, vector<8x16x32xbf16>
    %106 = vector.shape_cast %105 : vector<8x16x32xbf16> to vector<128x32xbf16>
    %c0_79 = arith.constant 0 : index
    %c128_80 = arith.constant 128 : index
    %107 = vector.load %arg11[%c0_79, %c128_80] : memref<128x256xbf16, #tpu.memory_space<vmem>>, vector<128x32xbf16>
    tpu.vector_store %arg11[%c0_79, %c128_80], %106 {strides = array<i32>} : memref<128x256xbf16, #tpu.memory_space<vmem>>, vector<128x32xbf16>,
    %c12_i32_81 = arith.constant 12 : i32
    %108 = arith.addi %5, %c12_i32_81 : i32
    %109 = arith.index_cast %108 : i32 to index
    %c0_82 = arith.constant 0 : index
    %c0_83 = arith.constant 0 : index
    %110 = vector.load %arg9[%109, %c0_82, %c0_83] : memref<40x40x32xbf16, #tpu.memory_space<vmem>>, vector<8x16x32xbf16>
    %111 = vector.shape_cast %110 : vector<8x16x32xbf16> to vector<128x32xbf16>
    %c0_84 = arith.constant 0 : index
    %c160_85 = arith.constant 160 : index
    %112 = vector.load %arg11[%c0_84, %c160_85] : memref<128x256xbf16, #tpu.memory_space<vmem>>, vector<128x32xbf16>
    tpu.vector_store %arg11[%c0_84, %c160_85], %111 {strides = array<i32>} : memref<128x256xbf16, #tpu.memory_space<vmem>>, vector<128x32xbf16>,
    %c12_i32_86 = arith.constant 12 : i32
    %113 = arith.addi %5, %c12_i32_86 : i32
    %114 = arith.index_cast %113 : i32 to index
    %c12_87 = arith.constant 12 : index
    %c0_88 = arith.constant 0 : index
    %115 = vector.load %arg9[%114, %c12_87, %c0_88] : memref<40x40x32xbf16, #tpu.memory_space<vmem>>, vector<8x16x32xbf16>
    %116 = vector.shape_cast %115 : vector<8x16x32xbf16> to vector<128x32xbf16>
    %c0_89 = arith.constant 0 : index
    %c192_90 = arith.constant 192 : index
    %117 = vector.load %arg11[%c0_89, %c192_90] : memref<128x256xbf16, #tpu.memory_space<vmem>>, vector<128x32xbf16>
    tpu.vector_store %arg11[%c0_89, %c192_90], %116 {strides = array<i32>} : memref<128x256xbf16, #tpu.memory_space<vmem>>, vector<128x32xbf16>,
    %c12_i32_91 = arith.constant 12 : i32
    %118 = arith.addi %5, %c12_i32_91 : i32
    %119 = arith.index_cast %118 : i32 to index
    %c24_92 = arith.constant 24 : index
    %c0_93 = arith.constant 0 : index
    %120 = vector.load %arg9[%119, %c24_92, %c0_93] : memref<40x40x32xbf16, #tpu.memory_space<vmem>>, vector<8x16x32xbf16>
    %121 = vector.shape_cast %120 : vector<8x16x32xbf16> to vector<128x32xbf16>
    %c0_94 = arith.constant 0 : index
    %c224_95 = arith.constant 224 : index
    %122 = vector.load %arg11[%c0_94, %c224_95] : memref<128x256xbf16, #tpu.memory_space<vmem>>, vector<128x32xbf16>
    tpu.vector_store %arg11[%c0_94, %c224_95], %121 {strides = array<i32>} : memref<128x256xbf16, #tpu.memory_space<vmem>>, vector<128x32xbf16>,
    %c0_96 = arith.constant 0 : index
    %c0_97 = arith.constant 0 : index
    %123 = vector.load %arg11[%c0_96, %c0_97] : memref<128x256xbf16, #tpu.memory_space<vmem>>, vector<128x256xbf16>
    %c0_98 = arith.constant 0 : index
    %c0_99 = arith.constant 0 : index
    %124 = vector.load %arg7[%c0_98, %c0_99] : memref<256x128xbf16, #tpu.memory_space<vmem>>, vector<256x128xbf16>
    %cst_100 = arith.constant dense<0.000000e+00> : vector<128x128xf32>
    %125 = tpu.matmul %123, %124, %cst_100 {dimension_numbers = #tpu.dot_dimension_numbers<[1], [0], [0], [1], [0, 0, 1, 1], [], []>} : vector<128x256xbf16>, vector<256x128xbf16>, vector<128x128xf32> -> vector<128x128xf32>
    %126 = arith.addf %82, %125 : vector<128x128xf32>
    %c3 = arith.constant 3 : index
    %c0_101 = arith.constant 0 : index
    %127 = vector.load %arg5[%c3, %c0_101] : memref<5x128xf32, #tpu.memory_space<vmem>>, vector<1x128xf32>
    %128 = vector.broadcast %127 : vector<1x128xf32> to vector<128x128xf32>
    %129 = arith.addf %126, %128 : vector<128x128xf32>
    %cst_102 = arith.constant 0.000000e+00 : f32
    %130 = vector.broadcast %cst_102 : f32 to vector<128x128xf32>
    %131 = arith.maximumf %129, %130 : vector<128x128xf32>
    %132 = vector.shape_cast %131 : vector<128x128xf32> to vector<8x16x128xf32>
    %c0_103 = arith.constant 0 : index
    %c3_104 = arith.constant 3 : index
    %c0_105 = arith.constant 0 : index
    %c0_106 = arith.constant 0 : index
    %c0_107 = arith.constant 0 : index
    %133 = vector.load %arg8[%c0_103, %c3_104, %c0_105, %c0_106, %c0_107] : memref<1x5x8x16x128xf32, #tpu.memory_space<vmem>>, vector<1x1x8x16x128xf32>
    %134 = vector.shape_cast %133 : vector<1x1x8x16x128xf32> to vector<8x16x128xf32>
    %135 = vector.shape_cast %132 : vector<8x16x128xf32> to vector<1x1x8x16x128xf32>
    tpu.vector_store %arg8[%c0_103, %c3_104, %c0_105, %c0_106, %c0_107], %135 {strides = array<i32>} : memref<1x5x8x16x128xf32, #tpu.memory_space<vmem>>, vector<1x1x8x16x128xf32>,
    %136 = vector.extract_strided_slice %17 {offsets = [0, 384], sizes = [128, 128], strides = [1, 1]} : vector<128x512xf32> to vector<128x128xf32>
    %c4 = arith.constant 4 : index
    %c0_108 = arith.constant 0 : index
    %137 = vector.load %arg5[%c4, %c0_108] : memref<5x128xf32, #tpu.memory_space<vmem>>, vector<1x128xf32>
    %138 = vector.broadcast %137 : vector<1x128xf32> to vector<128x128xf32>
    %139 = arith.addf %136, %138 : vector<128x128xf32>
    %cst_109 = arith.constant 0.000000e+00 : f32
    %140 = vector.broadcast %cst_109 : f32 to vector<128x128xf32>
    %141 = arith.maximumf %139, %140 : vector<128x128xf32>
    %142 = vector.shape_cast %141 : vector<128x128xf32> to vector<8x16x128xf32>
    %c0_110 = arith.constant 0 : index
    %c4_111 = arith.constant 4 : index
    %c0_112 = arith.constant 0 : index
    %c0_113 = arith.constant 0 : index
    %c0_114 = arith.constant 0 : index
    %143 = vector.load %arg8[%c0_110, %c4_111, %c0_112, %c0_113, %c0_114] : memref<1x5x8x16x128xf32, #tpu.memory_space<vmem>>, vector<1x1x8x16x128xf32>
    %144 = vector.shape_cast %143 : vector<1x1x8x16x128xf32> to vector<8x16x128xf32>
    %145 = vector.shape_cast %142 : vector<8x16x128xf32> to vector<1x1x8x16x128xf32>
    tpu.vector_store %arg8[%c0_110, %c4_111, %c0_112, %c0_113, %c0_114], %145 {strides = array<i32>} : memref<1x5x8x16x128xf32, #tpu.memory_space<vmem>>, vector<1x1x8x16x128xf32>,
    return
  }
  func.func @transform_0(%arg0: i32, %arg1: i32) -> (i32, i32, i32, i32) {
    %c0_i32 = arith.constant 0 : i32
    %c0_i32_0 = arith.constant 0 : i32
    %c0_i32_1 = arith.constant 0 : i32
    %c0_i32_2 = arith.constant 0 : i32
    return %arg0, %c0_i32, %c0_i32_0, %c0_i32_1 : i32, i32, i32, i32
  }
  func.func @transform_1(%arg0: i32, %arg1: i32) -> (i32, i32) {
    %c0_i32 = arith.constant 0 : i32
    %c0_i32_0 = arith.constant 0 : i32
    %c0_i32_1 = arith.constant 0 : i32
    return %c0_i32, %c0_i32_0 : i32, i32
  }
  func.func @transform_2(%arg0: i32, %arg1: i32) -> (i32, i32) {
    %c0_i32 = arith.constant 0 : i32
    %c0_i32_0 = arith.constant 0 : i32
    %c0_i32_1 = arith.constant 0 : i32
    return %c0_i32, %c0_i32_0 : i32, i32
  }
  func.func @transform_3(%arg0: i32, %arg1: i32) -> (i32, i32) {
    %c0_i32 = arith.constant 0 : i32
    %c0_i32_0 = arith.constant 0 : i32
    %c0_i32_1 = arith.constant 0 : i32
    return %c0_i32, %c0_i32_0 : i32, i32
  }
  func.func @transform_4(%arg0: i32, %arg1: i32) -> (i32, i32) {
    %c0_i32 = arith.constant 0 : i32
    %c0_i32_0 = arith.constant 0 : i32
    %c0_i32_1 = arith.constant 0 : i32
    return %c0_i32, %c0_i32_0 : i32, i32
  }
  func.func @transform_5(%arg0: i32, %arg1: i32) -> (i32, i32) {
    %c0_i32 = arith.constant 0 : i32
    %c0_i32_0 = arith.constant 0 : i32
    %c0_i32_1 = arith.constant 0 : i32
    return %c0_i32, %c0_i32_0 : i32, i32
  }
  func.func @transform_6(%arg0: i32, %arg1: i32) -> (i32, i32, i32, i32, i32) {
    %c0_i32 = arith.constant 0 : i32
    %c0_i32_0 = arith.constant 0 : i32
    %c0_i32_1 = arith.constant 0 : i32
    %c0_i32_2 = arith.constant 0 : i32
    return %arg0, %c0_i32, %arg1, %c0_i32_0, %c0_i32_1 : i32, i32, i32, i32, i32
  }
}

</mosaic_0001>

<bundles_post_ra>
// kernel: tpu_custom_call.1
= control target key start
LH: loop header
LB: loop body
LE: loop exit
PB: predicated region body
PF: predicated region fallthrough
CT: control target
= control target key end

     0   :  { %s8547_s0 = inlined_call_operand.hbm [shape: bf16[2,16,16,32], index: 0, kind: input, shape index: {}]   ;;  %s8548_s1 = inlined_call_operand.hbm [shape: bf16[32,512], index: 1, kind: input, shape index: {}]   ;;  %s8549_s2 = inlined_call_operand.hbm [shape: bf16[32,128], index: 2, kind: input, shape index: {}]   ;;  %s8550_s3 = inlined_call_operand.hbm [shape: f32[5,128], index: 3, kind: input, shape index: {}]   ;;  %s8551_s4 = inlined_call_operand.hbm [shape: bf16[256,128], index: 4, kind: input, shape index: {}]   ;;  %s8552_s5 = inlined_call_operand.hbm [shape: bf16[256,128], index: 5, kind: input, shape index: {}]   ;;  %s8553_s6 = inlined_call_operand.hbm [shape: f32[2,5,16,16,128], index: 6, kind: output, shape index: {}]  }
   0x1   :  { %8564 = sst [smem:[#allocation28_spill]] %s8547_s0 }
   0x2   :  { %8565 = sst [smem:[#allocation29_spill]] %s8548_s1 }
   0x3   :  { %8566 = sst [smem:[#allocation30_spill]] %s8549_s2 }
   0x4   :  { %8567 = sst [smem:[#allocation31_spill]] %s8550_s3 }
   0x5   :  { %8568 = sst [smem:[#allocation32_spill]] %s8551_s4 }
   0x6   :  { %8569 = sst [smem:[#allocation33_spill]] %s8552_s5 }
   0x7   :  { %8570 = sst [smem:[#allocation34_spill]] %s8553_s6 }
   0x8   :  { %11 = vsyncpa [#allocation6], 0 }
   0x9   :  { %13 = vsyncpa [#allocation6 + $0x1], 0 }
   0xa   :  { %14 = vsyncpa [#allocation9], 0 }
   0xb   :  { %15 = vsyncpa [#allocation12], 0 }
   0xc   :  { %16 = vsyncpa [#allocation15], 0 }
   0xd   :  { %17 = vsyncpa [#allocation7], 0 }
   0xe   :  { %19 = vsyncpa [#allocation7 + $0x1], 0  ;;  %s6005_s21 = smov 0   ;;  %s6007_s22 = smov 0  }
   0xf   :  { %s6009_s23 = smov 0   ;;  %s6011_s24 = smov 0  }
  0x10   :  { %s6013_s25 = smov 0   ;;  %s6015_s26 = smov 0  }
  0x11   :  { %s6017_s27 = smov 0   ;;  %s6019_s28 = smov 0  }
  0x12   :  { %s6021_s29 = smov 0   ;;  %s6023_s30 = smov 0  }
  0x13   :  { %s6025_s7 = smov 0  }
  0x14 LB: > { %8571 = sst [smem:[#allocation24_spill]] %s5928_s27  ;;  %s4482_s8 = sadd.s32 4294967295, %s5944_s7   ;;  %s5944_s7 = sphi %s6025_s7, %s25_s7   ;;  %s5940_s30 = sphi %s6023_s30, %s8622_s30   ;;  %s5936_s29 = sphi %s6021_s29, %s8621_s29   ;;  %s5932_s28 = sphi %s6019_s28, %s8620_s28   ;;  %s5928_s27 = sphi %s6017_s27, %s8619_s27   ;;  %s5924_s26 = sphi %s6015_s26, %s8618_s26   ;;  %s5920_s25 = sphi %s6013_s25, %s8617_s25   ;;  %s5916_s24 = sphi %s6011_s24, %s8616_s24   ;;  %s5912_s23 = sphi %s6009_s23, %s8615_s23   ;;  %s5908_s22 = sphi %s6007_s22, %s8614_s22   ;;  %s5904_s21 = sphi %s6005_s21, %s8613_s21  }
  0x15   : > { %8572 = sst [smem:[#allocation25_spill]] %s5932_s28  ;;  %p4484_p0 = scmp.ge.s32.totalorder %s5944_s7, 1 }
  0x16   : > { %p6062_p1 = scmp.eq.s32.totalorder %s4482_s8, 0  ;;  %p6066_p2 = scmp.eq.s32.totalorder %s4482_s8, 3 }
  0x17   : > { %p201_p3 = scmp.lt.s32.totalorder %s5944_s7, 5  ;;  %s5946_s12 = smov [#allocation8]  }
  0x18   : > { %s8573_s9 = scalar_select %p6062_p1, 1, 0 }
  0x19   : > { %s8574_s10 = scalar_select %p6066_p2, 1, 0 }
  0x1a   : > { %p6071_p4 = pnand %p4484_p0, %p201_p3  ;;  %s213_s13 = sshll.u32 %s5946_s12, 4  ;;  %s6075_s13 = int_to_ptr.vmem [resolvable:$true] %s213_s13 }
  0x1b   : > { %8575 = sst [smem:[#allocation26_spill]] %s8574_s10  ;;  %s5947_s15 = smov [#allocation11]  }
  0x1c   : > { %s8576_s11 = scalar_select %p6071_p4, 1, 0 }
  0x1d   : > { %p5427_p5 = pneg %p6071_p4  ;;  %s240_s16 = sshll.u32 %s5947_s15, 4  ;;  %s6085_s16 = int_to_ptr.vmem [resolvable:$true] %s240_s16 }
  0x1e   : > { %8577 = sst [smem:[#allocation27_spill]] %s8576_s11  ;;  %s5948_s17 = smov [#allocation10]  }
  0x1f   : > { %p6081_p6 = pnand %p5427_p5, %p6062_p1  ;;  %s226_s18 = sshll.u32 %s5948_s17, 4  ;;  %s6087_s18 = int_to_ptr.vmem [resolvable:$true] %s226_s18 }
  0x20   : > { %s8579_s1 = sld [smem:[#allocation29_spill]] }
  0x21   : > { %p6097_p8 = pneg %p6081_p6 }
  0x26   : > { %s5668_s8 = scalar_lea.hbm %s8579_s1, 1024 }
  0x27   : > { %p5669_p7 = scmp.ne.s32.totalorder %s8579_s1, %s5668_s8  ;;  %p5675_p11 = scmp.lt.u32.totalorder %s5668_s8, %s8579_s1 }
  0x29   : > { %p5671_p9 = pnand %p6097_p8, %p5669_p7 }
  0x2b   : > { %p5672_p10 = pneg %p5671_p9 }
  0x2d   : > { %p5677_p12 = pnand %p5675_p11, %p5672_p10 }
  0x2f   : > { %5680 = shalt.err (!%p5677_p12)
}
  0x30   : > { %s5681_s6 = scalar_lea.vmem %s6075_s13, 1024  ;;  %p5689_p5 = scmp.lt.s32.totalorder %s6075_s13, %s6075_s13 }
  0x31   : > { %p5682_p13 = scmp.ne.s32.totalorder %s6075_s13, %s5681_s6  ;;  %p5690_p4 = scmp.lt.s32.totalorder %s5681_s6, %s5681_s6 }
  0x33   : > { %p5684_p0 = pnand %p5682_p13, %p6097_p8  ;;  %p5691_p7 = por %p5690_p4, %p5689_p5 }
  0x35   : > { %p5685_p3 = pneg %p5684_p0 }
  0x37   : > { %p5692_p9 = pnand %p5691_p7, %p5685_p3 }
  0x39   : > { %5695 = shalt.err (!%p5692_p9)
}
  0x3a   : > { %s5949_s19 = smov 256   ;;  %s5950_s20 = smov 16  }
  0x3b   : > { %5430 = dma.hbm_to_vmem [thread:$0]  (!%p6081_p6), %s8579_s1, 1024, %s6075_s13, [#allocation9], %s5949_s19, %s5949_s19, %s5950_s20  }
  0x3c   : > { %s8581_s3 = sld [smem:[#allocation31_spill]] }
  0x42   : > { %s5696_s27 = scalar_lea.hbm %s8581_s3, 128 }
  0x43   : > { %p5697_p4 = scmp.ne.s32.totalorder %s8581_s3, %s5696_s27  ;;  %p5703_p12 = scmp.lt.u32.totalorder %s5696_s27, %s8581_s3 }
  0x45   : > { %p5699_p10 = pnand %p5697_p4, %p6097_p8 }
  0x47   : > { %p5700_p11 = pneg %p5699_p10 }
  0x49   : > { %p5705_p13 = pnand %p5703_p12, %p5700_p11 }
  0x4b   : > { %5708 = shalt.err (!%p5705_p13)
}
  0x4c   : > { %s5709_s13 = scalar_lea.vmem %s6085_s16, 128  ;;  %p5717_p7 = scmp.lt.s32.totalorder %s6085_s16, %s6085_s16 }
  0x4d   : > { %p5710_p0 = scmp.ne.s32.totalorder %s6085_s16, %s5709_s13  ;;  %p5718_p9 = scmp.lt.s32.totalorder %s5709_s13, %s5709_s13 }
  0x4f   : > { %p5712_p3 = pnand %p5710_p0, %p6097_p8  ;;  %p5719_p4 = por %p5718_p9, %p5717_p7 }
  0x51   : > { %p5713_p5 = pneg %p5712_p3 }
  0x53   : > { %p5720_p10 = pnand %p5719_p4, %p5713_p5 }
  0x55   : > { %5723 = shalt.err (!%p5720_p10)
}
  0x56   : > { %5436 = dma.hbm_to_vmem [thread:$0]  (!%p6081_p6), %s8581_s3, 128, %s6085_s16, [#allocation12]  }
  0x57   : > { %s8582_s2 = sld [smem:[#allocation30_spill]] }
  0x5d   : > { %s5724_s19 = scalar_lea.hbm %s8582_s2, 256 }
  0x5e   : > { %p5725_p11 = scmp.ne.s32.totalorder %s8582_s2, %s5724_s19  ;;  %p5731_p0 = scmp.lt.u32.totalorder %s5724_s19, %s8582_s2 }
  0x60   : > { %p5727_p12 = pnand %p5725_p11, %p6097_p8 }
  0x62   : > { %p5728_p13 = pneg %p5727_p12 }
  0x64   : > { %p5733_p3 = pnand %p5731_p0, %p5728_p13 }
  0x66   : > { %5736 = shalt.err (!%p5733_p3)
}
  0x67   : > { %s5737_s16 = scalar_lea.vmem %s6087_s18, 256  ;;  %p5745_p4 = scmp.lt.s32.totalorder %s6087_s18, %s6087_s18 }
  0x68   : > { %p5738_p5 = scmp.ne.s32.totalorder %s6087_s18, %s5737_s16  ;;  %p5746_p10 = scmp.lt.s32.totalorder %s5737_s16, %s5737_s16 }
  0x6a   : > { %p5740_p7 = pnand %p5738_p5, %p6097_p8  ;;  %p5747_p11 = por %p5746_p10, %p5745_p4 }
  0x6c   : > { %p5741_p9 = pneg %p5740_p7 }
  0x6e   : > { %p5748_p12 = pnand %p5747_p11, %p5741_p9 }
  0x70   : > { %5751 = shalt.err (!%p5748_p12)
}
  0x71   : > { %s8561_s17 = smov 64   ;;  %s8562_s6 = smov 4  }
  0x72   : > { %5433 = dma.hbm_to_vmem [thread:$0]  (!%p6081_p6), %s8582_s2, 256, %s6087_s18, [#allocation9], %s8561_s17, %s8561_s17, %s8562_s6  }
  0x73   : > { %s5953_s27 = smov [#allocation13]   ;;  %s5954_s11 = smov [#allocation14]  }
  0x74   : > { %s250_s10 = sshll.u32 %s5953_s27, 4  ;;  %s263_s19 = sshll.u32 %s5954_s11, 4  ;;  %s251_s10 = int_to_ptr.vmem [resolvable:$true] %s250_s10  ;;  %s6167_s19 = int_to_ptr.vmem [resolvable:$true] %s263_s19 }
  0x75   : > { %s8583_s4 = sld [smem:[#allocation32_spill]] }
  0x7b   : > { %s5752_s12 = scalar_lea.hbm %s8583_s4, 2048 }
  0x7c   : > { %p5753_p13 = scmp.ne.s32.totalorder %s8583_s4, %s5752_s12  ;;  %p5759_p5 = scmp.lt.u32.totalorder %s5752_s12, %s8583_s4 }
  0x7e   : > { %p5755_p0 = pnand %p5753_p13, %p6097_p8 }
  0x80   : > { %p5756_p3 = pneg %p5755_p0 }
  0x82   : > { %p5761_p7 = pnand %p5759_p5, %p5756_p3 }
  0x84   : > { %5764 = shalt.err (!%p5761_p7)
}
  0x85   : > { %s5765_s0 = scalar_lea.vmem %s251_s10, 2048  ;;  %p5773_p11 = scmp.lt.s32.totalorder %s251_s10, %s251_s10 }
  0x86   : > { %p5766_p9 = scmp.ne.s32.totalorder %s251_s10, %s5765_s0  ;;  %p5774_p12 = scmp.lt.s32.totalorder %s5765_s0, %s5765_s0 }
  0x88   : > { %p5768_p4 = pnand %p5766_p9, %p6097_p8  ;;  %p5775_p2 = por %p5774_p12, %p5773_p11 }
  0x8a   : > { %p5769_p10 = pneg %p5768_p4 }
  0x8c   : > { %p5776_p1 = pnand %p5775_p2, %p5769_p10 }
  0x8e   : > { %5779 = shalt.err (!%p5776_p1)
}
  0x8f   : > { %5439 = dma.hbm_to_vmem [thread:$0]  (!%p6081_p6), %s8583_s4, 2048, %s251_s10, [#allocation12], %s8561_s17, %s8561_s17, %s8562_s6  }
  0x90   : > { %s8584_s5 = sld [smem:[#allocation33_spill]] }
  0x96   : > { %s5780_s12 = scalar_lea.hbm %s8584_s5, 2048 }
  0x97   : > { %p5781_p13 = scmp.ne.s32.totalorder %s8584_s5, %s5780_s12  ;;  %p5787_p0 = scmp.lt.u32.totalorder %s5780_s12, %s8584_s5 }
  0x99   : > { %p5783_p1 = pnand %p5781_p13, %p6097_p8 }
  0x9b   : > { %p5784_p2 = pneg %p5783_p1 }
  0x9d   : > { %p5789_p3 = pnand %p5787_p0, %p5784_p2 }
  0x9f   : > { %5792 = shalt.err (!%p5789_p3)
}
  0xa0   : > { %s5793_s10 = scalar_lea.vmem %s6167_s19, 2048  ;;  %p5801_p4 = scmp.lt.s32.totalorder %s6167_s19, %s6167_s19 }
  0xa1   : > { %p5794_p5 = scmp.ne.s32.totalorder %s6167_s19, %s5793_s10  ;;  %p5802_p10 = scmp.lt.s32.totalorder %s5793_s10, %s5793_s10 }
  0xa3   : > { %p5796_p7 = pnand %p5794_p5, %p6097_p8  ;;  %p5803_p11 = por %p5802_p10, %p5801_p4 }
  0xa5   : > { %p5797_p9 = pneg %p5796_p7 }
  0xa7   : > { %p5804_p12 = pnand %p5803_p11, %p5797_p9 }
  0xa9   : > { %5807 = shalt.err (!%p5804_p12)
}
  0xaa   : > { %5442 = dma.hbm_to_vmem [thread:$0]  (!%p6081_p6), %s8584_s5, 2048, %s6167_s19, [#allocation15], %s8561_s17, %s8561_s17, %s8562_s6  }
  0xab   : > { %s4483_s28 = sadd.s32 4294967294, %s5944_s7   ;;  %s34_s14 = sadd.s32 1, %s5936_s29 }
  0xac   : > { %p35_p8 = scmp.ge.s32.totalorder %s34_s14, 2  ;;  %s37_s11 = sadd.s32 1, %s5940_s30 }
  0xad   : > { %s44_s20 = sadd.s32 1, %s5924_s26  ;;  %p51_p13 = scmp.ne.s32.totalorder %s5924_s26, %s5920_s25 }
  0xae   : > { %s8624_s14 = smov (%p35_p8, %s34_s14), 0  ;;  %s8585_s8 = sld [smem:[#allocation26_spill]] }
  0xaf   : > { %s8626_s11 = smov (!%p35_p8, %s37_s11), %s5940_s30  ;;  %p52_p1 = scmp.eq.s32.totalorder %s5944_s7, 0 }
  0xb0   : > { %p57_p6 = scmp.ne.s32.totalorder %s5920_s25, %s5916_s24  ;;  %p39_p2 = scmp.ge.s32.totalorder %s8626_s11, 2 }
  0xb1   : > { %s173_s19 = ssub.s32 %s5936_s29, %s8624_s14  ;;  %p6230_p0 = por %p52_p1, %p51_p13 }
  0xb2   : > { %p8587_p3 = scmp.ne.s32.totalorder %s8573_s9, 0  ;;  %s8628_s11 = smov (%p39_p2, %s8626_s11), 0 }
  0xb3   : > { %s177_s16 = sadd.s32 1, %s5912_s23  ;;  %p187_p7 = scmp.ne.s32.totalorder %s5912_s23, %s5908_s22 }
  0xb4   : > { %p6236_p5 = por %p8587_p3, %p57_p6  ;;  %s41_s24 = ssub.s32 %s5940_s30, %s8628_s11 }
  0xb5   : > { %p193_p9 = scmp.ne.s32.totalorder %s5908_s22, %s5904_s21  ;;  %p42_p4 = scmp.eq.s32.totalorder %s41_s24, 0 }
  0xb6   : > { %s174_s13 = sor.u32 %s173_s19, %s41_s24  ;;  %p8589_p11 = scmp.ne.s32.totalorder %s8585_s8, 0 }
  0xb7   : > { %p175_p10 = scmp.eq.s32.totalorder %s174_s13, 0  ;;  %p194_p8 = scmp.eq.s32.totalorder %s4483_s28, 3 }
  0xb8   : > { %p6251_p12 = por %p8589_p11, %p187_p7  ;;  %p5456_p13 = scmp.lt.s32.totalorder %s5944_s7, 4 }
  0xb9   : > { %s6256_s10 = scalar_select %p42_p4, %s5924_s26, %s44_s20  }
  0xba   : > { %s8590_s18 = scalar_select %p6251_p12, 1, 0 }
  0xbb   : > { %s6259_s0 = scalar_select %p175_p10, %s5912_s23, %s177_s16  }
  0xbc   : > { %s277_s27 = sand.u32 1, %s5924_s26   ;;  %s5174_s17 = sshll.u32 %s5940_s30, 11 }
  0xbd   : > { %p6264_p1 = por %p194_p8, %p193_p9  ;;  %s4491_s1 = sshll.u32 %s277_s27, 7 }
  0xbe   : > { %s8592_s8 = sld [smem:[#allocation28_spill]]  ;;  %p6275_p6 = pnand %p5456_p13, %p6230_p0 }
  0xbf   : > { %s8591_s6 = scalar_select %p6264_p1, 1, 0 }
  0xc0   : > { %s281_s20 = scalar_lea.vmem [#allocation5], %s4491_s1  ;;  %s6281_s2 = scalar_lea.sflag [#allocation6], %s277_s27 }
  0xc1   : > { %s288_s16 = sshll.u32 %s281_s20, 4  ;;  %p5810_p3 = pneg %p6275_p6  ;;  %s6279_s16 = int_to_ptr.vmem [resolvable:$true] %s288_s16 }
  0xc4   : > { %s6271_s13 = scalar_lea.hbm %s8592_s8, %s5174_s17  ;;  %s5813_s24 = scalar_lea.hbm %s8592_s8, 4096 }
  0xc5   : > { %s5808_s19 = scalar_lea.hbm %s6271_s13, 2048  ;;  %p5814_p0 = scmp.lt.u32.totalorder %s6271_s13, %s8592_s8 }
  0xc6   : > { %p5809_p2 = scmp.ne.s32.totalorder %s6271_s13, %s5808_s19  ;;  %p5815_p4 = scmp.lt.u32.totalorder %s5813_s24, %s5808_s19 }
  0xc7   : > { %p5817_p11 = scmp.lt.u32.totalorder %s5808_s19, %s6271_s13 }
  0xc8   : > { %p5811_p7 = pnand %p5810_p3, %p5809_p2  ;;  %p5816_p10 = por %p5815_p4, %p5814_p0 }
  0xca   : > { %p5812_p9 = pneg %p5811_p7  ;;  %p5818_p8 = por %p5817_p11, %p5816_p10 }
  0xcc   : > { %p5819_p13 = pnand %p5818_p8, %p5812_p9 }
  0xce   : > { %5822 = shalt.err (!%p5819_p13)
}
  0xcf   : > { %s5823_s1 = scalar_lea.vmem %s6279_s16, 2048  ;;  %s5955_s27 = smov [#allocation5]  }
  0xd0   : > { %p5824_p2 = scmp.ne.s32.totalorder %s6279_s16, %s5823_s1  ;;  %s5828_s20 = sshll.u32 %s5955_s27, 4  ;;  %s5829_s20 = int_to_ptr.vmem [resolvable:$false] %s5828_s20 }
  0xd1   : > { %s5830_s3 = scalar_lea.vmem %s5829_s20, 4096  ;;  %p5831_p12 = scmp.lt.s32.totalorder %s6279_s16, %s5829_s20 }
  0xd2   : > { %p5826_p7 = pnand %p5824_p2, %p5810_p3  ;;  %p5832_p0 = scmp.lt.s32.totalorder %s5830_s3, %s5823_s1 }
  0xd4   : > { %p5827_p1 = pneg %p5826_p7  ;;  %p5833_p4 = por %p5832_p0, %p5831_p12 }
  0xd6   : > { %p5834_p10 = pnand %p5833_p4, %p5827_p1 }
  0xd8   : > { %5837 = shalt.err (!%p5834_p10)
}
  0xd9   : > { %s8594_s4 = smov 4   ;;  %s8595_s19 = smov 64  }
  0xda   : > { %5446 = dma.hbm_to_vmem [thread:$0]  (!%p6275_p6), %s6271_s13, 2048, %s6279_s16, %s6281_s2, %s8595_s19, %s8595_s19, %s8594_s4  }
  0xdb   : > { %s8596_s17 = sld [smem:[#allocation27_spill]] }
  0xe1   : > { %p8597_p3 = scmp.ne.s32.totalorder %s8596_s17, 0 }
  0xe2   : > { %s302_s12 = sand.u32 (!%p8597_p3), 1, %s5920_s25  }
  0xe3   : > { %300 = sbr.rel (%p8597_p3) target bundleno = 1236 (0x4d4), region = 44  ;;  %s4495_s24 = sshll.u32 (!%p8597_p3), %s302_s12, 7 }
  0xe4   : > { %s303_s1 = scalar_lea.sflag (!%p8597_p3), [#allocation6], %s302_s12  ;;  %s6315_s27 = scalar_lea.vmem (!%p8597_p3), [#allocation5], %s4495_s24 }
  0xea   : > { %5883 = dma.done.wait (%p6236_p5), %s303_s1, 2048  }
  0xeb   : > { %5885 = vsyncadd (%p6236_p5), %s303_s1, 4294965248  ;;  %p8598_p12 = scmp.ne.s32.totalorder %s8573_s9, 0 }
  0xed   : > { %5887 = dma.done.wait (%p8598_p12), [#allocation9], 1280  }
  0xee   : > { %5889 = vsyncadd (%p8598_p12), [#allocation9], 4294966016 }
  0xef   : > { %5891 = dma.done.wait (%p8598_p12), [#allocation12], 2176  }
  0xf0   : > { %5893 = vsyncadd (%p8598_p12), [#allocation12], 4294965120 }
  0xf1   : > { %5895 = dma.done.wait (%p8598_p12), [#allocation15], 2048  }
  0xf2   : > { %5897 = vsyncadd (%p8598_p12), [#allocation15], 4294965248  ;;  %s352_s2 = sand.u32 1, %s5908_s22   ;;  %s8599_s28 = sld [smem:[#allocation24_spill]] }
  0xf3   : > { %s5395_s15 = smul.u32 640, %s352_s2 }
  0xf5   : > { %s6336_s13 = scalar_lea.vmem [#allocation16], %s5395_s15 }
  0xf8   : > { %p4501_p5 = scmp.ne.s32.totalorder %s8599_s28, 0 }
  0xf9   : > { %vm361_vm0 = vcmask (!%p4501_p5), 257024   ;;  %v5956_v0 = vmov (!%p4501_p5), 0   ;;  %v6740_v1 = vld [vmem:[%s6315_s27] sm:$0xf] (!%p4501_p5)  ;;  %v563_v2 = vld [vmem:[%s6315_s27 + $0x4] sm:$0xf] (!%p4501_p5) }
  0xfa   : > { %360 = sbr.rel (%p4501_p5) target bundleno = 665 (0x299), region = 72  ;;  %362 = vst.msk [vmem:[#allocation2] sm:$0xf] (!%p4501_p5), %vm361_vm0, %v5956_v0  ;;  %363 = vst.msk [vmem:[#allocation2 + $0x4] sm:$0xf] (!%p4501_p5), %vm361_vm0, %v5956_v0  ;;  %vm626_vm1 = vcmask (!%p4501_p5), 1041408  }
  0xfb   : > { %364 = vst.msk [vmem:[#allocation2 + $0x8] sm:$0xf] (!%p4501_p5), %vm361_vm0, %v5956_v0  ;;  %365 = vst.msk [vmem:[#allocation2 + $0xc] sm:$0xf] (!%p4501_p5), %vm361_vm0, %v5956_v0  ;;  %v6744_v3 = vld [vmem:[%s6315_s27 + $0x8] sm:$0xf] (!%p4501_p5) }
  0xfc   : > { %366 = vst.msk [vmem:[#allocation2 + $0x10] sm:$0xf] (!%p4501_p5), %vm361_vm0, %v5956_v0  ;;  %367 = vst.msk [vmem:[#allocation2 + $0x14] sm:$0xf] (!%p4501_p5), %vm361_vm0, %v5956_v0  ;;  %v565_v4 = vld [vmem:[%s6315_s27 + $0xc] sm:$0xf] (!%p4501_p5) }
  0xfd   : > { %368 = vst.msk [vmem:[#allocation2 + $0x18] sm:$0xf] (!%p4501_p5), %vm361_vm0, %v5956_v0  ;;  %369 = vst.msk [vmem:[#allocation2 + $0x1c] sm:$0xf] (!%p4501_p5), %vm361_vm0, %v5956_v0  ;;  %v6748_v5 = vld [vmem:[%s6315_s27 + $0x10] sm:$0xf] (!%p4501_p5) }
  0xfe   : > { %370 = vst.msk [vmem:[#allocation2 + $0x20] sm:$0xf] (!%p4501_p5), %vm361_vm0, %v5956_v0  ;;  %371 = vst.msk [vmem:[#allocation2 + $0x24] sm:$0xf] (!%p4501_p5), %vm361_vm0, %v5956_v0  ;;  %v567_v6 = vld [vmem:[%s6315_s27 + $0x14] sm:$0xf] (!%p4501_p5) }
  0xff   : > { %372 = vst.msk [vmem:[#allocation2 + $0x28] sm:$0xf] (!%p4501_p5), %vm361_vm0, %v5956_v0  ;;  %373 = vst.msk [vmem:[#allocation2 + $0x2c] sm:$0xf] (!%p4501_p5), %vm361_vm0, %v5956_v0  ;;  %v6752_v7 = vld [vmem:[%s6315_s27 + $0x18] sm:$0xf] (!%p4501_p5) }
 0x100   : > { %374 = vst.msk [vmem:[#allocation2 + $0x30] sm:$0xf] (!%p4501_p5), %vm361_vm0, %v5956_v0  ;;  %375 = vst.msk [vmem:[#allocation2 + $0x34] sm:$0xf] (!%p4501_p5), %vm361_vm0, %v5956_v0  ;;  %v569_v8 = vld [vmem:[%s6315_s27 + $0x1c] sm:$0xf] (!%p4501_p5) }
 0x101   : > { %376 = vst.msk [vmem:[#allocation2 + $0x38] sm:$0xf] %vm361_vm0, %v5956_v0  ;;  %377 = vst.msk [vmem:[#allocation2 + $0x3c] sm:$0xf] %vm361_vm0, %v5956_v0  ;;  %v6756_v9 = vld [vmem:[%s6315_s27 + $0x20] sm:$0xf] }
 0x102   : > { %378 = vst.msk [vmem:[#allocation2 + $0x40] sm:$0xf] %vm361_vm0, %v5956_v0  ;;  %379 = vst.msk [vmem:[#allocation2 + $0x44] sm:$0xf] %vm361_vm0, %v5956_v0  ;;  %v571_v10 = vld [vmem:[%s6315_s27 + $0x24] sm:$0xf] }
 0x103   : > { %380 = vst.msk [vmem:[#allocation2 + $0x48] sm:$0xf] %vm361_vm0, %v5956_v0  ;;  %381 = vst.msk [vmem:[#allocation2 + $0x4c] sm:$0xf] %vm361_vm0, %v5956_v0  ;;  %v6760_v11 = vld [vmem:[%s6315_s27 + $0x28] sm:$0xf] }
 0x104   : > { %382 = vst.msk [vmem:[#allocation2 + $0x50] sm:$0xf] %vm361_vm0, %v5956_v0  ;;  %383 = vst.msk [vmem:[#allocation2 + $0x54] sm:$0xf] %vm361_vm0, %v5956_v0  ;;  %vm627_vm2 = vcmask 1045508   ;;  %v629_v12 = vrot.slane %v6740_v1, 6 }
 0x105   : > { %384 = vst.msk [vmem:[#allocation2 + $0x58] sm:$0xf] %vm361_vm0, %v5956_v0  ;;  %385 = vst.msk [vmem:[#allocation2 + $0x5c] sm:$0xf] %vm361_vm0, %v5956_v0  ;;  %v631_v13 = vrot.slane %v563_v2, 6  ;;  %v634_v17 = vrot.slane %v6744_v3, 6 }
 0x106   : > { %386 = vst.msk [vmem:[#allocation2 + $0x60] sm:$0xf] %vm361_vm0, %v5956_v0  ;;  %387 = vst.msk [vmem:[#allocation2 + $0x64] sm:$0xf] %vm361_vm0, %v5956_v0  ;;  %v573_v14 = vld [vmem:[%s6315_s27 + $0x2c] sm:$0xf] }
 0x107   : > { %388 = vst.msk [vmem:[#allocation2 + $0x68] sm:$0xf] %vm361_vm0, %v5956_v0  ;;  %389 = vst.msk [vmem:[#allocation2 + $0x6c] sm:$0xf] %vm361_vm0, %v5956_v0  ;;  %v6765_v15 = vld [vmem:[%s6315_s27 + $0x30] sm:$0xf] }
 0x108   : > { %390 = vst.msk [vmem:[#allocation2 + $0x70] sm:$0xf] %vm361_vm0, %v5956_v0  ;;  %391 = vst.msk [vmem:[#allocation2 + $0x74] sm:$0xf] %vm361_vm0, %v5956_v0  ;;  %v636_v18 = vrot.slane %v565_v4, 6  ;;  %v639_v19 = vrot.slane %v6748_v5, 6 }
 0x109   : > { %392 = vst.msk [vmem:[#allocation2 + $0x78] sm:$0xf] %vm361_vm0, %v5956_v0  ;;  %393 = vst.msk [vmem:[#allocation2 + $0x7c] sm:$0xf] %vm361_vm0, %v5956_v0  ;;  %v641_v20 = vrot.slane %v567_v6, 6  ;;  %v630_v23 = vrot.slane %v629_v12, 4 }
 0x10a   : > { %394 = vst.msk [vmem:[#allocation2 + $0x80] sm:$0xf] %vm361_vm0, %v5956_v0  ;;  %395 = vst.msk [vmem:[#allocation2 + $0x84] sm:$0xf] %vm361_vm0, %v5956_v0  ;;  %v575_v21 = vld [vmem:[%s6315_s27 + $0x34] sm:$0xf] }
 0x10b   : > { %396 = vst.msk [vmem:[#allocation2 + $0x88] sm:$0xf] %vm361_vm0, %v5956_v0  ;;  %397 = vst.msk [vmem:[#allocation2 + $0x8c] sm:$0xf] %vm361_vm0, %v5956_v0  ;;  %v6775_v22 = vld [vmem:[%s6315_s27 + $0x38] sm:$0xf] }
 0x10c   : > { %398 = vst.msk [vmem:[#allocation2 + $0x90] sm:$0xf] %vm361_vm0, %v5956_v0  ;;  %399 = vst.msk [vmem:[#allocation2 + $0x94] sm:$0xf] %vm361_vm0, %v5956_v0  ;;  %v6779_v24 = vrot.slane %v631_v13, 4  ;;  %v644_v25 = vrot.slane %v6752_v7, 6 }
 0x10d   : > { %400 = vst.msk [vmem:[#allocation2 + $0x98] sm:$0xf] %vm361_vm0, %v5956_v0  ;;  %401 = vst.msk [vmem:[#allocation2 + $0x9c] sm:$0xf] %vm361_vm0, %v5956_v0  ;;  %v646_v26 = vrot.slane %v569_v8, 6  ;;  %v635_v28 = vrot.slane %v634_v17, 4 }
 0x10e   : > { %402 = vst.msk [vmem:[#allocation2 + $0xa0] sm:$0xf] %vm361_vm0, %v5956_v0  ;;  %403 = vst.msk [vmem:[#allocation2 + $0xa4] sm:$0xf] %vm361_vm0, %v5956_v0  ;;  %v577_v27 = vld [vmem:[%s6315_s27 + $0x3c] sm:$0xf] }
 0x10f   : > { %404 = vst.msk [vmem:[#allocation2 + $0xa8] sm:$0xf] %vm361_vm0, %v5956_v0  ;;  %405 = vst.msk [vmem:[#allocation2 + $0xac] sm:$0xf] %vm361_vm0, %v5956_v0  ;;  %v6785_v29 = vrot.slane %v636_v18, 4  ;;  %v640_v30 = vrot.slane %v639_v19, 4 }
 0x110   : > { %406 = vst.msk [vmem:[#allocation2 + $0xb0] sm:$0xf] %vm361_vm0, %v5956_v0  ;;  %407 = vst.msk [vmem:[#allocation2 + $0xb4] sm:$0xf] %vm361_vm0, %v5956_v0  ;;  %v6789_v31 = vrot.slane %v641_v20, 4  ;;  %v645_v34 = vrot.slane %v644_v25, 4 }
 0x111   : > { %408 = vst.msk [vmem:[#allocation2 + $0xb8] sm:$0xf] %vm361_vm0, %v5956_v0  ;;  %409 = vst.msk [vmem:[#allocation2 + $0xbc] sm:$0xf] %vm361_vm0, %v5956_v0  ;;  %v6792_v32 = vld [vmem:[%s6315_s27 + $0x40] sm:$0xf] }
 0x112   : > { %410 = vst.msk [vmem:[#allocation2 + $0xc0] sm:$0xf] %vm361_vm0, %v5956_v0  ;;  %411 = vst.msk [vmem:[#allocation2 + $0xc4] sm:$0xf] %vm361_vm0, %v5956_v0  ;;  %v6798_v35 = vrot.slane %v646_v26, 4  ;;  %v649_v36 = vrot.slane %v6756_v9, 6 }
 0x113   : > { %412 = vst.msk [vmem:[#allocation2 + $0xc8] sm:$0xf] %vm361_vm0, %v5956_v0  ;;  %413 = vst.msk [vmem:[#allocation2 + $0xcc] sm:$0xf] %vm361_vm0, %v5956_v0  ;;  %v579_v37 = vld [vmem:[%s6315_s27 + $0x44] sm:$0xf] }
 0x114   : > { %414 = vst.msk [vmem:[#allocation2 + $0xd0] sm:$0xf] %vm361_vm0, %v5956_v0  ;;  %415 = vst.msk [vmem:[#allocation2 + $0xd4] sm:$0xf] %vm361_vm0, %v5956_v0  ;;  %v6803_v38 = vld [vmem:[%s6315_s27 + $0x48] sm:$0xf] }
 0x115   : > { %416 = vst.msk [vmem:[#allocation2 + $0xd8] sm:$0xf] %vm361_vm0, %v5956_v0  ;;  %417 = vst.msk [vmem:[#allocation2 + $0xdc] sm:$0xf] %vm361_vm0, %v5956_v0  ;;  %v651_v41 = vrot.slane %v571_v10, 6  ;;  %v654_v42 = vrot.slane %v6760_v11, 6 }
 0x116   : > { %418 = vst.msk [vmem:[#allocation2 + $0xe0] sm:$0xf] %vm361_vm0, %v5956_v0  ;;  %419 = vst.msk [vmem:[#allocation2 + $0xe4] sm:$0xf] %vm361_vm0, %v5956_v0  ;;  %v581_v43 = vld [vmem:[%s6315_s27 + $0x4c] sm:$0xf] }
 0x117   : > { %420 = vst.msk [vmem:[#allocation2 + $0xe8] sm:$0xf] %vm361_vm0, %v5956_v0  ;;  %421 = vst.msk [vmem:[#allocation2 + $0xec] sm:$0xf] %vm361_vm0, %v5956_v0  ;;  %v6813_v44 = vld [vmem:[%s6315_s27 + $0x50] sm:$0xf] }
 0x118   : > { %422 = vst.msk [vmem:[#allocation2 + $0xf0] sm:$0xf] %vm361_vm0, %v5956_v0  ;;  %423 = vst.msk [vmem:[#allocation2 + $0xf4] sm:$0xf] %vm361_vm0, %v5956_v0  ;;  %v650_v46 = vrot.slane %v649_v36, 4  ;;  %v656_v47 = vrot.slane %v573_v14, 6 }
 0x119   : > { %424 = vst.msk [vmem:[#allocation2 + $0xf8] sm:$0xf] %vm361_vm0, %v5956_v0  ;;  %425 = vst.msk [vmem:[#allocation2 + $0xfc] sm:$0xf] %vm361_vm0, %v5956_v0  ;;  %v659_v48 = vrot.slane %v6765_v15, 6  ;;  %v6826_v51 = vrot.slane %v651_v41, 4 }
 0x11a   : > { %426 = vst.msk [vmem:[#allocation2 + $0x100] sm:$0xf] %vm361_vm0, %v5956_v0  ;;  %427 = vst.msk [vmem:[#allocation2 + $0x104] sm:$0xf] %vm361_vm0, %v5956_v0  ;;  %v583_v49 = vld [vmem:[%s6315_s27 + $0x54] sm:$0xf] }
 0x11b   : > { %428 = vst.msk [vmem:[#allocation2 + $0x108] sm:$0xf] %vm361_vm0, %v5956_v0  ;;  %429 = vst.msk [vmem:[#allocation2 + $0x10c] sm:$0xf] %vm361_vm0, %v5956_v0  ;;  %v6824_v50 = vld [vmem:[%s6315_s27 + $0x58] sm:$0xf] }
 0x11c   : > { %430 = vst.msk [vmem:[#allocation2 + $0x110] sm:$0xf] %vm361_vm0, %v5956_v0  ;;  %431 = vst.msk [vmem:[#allocation2 + $0x114] sm:$0xf] %vm361_vm0, %v5956_v0  ;;  %v655_v52 = vrot.slane %v654_v42, 4  ;;  %v661_v53 = vrot.slane %v575_v21, 6 }
 0x11d   : > { %432 = vst.msk [vmem:[#allocation2 + $0x118] sm:$0xf] %vm361_vm0, %v5956_v0  ;;  %433 = vst.msk [vmem:[#allocation2 + $0x11c] sm:$0xf] %vm361_vm0, %v5956_v0  ;;  %v664_v54 = vrot.slane %v6775_v22, 6  ;;  %v6835_v57 = vrot.slane %v656_v47, 4 }
 0x11e   : > { %434 = vst.msk [vmem:[#allocation2 + $0x120] sm:$0xf] %vm361_vm0, %v5956_v0  ;;  %435 = vst.msk [vmem:[#allocation2 + $0x124] sm:$0xf] %vm361_vm0, %v5956_v0  ;;  %v585_v55 = vld [vmem:[%s6315_s27 + $0x5c] sm:$0xf] }
 0x11f   : > { %436 = vst.msk [vmem:[#allocation2 + $0x128] sm:$0xf] %vm361_vm0, %v5956_v0  ;;  %437 = vst.msk [vmem:[#allocation2 + $0x12c] sm:$0xf] %vm361_vm0, %v5956_v0  ;;  %v660_v58 = vrot.slane %v659_v48, 4  ;;  %v666_v59 = vrot.slane %v577_v27, 6 }
 0x120   : > { %438 = vst.msk [vmem:[#allocation2 + $0x130] sm:$0xf] %vm361_vm0, %v5956_v0  ;;  %439 = vst.msk [vmem:[#allocation2 + $0x134] sm:$0xf] %vm361_vm0, %v5956_v0  ;;  %v6840_v60 = vld [vmem:[%s6315_s27 + $0x60] sm:$0xf] }
 0x121   : > { %440 = vst.msk [vmem:[#allocation2 + $0x138] sm:$0xf] %vm361_vm0, %v5956_v0  ;;  %441 = vst.msk [vmem:[#allocation2 + $0x13c] sm:$0xf] %vm361_vm0, %v5956_v0  ;;  %v6844_v62 = vrot.slane %v661_v53, 4  ;;  %v665_v63 = vrot.slane %v664_v54, 4 }
 0x122   : > { %442 = vst.msk [vmem:[#allocation2 + $0x140] sm:$0xf] %vm361_vm0, %v5956_v0  ;;  %443 = vst.msk [vmem:[#allocation2 + $0x144] sm:$0xf] %vm361_vm0, %v5956_v0  ;;  %v587_v2 = vld [vmem:[%s6315_s27 + $0x64] sm:$0xf] }
 0x123   : > { %444 = vst.msk [vmem:[#allocation2 + $0x148] sm:$0xf] %vm361_vm0, %v5956_v0  ;;  %445 = vst.msk [vmem:[#allocation2 + $0x14c] sm:$0xf] %vm361_vm0, %v5956_v0  ;;  %v6852_v4 = vld [vmem:[%s6315_s27 + $0x68] sm:$0xf] }
 0x124   : > { %446 = vst.msk [vmem:[#allocation2 + $0x150] sm:$0xf] %vm361_vm0, %v5956_v0  ;;  %447 = vst.msk [vmem:[#allocation2 + $0x154] sm:$0xf] %vm361_vm0, %v5956_v0  ;;  %v6856_v8 = vrot.slane %v666_v59, 4  ;;  %v671_v10 = vrot.slane %v579_v37, 6 }
 0x125   : > { %448 = vst.msk [vmem:[#allocation2 + $0x158] sm:$0xf] %vm361_vm0, %v5956_v0  ;;  %449 = vst.msk [vmem:[#allocation2 + $0x15c] sm:$0xf] %vm361_vm0, %v5956_v0  ;;  %v589_v14 = vld [vmem:[%s6315_s27 + $0x6c] sm:$0xf] }
 0x126   : > { %450 = vst.msk [vmem:[#allocation2 + $0x160] sm:$0xf] %vm361_vm0, %v5956_v0  ;;  %451 = vst.msk [vmem:[#allocation2 + $0x164] sm:$0xf] %vm361_vm0, %v5956_v0  ;;  %v676_v21 = vrot.slane %v581_v43, 6  ;;  %v6868_v27 = vrot.slane %v671_v10, 4 }
 0x127   : > { %452 = vst.msk [vmem:[#allocation2 + $0x168] sm:$0xf] %vm361_vm0, %v5956_v0  ;;  %453 = vst.msk [vmem:[#allocation2 + $0x16c] sm:$0xf] %vm361_vm0, %v5956_v0  ;;  %v592_v43 = vld [vmem:[%s6315_s27 + $0x78] sm:$0xf] }
 0x128   : > { %454 = vst.msk [vmem:[#allocation2 + $0x170] sm:$0xf] %vm361_vm0, %v5956_v0  ;;  %455 = vst.msk [vmem:[#allocation2 + $0x174] sm:$0xf] %vm361_vm0, %v5956_v0  ;;  %vm758_vm4 = vcmask 257026   ;;  %vm761_vm5 = vcmask 254976  }
 0x129   : > { %456 = vst.msk [vmem:[#allocation2 + $0x178] sm:$0xf] %vm361_vm0, %v5956_v0  ;;  %457 = vst.msk [vmem:[#allocation2 + $0x17c] sm:$0xf] %vm361_vm0, %v5956_v0  ;;  %v5957_v3 = vmov 0.0   ;;  %v5575_v5 = vld [vmem:[#allocation10 + $0x8] sm:$0xff]  }
 0x12a   : > { %458 = vst.msk [vmem:[#allocation2 + $0x180] sm:$0xf] %vm361_vm0, %v5956_v0  ;;  %459 = vst.msk [vmem:[#allocation2 + $0x184] sm:$0xf] %vm361_vm0, %v5956_v0  ;;  %5387 = vmatprep.subr.bf16.mxu0 %v5957_v3  ;;  %vm5958_vm6 = vmmov 0   ;;  %v5178_v7 = vld [vmem:[%s6315_s27] sm:$0xff]  }
 0x12b   : > { %460 = vst.msk [vmem:[#allocation2 + $0x188] sm:$0xf] %vm361_vm0, %v5956_v0  ;;  %461 = vst.msk [vmem:[#allocation2 + $0x18c] sm:$0xf] %vm361_vm0, %v5956_v0  ;;  %5391 = vmatprep.mubr.msk.bf16.mxu0 %vm5958_vm6, %v5957_v3  ;;  %v5241_v9 = vld [vmem:[%s6315_s27 + $0x8] sm:$0xff]   ;;  %v5179_v11 = vunpack.c.l.bf16 %v5178_v7  ;;  %v5242_v16 = vld [vmem:[%s6315_s27 + $0x10] sm:$0xff]  }
 0x12c   : > { %462 = vst.msk [vmem:[#allocation2 + $0x190] sm:$0xf] %vm361_vm0, %v5956_v0  ;;  %463 = vst.msk [vmem:[#allocation2 + $0x194] sm:$0xf] %vm361_vm0, %v5956_v0  ;;  %v5183_v15 = vunpack.c.l.bf16 %v5241_v9  ;;  %vm872_vm7 = vcmask 261120  }
 0x12d   : > { %464 = vst.msk [vmem:[#allocation2 + $0x198] sm:$0xf] %vm361_vm0, %v5956_v0  ;;  %465 = vst.msk [vmem:[#allocation2 + $0x19c] sm:$0xf] %vm361_vm0, %v5956_v0  ;;  %v873_v22 = vsel %vm872_vm7, %v5179_v11, 0.0 }
 0x12e   : > { %466 = vst.msk [vmem:[#allocation2 + $0x1a0] sm:$0xf] %vm361_vm0, %v5956_v0  ;;  %467 = vst.msk [vmem:[#allocation2 + $0x1a4] sm:$0xf] %vm361_vm0, %v5956_v0 }
 0x12f   : > { %468 = vst.msk [vmem:[#allocation2 + $0x1a8] sm:$0xf] %vm361_vm0, %v5956_v0  ;;  %469 = vst.msk [vmem:[#allocation2 + $0x1ac] sm:$0xf] %vm361_vm0, %v5956_v0 }
 0x130   : > { %470 = vst.msk [vmem:[#allocation2 + $0x1b0] sm:$0xf] %vm361_vm0, %v5956_v0  ;;  %471 = vst.msk [vmem:[#allocation2 + $0x1b4] sm:$0xf] %vm361_vm0, %v5956_v0 }
 0x131   : > { %472 = vst.msk [vmem:[#allocation2 + $0x1b8] sm:$0xf] %vm361_vm0, %v5956_v0  ;;  %473 = vst.msk [vmem:[#allocation2 + $0x1bc] sm:$0xf] %vm361_vm0, %v5956_v0 }
 0x132   : > { %474 = vst.msk [vmem:[#allocation2 + $0x1c0] sm:$0xf] %vm361_vm0, %v5956_v0  ;;  %475 = vst.msk [vmem:[#allocation2 + $0x1c4] sm:$0xf] %vm361_vm0, %v5956_v0 }
 0x133   : > { %476 = vst.msk [vmem:[#allocation2 + $0x1c8] sm:$0xf] %vm361_vm0, %v5956_v0  ;;  %477 = vst.msk [vmem:[#allocation2 + $0x1cc] sm:$0xf] %vm361_vm0, %v5956_v0 }
 0x134   : > { %478 = vst.msk [vmem:[#allocation2 + $0x1d0] sm:$0xf] %vm361_vm0, %v5956_v0  ;;  %479 = vst.msk [vmem:[#allocation2 + $0x1d4] sm:$0xf] %vm361_vm0, %v5956_v0 }
 0x135   : > { %480 = vst.msk [vmem:[#allocation2 + $0x1d8] sm:$0xf] %vm361_vm0, %v5956_v0  ;;  %481 = vst.msk [vmem:[#allocation2 + $0x1dc] sm:$0xf] %vm361_vm0, %v5956_v0 }
 0x136   : > { %482 = vst.msk [vmem:[#allocation2 + $0x1e0] sm:$0xf] %vm361_vm0, %v5956_v0  ;;  %483 = vst.msk [vmem:[#allocation2 + $0x1e4] sm:$0xf] %vm361_vm0, %v5956_v0 }
 0x137   : > { %484 = vst.msk [vmem:[#allocation2 + $0x1e8] sm:$0xf] %vm361_vm0, %v5956_v0  ;;  %485 = vst.msk [vmem:[#allocation2 + $0x1ec] sm:$0xf] %vm361_vm0, %v5956_v0 }
 0x138   : > { %486 = vst.msk [vmem:[#allocation2 + $0x1f0] sm:$0xf] %vm361_vm0, %v5956_v0  ;;  %487 = vst.msk [vmem:[#allocation2 + $0x1f4] sm:$0xf] %vm361_vm0, %v5956_v0 }
 0x139   : > { %488 = vst.msk [vmem:[#allocation2 + $0x1f8] sm:$0xf] %vm361_vm0, %v5956_v0  ;;  %489 = vst.msk [vmem:[#allocation2 + $0x1fc] sm:$0xf] %vm361_vm0, %v5956_v0 }
 0x13a   : > { %490 = vst.msk [vmem:[#allocation2 + $0x200] sm:$0xf] %vm361_vm0, %v5956_v0  ;;  %491 = vst.msk [vmem:[#allocation2 + $0x204] sm:$0xf] %vm361_vm0, %v5956_v0 }
 0x13b   : > { %492 = vst.msk [vmem:[#allocation2 + $0x208] sm:$0xf] %vm361_vm0, %v5956_v0  ;;  %493 = vst.msk [vmem:[#allocation2 + $0x20c] sm:$0xf] %vm361_vm0, %v5956_v0 }
 0x13c   : > { %494 = vst.msk [vmem:[#allocation2 + $0x210] sm:$0xf] %vm361_vm0, %v5956_v0  ;;  %495 = vst.msk [vmem:[#allocation2 + $0x214] sm:$0xf] %vm361_vm0, %v5956_v0 }
 0x13d   : > { %496 = vst.msk [vmem:[#allocation2 + $0x218] sm:$0xf] %vm361_vm0, %v5956_v0  ;;  %497 = vst.msk [vmem:[#allocation2 + $0x21c] sm:$0xf] %vm361_vm0, %v5956_v0 }
 0x13e   : > { %498 = vst.msk [vmem:[#allocation2 + $0x220] sm:$0xf] %vm361_vm0, %v5956_v0  ;;  %499 = vst.msk [vmem:[#allocation2 + $0x224] sm:$0xf] %vm361_vm0, %v5956_v0 }
 0x13f   : > { %500 = vst.msk [vmem:[#allocation2 + $0x228] sm:$0xf] %vm361_vm0, %v5956_v0  ;;  %501 = vst.msk [vmem:[#allocation2 + $0x22c] sm:$0xf] %vm361_vm0, %v5956_v0 }
 0x140   : > { %502 = vst.msk [vmem:[#allocation2 + $0x230] sm:$0xf] %vm361_vm0, %v5956_v0  ;;  %503 = vst.msk [vmem:[#allocation2 + $0x234] sm:$0xf] %vm361_vm0, %v5956_v0 }
 0x141   : > { %504 = vst.msk [vmem:[#allocation2 + $0x238] sm:$0xf] %vm361_vm0, %v5956_v0  ;;  %505 = vst.msk [vmem:[#allocation2 + $0x23c] sm:$0xf] %vm361_vm0, %v5956_v0 }
 0x142   : > { %506 = vst.msk [vmem:[#allocation2 + $0x240] sm:$0xf] %vm361_vm0, %v5956_v0  ;;  %507 = vst.msk [vmem:[#allocation2 + $0x244] sm:$0xf] %vm361_vm0, %v5956_v0 }
 0x143   : > { %508 = vst.msk [vmem:[#allocation2 + $0x248] sm:$0xf] %vm361_vm0, %v5956_v0  ;;  %509 = vst.msk [vmem:[#allocation2 + $0x24c] sm:$0xf] %vm361_vm0, %v5956_v0 }
 0x144   : > { %510 = vst.msk [vmem:[#allocation2 + $0x250] sm:$0xf] %vm361_vm0, %v5956_v0  ;;  %511 = vst.msk [vmem:[#allocation2 + $0x254] sm:$0xf] %vm361_vm0, %v5956_v0 }
 0x145   : > { %512 = vst.msk [vmem:[#allocation2 + $0x258] sm:$0xf] %vm361_vm0, %v5956_v0  ;;  %513 = vst.msk [vmem:[#allocation2 + $0x25c] sm:$0xf] %vm361_vm0, %v5956_v0 }
 0x146   : > { %514 = vst.msk [vmem:[#allocation2 + $0x260] sm:$0xf] %vm361_vm0, %v5956_v0  ;;  %515 = vst.msk [vmem:[#allocation2 + $0x264] sm:$0xf] %vm361_vm0, %v5956_v0 }
 0x147   : > { %516 = vst.msk [vmem:[#allocation2 + $0x268] sm:$0xf] %vm361_vm0, %v5956_v0  ;;  %517 = vst.msk [vmem:[#allocation2 + $0x26c] sm:$0xf] %vm361_vm0, %v5956_v0 }
 0x148   : > { %518 = vst.msk [vmem:[#allocation2 + $0x270] sm:$0xf] %vm361_vm0, %v5956_v0  ;;  %519 = vst.msk [vmem:[#allocation2 + $0x274] sm:$0xf] %vm361_vm0, %v5956_v0 }
 0x149   : > { %520 = vst.msk [vmem:[#allocation2 + $0x278] sm:$0xf] %vm361_vm0, %v5956_v0  ;;  %521 = vst.msk [vmem:[#allocation2 + $0x27c] sm:$0xf] %vm361_vm0, %v5956_v0 }
 0x14a   : > { %522 = vst.msk [vmem:[#allocation2 + $0x280] sm:$0xf] %vm361_vm0, %v5956_v0  ;;  %523 = vst.msk [vmem:[#allocation2 + $0x284] sm:$0xf] %vm361_vm0, %v5956_v0 }
 0x14b   : > { %524 = vst.msk [vmem:[#allocation2 + $0x288] sm:$0xf] %vm361_vm0, %v5956_v0  ;;  %525 = vst.msk [vmem:[#allocation2 + $0x28c] sm:$0xf] %vm361_vm0, %v5956_v0 }
 0x14c   : > { %526 = vst.msk [vmem:[#allocation2 + $0x290] sm:$0xf] %vm361_vm0, %v5956_v0  ;;  %527 = vst.msk [vmem:[#allocation2 + $0x294] sm:$0xf] %vm361_vm0, %v5956_v0 }
 0x14d   : > { %528 = vst.msk [vmem:[#allocation2 + $0x298] sm:$0xf] %vm361_vm0, %v5956_v0  ;;  %529 = vst.msk [vmem:[#allocation2 + $0x29c] sm:$0xf] %vm361_vm0, %v5956_v0 }
 0x14e   : > { %530 = vst.msk [vmem:[#allocation2 + $0x2a0] sm:$0xf] %vm361_vm0, %v5956_v0  ;;  %531 = vst.msk [vmem:[#allocation2 + $0x2a4] sm:$0xf] %vm361_vm0, %v5956_v0 }
 0x14f   : > { %532 = vst.msk [vmem:[#allocation2 + $0x2a8] sm:$0xf] %vm361_vm0, %v5956_v0  ;;  %533 = vst.msk [vmem:[#allocation2 + $0x2ac] sm:$0xf] %vm361_vm0, %v5956_v0 }
 0x150   : > { %534 = vst.msk [vmem:[#allocation2 + $0x2b0] sm:$0xf] %vm361_vm0, %v5956_v0  ;;  %535 = vst.msk [vmem:[#allocation2 + $0x2b4] sm:$0xf] %vm361_vm0, %v5956_v0 }
 0x151   : > { %536 = vst.msk [vmem:[#allocation2 + $0x2b8] sm:$0xf] %vm361_vm0, %v5956_v0  ;;  %537 = vst.msk [vmem:[#allocation2 + $0x2bc] sm:$0xf] %vm361_vm0, %v5956_v0 }
 0x152   : > { %538 = vst.msk [vmem:[#allocation2 + $0x2c0] sm:$0xf] %vm361_vm0, %v5956_v0  ;;  %539 = vst.msk [vmem:[#allocation2 + $0x2c4] sm:$0xf] %vm361_vm0, %v5956_v0 }
 0x153   : > { %540 = vst.msk [vmem:[#allocation2 + $0x2c8] sm:$0xf] %vm361_vm0, %v5956_v0  ;;  %541 = vst.msk [vmem:[#allocation2 + $0x2cc] sm:$0xf] %vm361_vm0, %v5956_v0 }
 0x154   : > { %542 = vst.msk [vmem:[#allocation2 + $0x2d0] sm:$0xf] %vm361_vm0, %v5956_v0  ;;  %543 = vst.msk [vmem:[#allocation2 + $0x2d4] sm:$0xf] %vm361_vm0, %v5956_v0 }
 0x155   : > { %544 = vst.msk [vmem:[#allocation2 + $0x2d8] sm:$0xf] %vm361_vm0, %v5956_v0  ;;  %545 = vst.msk [vmem:[#allocation2 + $0x2dc] sm:$0xf] %vm361_vm0, %v5956_v0 }
 0x156   : > { %546 = vst.msk [vmem:[#allocation2 + $0x2e0] sm:$0xf] %vm361_vm0, %v5956_v0  ;;  %547 = vst.msk [vmem:[#allocation2 + $0x2e4] sm:$0xf] %vm361_vm0, %v5956_v0 }
 0x157   : > { %548 = vst.msk [vmem:[#allocation2 + $0x2e8] sm:$0xf] %vm361_vm0, %v5956_v0  ;;  %549 = vst.msk [vmem:[#allocation2 + $0x2ec] sm:$0xf] %vm361_vm0, %v5956_v0 }
 0x158   : > { %550 = vst.msk [vmem:[#allocation2 + $0x2f0] sm:$0xf] %vm361_vm0, %v5956_v0  ;;  %551 = vst.msk [vmem:[#allocation2 + $0x2f4] sm:$0xf] %vm361_vm0, %v5956_v0 }
 0x159   : > { %552 = vst.msk [vmem:[#allocation2 + $0x2f8] sm:$0xf] %vm361_vm0, %v5956_v0  ;;  %553 = vst.msk [vmem:[#allocation2 + $0x2fc] sm:$0xf] %vm361_vm0, %v5956_v0 }
 0x15a   : > { %554 = vst.msk [vmem:[#allocation2 + $0x300] sm:$0xf] %vm361_vm0, %v5956_v0  ;;  %555 = vst.msk [vmem:[#allocation2 + $0x304] sm:$0xf] %vm361_vm0, %v5956_v0 }
 0x15b   : > { %556 = vst.msk [vmem:[#allocation2 + $0x308] sm:$0xf] %vm361_vm0, %v5956_v0  ;;  %557 = vst.msk [vmem:[#allocation2 + $0x30c] sm:$0xf] %vm361_vm0, %v5956_v0 }
 0x15c   : > { %558 = vst.msk [vmem:[#allocation2 + $0x310] sm:$0xf] %vm361_vm0, %v5956_v0  ;;  %559 = vst.msk [vmem:[#allocation2 + $0x314] sm:$0xf] %vm361_vm0, %v5956_v0 }
 0x15d   : > { %560 = vst.msk [vmem:[#allocation2 + $0x318] sm:$0xf] %vm361_vm0, %v5956_v0  ;;  %561 = vst.msk [vmem:[#allocation2 + $0x31c] sm:$0xf] %vm361_vm0, %v5956_v0  ;;  %v669_v0 = vrot.slane %v6792_v32, 6  ;;  %v5188_v32 = vunpack.c.h.bf16 %v5242_v16 }
 0x15e   : > { %vm6767_vm3 = vmor %vm626_vm1, %vm627_vm2  ;;  %759 = vst.msk [vmem:[#allocation2 + $0xf4] sm:$0xc] %vm758_vm4, %v629_v12  ;;  %v5180_v12 = vunpack.c.h.bf16 %v5178_v7 }
 0x15f   : > { %v632_v33 = vsel %vm6767_vm3, %v630_v23, %v631_v13  ;;  %v637_v39 = vsel %vm6767_vm3, %v635_v28, %v636_v18  ;;  %v642_v40 = vsel %vm6767_vm3, %v640_v30, %v641_v20  ;;  %v647_v45 = vsel %vm6767_vm3, %v645_v34, %v646_v26  ;;  %v590_v26 = vld [vmem:[%s6315_s27 + $0x70] sm:$0xf]  ;;  %v591_v34 = vld [vmem:[%s6315_s27 + $0x74] sm:$0xf]  ;;  %763 = vst.msk [vmem:[#allocation2 + $0x108] sm:$0xc] %vm758_vm4, %v634_v17 }
 0x160   : > { %760 = vst.msk [vmem:[#allocation2 + $0xf8] sm:$0xf] %vm361_vm0, %v632_v33  ;;  %764 = vst.msk [vmem:[#allocation2 + $0x10c] sm:$0xf] %vm361_vm0, %v637_v39  ;;  %v652_v56 = vsel %vm6767_vm3, %v650_v46, %v651_v41  ;;  %v657_v61 = vsel %vm6767_vm3, %v655_v52, %v656_v47  ;;  %v662_v6 = vsel %vm6767_vm3, %v660_v58, %v661_v53  ;;  %v674_v13 = vrot.slane %v6803_v38, 6 }
 0x161   : > { %767 = vst.msk [vmem:[#allocation2 + $0x120] sm:$0xf] %vm361_vm0, %v642_v40  ;;  %770 = vst.msk [vmem:[#allocation2 + $0x134] sm:$0xf] %vm361_vm0, %v647_v45  ;;  %v667_v18 = vsel %vm6767_vm3, %v665_v63, %v666_v59  ;;  %v670_v20 = vrot.slane %v669_v0, 4  ;;  %v679_v23 = vrot.slane %v6813_v44, 6  ;;  %v5184_v17 = vunpack.c.h.bf16 %v5241_v9 }
 0x162   : > { %773 = vst.msk [vmem:[#allocation2 + $0x148] sm:$0xf] %vm361_vm0, %v652_v56  ;;  %776 = vst.msk [vmem:[#allocation2 + $0x15c] sm:$0xf] %vm361_vm0, %v657_v61  ;;  %v675_v28 = vrot.slane %v674_v13, 4  ;;  %v681_v30 = vrot.slane %v583_v49, 6 }
 0x163   : > { %779 = vst.msk [vmem:[#allocation2 + $0x170] sm:$0xf] %vm361_vm0, %v662_v6  ;;  %v684_v33 = vrot.slane %v6824_v50, 6  ;;  %782 = vst.msk [vmem:[#allocation2 + $0x184] sm:$0xf] %vm361_vm0, %v667_v18  ;;  %v672_v37 = vsel %vm6767_vm3, %v670_v20, %v671_v10  ;;  %v6877_v39 = vrot.slane %v676_v21, 4 }
 0x164   : > { %v680_v40 = vrot.slane %v679_v23, 4  ;;  %v686_v41 = vrot.slane %v585_v55, 6  ;;  %v677_v44 = vsel %vm6767_vm3, %v675_v28, %v676_v21  ;;  %v683_v45 = vrot.slane %v681_v30, 4  ;;  %785 = vst.msk [vmem:[#allocation2 + $0x198] sm:$0xf] %vm361_vm0, %v672_v37  ;;  %v5574_v21 = vld [vmem:[#allocation10] sm:$0xff]  }
 0x165   : > { %v685_v46 = vrot.slane %v684_v33, 4  ;;  %v689_v47 = vrot.slane %v6840_v60, 6  ;;  %v593_v49 = vld [vmem:[%s6315_s27 + $0x7c] sm:$0xf]  ;;  %v691_v53 = vrot.slane %v587_v2, 6  ;;  %v694_v56 = vrot.slane %v6852_v4, 6  ;;  %5388 = vmatpush3.bf16.msra.mxu0 %v5574_v21 }
 0x166   : > { %v682_v50 = vsel %vm6767_vm3, %v680_v40, %v681_v30  ;;  %v688_v52 = vrot.slane %v686_v41, 4  ;;  %788 = vst.msk [vmem:[#allocation2 + $0x1ac] sm:$0xf] %vm361_vm0, %v677_v44  ;;  %v696_v59 = vrot.slane %v589_v14, 6  ;;  %v699_v61 = vrot.slane %v590_v26, 6  ;;  %5389 = vmatprep.subr.bf16.mxu0 %v5957_v3 }
 0x167   : > { %v687_v55 = vsel %vm6767_vm3, %v685_v46, %v686_v41  ;;  %v690_v58 = vrot.slane %v689_v47, 4  ;;  %791 = vst.msk [vmem:[#allocation2 + $0x1c0] sm:$0xf] %vm361_vm0, %v682_v50  ;;  %v693_v60 = vrot.slane %v691_v53, 4  ;;  %v695_v63 = vrot.slane %v694_v56, 4  ;;  %v5246_v41 = vld [vmem:[%s6315_s27 + $0x30] sm:$0xff]  }
 0x168   : > { %v701_v6 = vrot.slane %v591_v34, 6  ;;  %v704_v10 = vrot.slane %v592_v43, 6  ;;  %794 = vst.msk [vmem:[#allocation2 + $0x1d4] sm:$0xf] %vm361_vm0, %v687_v55  ;;  %v698_v4 = vrot.slane %v696_v59, 4  ;;  %v700_v18 = vrot.slane %v699_v61, 4 }
 0x169   : > { %v692_v2 = vsel %vm6767_vm3, %v690_v58, %v691_v53  ;;  %v706_v20 = vrot.slane %v593_v49, 6  ;;  %v697_v28 = vsel %vm6767_vm3, %v695_v63, %v696_v59  ;;  %766 = vst.msk [vmem:[#allocation2 + $0x11c] sm:$0xc] %vm758_vm4, %v639_v19  ;;  %769 = vst.msk [vmem:[#allocation2 + $0x130] sm:$0xc] %vm758_vm4, %v644_v25  ;;  %5390 = vmatpush3.bf16.msra.mxu0 %v5575_v5  ;;  %v5187_v19 = vunpack.c.l.bf16 %v5242_v16  ;;  %v5247_v50 = vld [vmem:[%s6315_s27 + $0x38] sm:$0xff]  }
 0x16a   : > { %v703_v14 = vrot.slane %v701_v6, 4  ;;  %v705_v26 = vrot.slane %v704_v10, 4  ;;  %797 = vst.msk [vmem:[#allocation2 + $0x1e8] sm:$0xf] %vm361_vm0, %v692_v2  ;;  %v702_v30 = vsel %vm6767_vm3, %v700_v18, %v701_v6  ;;  %800 = vst.msk [vmem:[#allocation2 + $0x1fc] sm:$0xf] %vm361_vm0, %v697_v28  ;;  %v5204_v53 = vunpack.c.h.bf16 %v5246_v41 }
 0x16b   : > { %v708_v34 = vrot.slane %v706_v20, 4  ;;  %772 = vst.msk [vmem:[#allocation2 + $0x144] sm:$0xc] %vm758_vm4, %v649_v36  ;;  %775 = vst.msk [vmem:[#allocation2 + $0x158] sm:$0xc] %vm758_vm4, %v654_v42  ;;  %v876_v25 = vsel %vm872_vm7, %v5183_v15, 0.0  ;;  %v5207_v58 = vunpack.c.l.bf16 %v5247_v50  ;;  %v5208_v63 = vunpack.c.h.bf16 %v5247_v50 }
 0x16c   : > { %778 = vst.msk [vmem:[#allocation2 + $0x16c] sm:$0xc] %vm758_vm4, %v659_v48  ;;  %781 = vst.msk [vmem:[#allocation2 + $0x180] sm:$0xc] %vm758_vm4, %v664_v54  ;;  %v707_v1 = vsel %vm6767_vm3, %v705_v26, %v706_v20  ;;  %v880_v42 = vsel %vm872_vm7, %v5187_v19, 0.0  ;;  %v5244_v48 = vld [vmem:[%s6315_s27 + $0x20] sm:$0xff]  }
 0x16d   : > { %784 = vst.msk [vmem:[#allocation2 + $0x194] sm:$0xc] %vm758_vm4, %v669_v0  ;;  %787 = vst.msk [vmem:[#allocation2 + $0x1a8] sm:$0xc] %vm758_vm4, %v674_v13  ;;  %v5195_v0 = vunpack.c.l.bf16 %v5244_v48  ;;  %v5245_v13 = vld [vmem:[%s6315_s27 + $0x28] sm:$0xff]   ;;  %v898_v6 = vsel %vm872_vm7, %v5204_v53, 0.0 }
 0x16e   : > { %790 = vst.msk [vmem:[#allocation2 + $0x1bc] sm:$0xc] %vm758_vm4, %v679_v23  ;;  %793 = vst.msk [vmem:[#allocation2 + $0x1d0] sm:$0xc] %vm758_vm4, %v684_v33  ;;  %v5200_v44 = vunpack.c.h.bf16 %v5245_v13  ;;  %v5249_v18 = vld [vmem:[%s6315_s27 + $0x48] sm:$0xff]   ;;  %v902_v28 = vsel %vm872_vm7, %v5208_v63, 0.0 }
 0x16f   : > { %796 = vst.msk [vmem:[#allocation2 + $0x1e4] sm:$0xc] %vm758_vm4, %v689_v47  ;;  %799 = vst.msk [vmem:[#allocation2 + $0x1f8] sm:$0xc] %vm758_vm4, %v694_v56  ;;  %v888_v40 = vsel %vm872_vm7, %v5195_v0, 0.0  ;;  %v5203_v47 = vunpack.c.l.bf16 %v5246_v41  ;;  %v5215_v26 = vunpack.c.l.bf16 %v5249_v18  ;;  %v5216_v3 = vunpack.c.h.bf16 %v5249_v18 }
 0x170   : > { %802 = vst.msk [vmem:[#allocation2 + $0x20c] sm:$0xc] %vm758_vm4, %v699_v61  ;;  %805 = vst.msk [vmem:[#allocation2 + $0x220] sm:$0xc] %vm758_vm4, %v704_v10  ;;  %v894_v56 = vsel %vm872_vm7, %v5200_v44, 0.0  ;;  %v5248_v61 = vld [vmem:[%s6315_s27 + $0x40] sm:$0xff]  }
 0x171   : > { %762 = vst.msk [vmem:[#allocation2 + $0xfc] sm:$0x3] %vm761_vm5, %v6779_v24  ;;  %765 = vst.msk [vmem:[#allocation2 + $0x110] sm:$0x3] %vm761_vm5, %v6785_v29  ;;  %v874_v24 = vsel %vm872_vm7, %v5180_v12, 0.0  ;;  %v5243_v29 = vld [vmem:[%s6315_s27 + $0x18] sm:$0xff]   ;;  %v5211_v2 = vunpack.c.l.bf16 %v5248_v61  ;;  %v5212_v21 = vunpack.c.h.bf16 %v5248_v61 }
 0x172   : > { %768 = vst.msk [vmem:[#allocation2 + $0x124] sm:$0x3] %vm761_vm5, %v6789_v31  ;;  %771 = vst.msk [vmem:[#allocation2 + $0x138] sm:$0x3] %vm761_vm5, %v6798_v35  ;;  %v875_v31 = vadd.f32 %v874_v24, %v873_v22  ;;  %v878_v35 = vsel %vm872_vm7, %v5184_v17, 0.0  ;;  %v5191_v38 = vunpack.c.l.bf16 %v5243_v29  ;;  %v5192_v54 = vunpack.c.h.bf16 %v5243_v29  ;;  %v5251_v12 = vld [vmem:[%s6315_s27 + $0x58] sm:$0xff]  }
 0x173   : > { %774 = vst.msk [vmem:[#allocation2 + $0x14c] sm:$0x3] %vm761_vm5, %v6826_v51  ;;  %777 = vst.msk [vmem:[#allocation2 + $0x160] sm:$0x3] %vm761_vm5, %v6835_v57  ;;  %v882_v57 = vsel %vm872_vm7, %v5188_v32, 0.0  ;;  %v896_v59 = vsel %vm872_vm7, %v5203_v47, 0.0  ;;  %v5223_v22 = vunpack.c.l.bf16 %v5251_v12 }
 0x174   : > { %780 = vst.msk [vmem:[#allocation2 + $0x174] sm:$0x3] %vm761_vm5, %v6844_v62  ;;  %783 = vst.msk [vmem:[#allocation2 + $0x188] sm:$0x3] %vm761_vm5, %v6856_v8  ;;  %v877_v36 = vadd.f32 %v876_v25, %v875_v31  ;;  %v884_v8 = vsel %vm872_vm7, %v5191_v38, 0.0  ;;  %v886_v33 = vsel %vm872_vm7, %v5192_v54, 0.0  ;;  %v5224_v31 = vunpack.c.h.bf16 %v5251_v12 }
 0x175   : > { %786 = vst.msk [vmem:[#allocation2 + $0x19c] sm:$0x3] %vm761_vm5, %v6868_v27  ;;  %789 = vst.msk [vmem:[#allocation2 + $0x1b0] sm:$0x3] %vm761_vm5, %v6877_v39  ;;  %v5196_v27 = vunpack.c.h.bf16 %v5244_v48  ;;  %v5199_v39 = vunpack.c.l.bf16 %v5245_v13  ;;  %v906_v5 = vsel %vm872_vm7, %v5212_v21, 0.0  ;;  %v908_v11 = vsel %vm872_vm7, %v5215_v26, 0.0 }
 0x176   : > { %792 = vst.msk [vmem:[#allocation2 + $0x1c4] sm:$0x3] %vm761_vm5, %v683_v45  ;;  %795 = vst.msk [vmem:[#allocation2 + $0x1d8] sm:$0x3] %vm761_vm5, %v688_v52  ;;  %v879_v51 = vadd.f32 %v878_v35, %v877_v36  ;;  %v910_v17 = vsel %vm872_vm7, %v5216_v3, 0.0  ;;  %v5252_v25 = vld [vmem:[%s6315_s27 + $0x60] sm:$0xff]  }
 0x177   : > { %798 = vst.msk [vmem:[#allocation2 + $0x1ec] sm:$0x3] %vm761_vm5, %v693_v60  ;;  %801 = vst.msk [vmem:[#allocation2 + $0x200] sm:$0x3] %vm761_vm5, %v698_v4  ;;  %v890_v45 = vsel %vm872_vm7, %v5196_v27, 0.0  ;;  %v892_v49 = vsel %vm872_vm7, %v5199_v39, 0.0  ;;  %v5227_v36 = vunpack.c.l.bf16 %v5252_v25 }
 0x178   : > { %803 = vst.msk [vmem:[#allocation2 + $0x210] sm:$0xf] %vm361_vm0, %v702_v30  ;;  %806 = vst.msk [vmem:[#allocation2 + $0x224] sm:$0xf] %vm361_vm0, %v707_v1  ;;  %v881_v62 = vadd.f32 %v880_v42, %v879_v51  ;;  %v900_v4 = vsel %vm872_vm7, %v5207_v58, 0.0  ;;  %v904_v30 = vsel %vm872_vm7, %v5211_v2, 0.0  ;;  %v5228_v51 = vunpack.c.h.bf16 %v5252_v25 }
 0x179   : > { %804 = vst.msk [vmem:[#allocation2 + $0x214] sm:$0x3] %vm761_vm5, %v703_v14  ;;  %807 = vst.msk [vmem:[#allocation2 + $0x228] sm:$0x3] %vm761_vm5, %v708_v34  ;;  %v5250_v34 = vld [vmem:[%s6315_s27 + $0x50] sm:$0xff]   ;;  %v916_v38 = vsel %vm872_vm7, %v5223_v22, 0.0 }
 0x17a   : > { %v883_v23 = vadd.f32 %v882_v57, %v881_v62  ;;  %v5219_v9 = vunpack.c.l.bf16 %v5250_v34  ;;  %v5220_v16 = vunpack.c.h.bf16 %v5250_v34  ;;  %v5253_v42 = vld [vmem:[%s6315_s27 + $0x68] sm:$0xff]   ;;  %v918_v54 = vsel %vm872_vm7, %v5224_v31, 0.0  ;;  %v949_v21 = vld [vmem:[#allocation11] sm:$0x1] }
 0x17b   : > { %v5231_v62 = vunpack.c.l.bf16 %v5253_v42  ;;  %v920_v0 = vsel %vm872_vm7, %v5227_v36, 0.0  ;;  %v922_v27 = vsel %vm872_vm7, %v5228_v51, 0.0 }
 0x17c   : > { %v885_v37 = vadd.f32 %v884_v8, %v883_v23  ;;  %v912_v24 = vsel %vm872_vm7, %v5219_v9, 0.0  ;;  %v914_v32 = vsel %vm872_vm7, %v5220_v16, 0.0  ;;  %v5254_v8 = vld [vmem:[%s6315_s27 + $0x70] sm:$0xff]   ;;  %v5232_v23 = vunpack.c.h.bf16 %v5253_v42 }
 0x17d   : > { %v924_v39 = vsel %vm872_vm7, %v5231_v62, 0.0 }
 0x17e   : > { %v887_v43 = vadd.f32 %v886_v33, %v885_v37  ;;  %v5235_v37 = vunpack.c.l.bf16 %v5254_v8  ;;  %v926_v44 = vsel %vm872_vm7, %v5232_v23, 0.0 }
 0x180   : > { %v889_v46 = vadd.f32 %v888_v40, %v887_v43  ;;  %v5255_v40 = vld [vmem:[%s6315_s27 + $0x78] sm:$0xff]   ;;  %v5236_v43 = vunpack.c.h.bf16 %v5254_v8  ;;  %v928_v47 = vsel %vm872_vm7, %v5235_v37, 0.0 }
 0x181   : > { %v5240_v50 = vunpack.c.h.bf16 %v5255_v40 }
 0x182   : > { %v891_v52 = vadd.f32 %v890_v45, %v889_v46  ;;  %v5239_v46 = vunpack.c.l.bf16 %v5255_v40 }
 0x183   : > { %v934_v58 = vsel %vm872_vm7, %v5240_v50, 0.0 }
 0x184   : > { %v893_v55 = vadd.f32 %v892_v49, %v891_v52  ;;  %v930_v52 = vsel %vm872_vm7, %v5236_v43, 0.0 }
 0x186   : > { %v895_v60 = vadd.f32 %v894_v56, %v893_v55  ;;  %v932_v56 = vsel %vm872_vm7, %v5239_v46, 0.0 }
 0x188   : > { %v897_v10 = vadd.f32 %v896_v59, %v895_v60 }
 0x18a   : > { %v899_v20 = vadd.f32 %v898_v6, %v897_v10 }
 0x18c   : > { %v901_v14 = vadd.f32 %v900_v4, %v899_v20 }
 0x18e   : > { %v903_v1 = vadd.f32 %v902_v28, %v901_v14 }
 0x190   : > { %v905_v7 = vadd.f32 %v904_v30, %v903_v1 }
 0x192   : > { %v907_v15 = vadd.f32 %v906_v5, %v905_v7 }
 0x194   : > { %v909_v19 = vadd.f32 %v908_v11, %v907_v15 }
 0x196   : > { %v911_v29 = vadd.f32 %v910_v17, %v909_v19 }
 0x198   : > { %v913_v35 = vadd.f32 %v912_v24, %v911_v29 }
 0x19a   : > { %v915_v48 = vadd.f32 %v914_v32, %v913_v35 }
 0x19c   : > { %v917_v57 = vadd.f32 %v916_v38, %v915_v48 }
 0x19e   : > { %v919_v13 = vadd.f32 %v918_v54, %v917_v57 }
 0x1a0   : > { %v921_v33 = vadd.f32 %v920_v0, %v919_v13 }
 0x1a2   : > { %v923_v41 = vadd.f32 %v922_v27, %v921_v33 }
 0x1a4   : > { %v925_v45 = vadd.f32 %v924_v39, %v923_v41 }
 0x1a6   : > { %v927_v49 = vadd.f32 %v926_v44, %v925_v45 }
 0x1a8   : > { %v929_v53 = vadd.f32 %v928_v47, %v927_v49 }
 0x1aa   : > { %v931_v55 = vadd.f32 %v930_v52, %v929_v53 }
 0x1ac   : > { %v933_v59 = vadd.f32 %v932_v56, %v931_v55 }
 0x1ae   : > { %v935_v61 = vadd.f32 %v934_v58, %v933_v59 }
 0x1b0   : > { %v936_v60 = vrot.slane %v935_v61, 4 }
 0x1b2   : > { %v937_v63 = vadd.f32 %v936_v60, %v935_v61 }
 0x1b4   : > { %v938_v6 = vrot.slane %v937_v63, 2 }
 0x1b6   : > { %v939_v10 = vadd.f32 %v938_v6, %v937_v63 }
 0x1b8   : > { %v940_v2 = vrot.slane %v939_v10, 1 }
 0x1ba   : > { %v941_v4 = vadd.f32 %v940_v2, %v939_v10 }
 0x1bc   : > { %v943_v18 = vmul.f32 0.00390625, %v941_v4 }
 0x1be   : > { %v944_v20 = vpack.c.bf16 %v943_v18, %v943_v18 }
 0x1c0   : > { %5392 = vmatmul.mubr.msk.bf16.vlgmr.msra.gmra.mrb[0].mxu0 %vm872_vm7, %v944_v20 }
 0x293   : > { %v999_v28 = vpop.f32.mrb[0].mxu0 }
 0x294   : > { %v1000_v14 = vadd.f32 %v999_v28, %v949_v21  ;;  %v5393_v26 = vpop.f32.mrb[1].mxu0 }
 0x295   : > { %v1002_v30 = vpop.f32.mrb[2].mxu0 }
 0x296   : > { %v1005_v34 = vmax.f32 %v1000_v14, 0.0  ;;  %v5394_v1 = vpop.f32.mrb[3].mxu0 }
 0x298   : > { %1006 = vst [vmem:[#allocation3] sm:$0x1] %v1005_v34 }
 0x299 PF: > { %s8602_s9 = sld [smem:[#allocation24_spill]]  ;;  %vm1571_vm8 = vcmask 1040384   ;;  %vm1572_vm9 = vcmask 1044484   ;;  %vm1083_vm11 = vcmask 1041408   ;;  %vm1084_vm12 = vcmask 1045508   ;;  %s5960_s3 = smov 32  }
 0x29a   : > { %vm7017_vm10 = vmor %vm1571_vm8, %vm1572_vm9  ;;  %v5959_v12 = vmov 0   ;;  %vm1879_vm13 = vcmask 1042432   ;;  %vm1880_vm15 = vcmask 1046532   ;;  %s5961_s4 = smov 64   ;;  %s5962_s19 = smov 96   ;;  %vm1214_vm1 = vcmask 261120  }
 0x29b   : > { %1271 = vmatprep.mubr.bf16.mxu0 %v5959_v12  ;;  %1384 = vmatprep.mubr.bf16.mxu1 %v5959_v12  ;;  %vm7047_vm14 = vmor %vm1083_vm11, %vm1084_vm12  ;;  %vm1822_vm2 = vcmask 523520   ;;  %vm1986_vm3 = vcmask 785920   ;;  %vm2147_vm4 = vcmask 1048320   ;;  %s4284_s17 = scalar_lea.sflag [#allocation7], %s352_s2 }
 0x29c   : > { %vm7066_vm0 = vmor %vm1879_vm13, %vm1880_vm15 }
 0x29f   : > { %s4508_s16 = smul.u32 160, %s8602_s9  ;;  %v4506_v3 = vld [vmem:[#allocation3] ss:$0 sm:$0xff] }
 0x2a0   : > { %1016 = vst [vmem:[%s6336_s13] sm:$0xff] %v4506_v3  ;;  %1017 = vst [vmem:[%s6336_s13 + $0x8] sm:$0xff] %v4506_v3 }
 0x2a1   : > { %1018 = vst [vmem:[%s6336_s13 + $0x10] sm:$0xff] %v4506_v3  ;;  %1019 = vst [vmem:[%s6336_s13 + $0x18] sm:$0xff] %v4506_v3  ;;  %s7037_s20 = scalar_lea.vmem [#allocation2], %s4508_s16 }
 0x2a2   : > { %1020 = vst [vmem:[%s6336_s13 + $0x20] sm:$0xff] %v4506_v3  ;;  %1021 = vst [vmem:[%s6336_s13 + $0x28] sm:$0xff] %v4506_v3  ;;  %v4794_v7 = vld [vmem:[%s7037_s20 + $0x168] sm:$0x8]  ;;  %v4795_v9 = vld [vmem:[%s7037_s20 + $0x16c] sm:$0xf] }
 0x2a3   : > { %1022 = vst [vmem:[%s6336_s13 + $0x30] sm:$0xff] %v4506_v3  ;;  %1023 = vst [vmem:[%s6336_s13 + $0x38] sm:$0xff] %v4506_v3  ;;  %v4796_v11 = vld [vmem:[%s7037_s20 + $0x170] sm:$0x7]  ;;  %v4818_v15 = vrot.slane %v4794_v7, 11  ;;  %v2354_v16 = vrot.slane %v4795_v9, 7 }
 0x2a4   : > { %1024 = vst [vmem:[%s6336_s13 + $0x40] sm:$0xff] %v4506_v3  ;;  %1025 = vst [vmem:[%s6336_s13 + $0x48] sm:$0xff] %v4506_v3  ;;  %v2357_v17 = vrot.slane %v4796_v11, 7  ;;  %v4834_v19 = vld [vmem:[%s7037_s20 + $0x16c] sm:$0xc] }
 0x2a5   : > { %1026 = vst [vmem:[%s6336_s13 + $0x50] sm:$0xff] %v4506_v3  ;;  %1027 = vst [vmem:[%s6336_s13 + $0x58] sm:$0xff] %v4506_v3  ;;  %v4835_v24 = vld [vmem:[%s7037_s20 + $0x170] sm:$0xf]  ;;  %v4836_v25 = vld [vmem:[%s7037_s20 + $0x174] sm:$0x3]  ;;  %v2355_v31 = vsel %vm7017_vm10, %v4818_v15, %v2354_v16 }
 0x2a6   : > { %1028 = vst [vmem:[%s6336_s13 + $0x60] sm:$0xff] %v4506_v3  ;;  %1029 = vst [vmem:[%s6336_s13 + $0x68] sm:$0xff] %v4506_v3  ;;  %v4858_v29 = vrot.slane %v4834_v19, 10  ;;  %v2356_v32 = vrot.slane %v2354_v16, 4  ;;  %v2514_v35 = vrot.slane %v4835_v24, 6  ;;  %v2517_v36 = vrot.slane %v4836_v25, 6 }
 0x2a7   : > { %1030 = vst [vmem:[%s6336_s13 + $0x70] sm:$0xff] %v4506_v3  ;;  %1031 = vst [vmem:[%s6336_s13 + $0x78] sm:$0xff] %v4506_v3  ;;  %v4632_v38 = vld [vmem:[%s7037_s20 + $0x7c] sm:$0xc]  ;;  %v4633_v42 = vld [vmem:[%s7037_s20 + $0x80] sm:$0xf] }
 0x2a8   : > { %v4634_v48 = vld [vmem:[%s7037_s20 + $0x84] sm:$0x3]  ;;  %v4656_v51 = vrot.slane %v4632_v38, 10  ;;  %v2358_v54 = vsel %vm7017_vm10, %v2356_v32, %v2357_v17  ;;  %v2515_v57 = vsel %vm7047_vm14, %v4858_v29, %v2514_v35  ;;  %v2516_v62 = vrot.slane %v2514_v35, 4  ;;  %v4672_v8 = vld [vmem:[%s7037_s20 + $0x80] sm:$0xe] }
 0x2a9   : > { %v1720_v0 = vrot.slane %v4633_v42, 6  ;;  %v4673_v13 = vld [vmem:[%s7037_s20 + $0x84] sm:$0xf]  ;;  %v4826_v27 = vcombine.low %v2355_v31, %v2358_v54  ;;  %v1723_v33 = vrot.slane %v4634_v48, 6  ;;  %v4674_v37 = vld [vmem:[%s7037_s20 + $0x88] sm:$0x1] }
 0x2aa   : > { %v4696_v39 = vrot.slane %v4672_v8, 9  ;;  %v1884_v40 = vrot.slane %v4673_v13, 5  ;;  %v2518_v41 = vsel %vm7047_vm14, %v2516_v62, %v2517_v36  ;;  %v1887_v45 = vrot.slane %v4674_v37, 5  ;;  %v4874_v46 = vld [vmem:[%s7037_s20 + $0x170] sm:$0xe] }
 0x2ab   : > { %v1721_v43 = vsel %vm7047_vm14, %v4656_v51, %v1720_v0  ;;  %v1722_v44 = vrot.slane %v1720_v0, 4  ;;  %v4875_v47 = vld [vmem:[%s7037_s20 + $0x174] sm:$0xf]  ;;  %2432 = vrot.lane.b32.xlu0 %v4826_v27, %s5960_s3  ;;  %v4866_v49 = vcombine.low %v2515_v57, %v2518_v41  ;;  %v4876_v53 = vld [vmem:[%s7037_s20 + $0x178] sm:$0x1]  ;;  %v4898_v56 = vrot.slane %v4874_v46, 9 }
 0x2ac   : > { %v1885_v50 = vsel %vm7066_vm0, %v4696_v39, %v1884_v40  ;;  %v1886_v52 = vrot.slane %v1884_v40, 4  ;;  %v4712_v55 = vld [vmem:[%s7037_s20 + $0xf0] sm:$0x8]  ;;  %v2674_v59 = vrot.slane %v4875_v47, 5  ;;  %v2677_v61 = vrot.slane %v4876_v53, 5 }
 0x2ad   : > { %v1724_v58 = vsel %vm7047_vm14, %v1722_v44, %v1723_v33  ;;  %v4713_v60 = vld [vmem:[%s7037_s20 + $0xf4] sm:$0xf]  ;;  %v4714_v63 = vld [vmem:[%s7037_s20 + $0xf8] sm:$0x7]  ;;  %2592 = vrot.lane.b32.xlu1 %v4866_v49, %s5961_s4  ;;  %v4736_v2 = vrot.slane %v4712_v55, 11 }
 0x2ae   : > { %v4664_v6 = vcombine.low %v1721_v43, %v1724_v58  ;;  %v1888_v10 = vsel %vm7066_vm0, %v1886_v52, %v1887_v45  ;;  %v2045_v4 = vrot.slane %v4713_v60, 7  ;;  %v4797_v18 = vld [vmem:[%s7037_s20 + $0x17c] sm:$0x8]  ;;  %v4798_v20 = vld [vmem:[%s7037_s20 + $0x180] sm:$0xf]  ;;  %v2675_v28 = vsel %vm7066_vm0, %v4898_v56, %v2674_v59 }
 0x2af   : > { %v4704_v21 = vcombine.low %v1885_v50, %v1888_v10  ;;  %v2676_v14 = vrot.slane %v2674_v59, 4  ;;  %v2048_v26 = vrot.slane %v4714_v63, 7  ;;  %v4799_v30 = vld [vmem:[%s7037_s20 + $0x184] sm:$0x7]  ;;  %v4635_v34 = vld [vmem:[%s7037_s20 + $0x90] sm:$0xc] }
 0x2b0   : > { %1798 = vrot.lane.b32.xlu0 %v4664_v6, %s5960_s3  ;;  %v2046_v1 = vsel %vm7017_vm10, %v4736_v2, %v2045_v4  ;;  %v2047_v3 = vrot.slane %v2045_v4, 4  ;;  %v4819_v7 = vrot.slane %v4797_v18, 11  ;;  %v2361_v9 = vrot.slane %v4798_v20, 7  ;;  %v4636_v11 = vld [vmem:[%s7037_s20 + $0x94] sm:$0xf] }
 0x2b1   : > { %v2678_v15 = vsel %vm7066_vm0, %v2676_v14, %v2677_v61  ;;  %v2364_v16 = vrot.slane %v4799_v30, 7  ;;  %v4637_v17 = vld [vmem:[%s7037_s20 + $0x98] sm:$0x3]  ;;  %v4657_v19 = vrot.slane %v4635_v34, 10  ;;  %v1727_v24 = vrot.slane %v4636_v11, 6  ;;  %1962 = vrot.lane.b32.xlu1 %v4704_v21, %s5961_s4 }
 0x2b2   : > { %v4906_v25 = vcombine.low %v2675_v28, %v2678_v15  ;;  %v2049_v29 = vsel %vm7017_vm10, %v2047_v3, %v2048_v26  ;;  %v2362_v31 = vsel %vm7017_vm10, %v4819_v7, %v2361_v9  ;;  %v2363_v32 = vrot.slane %v2361_v9, 4  ;;  %v4837_v35 = vld [vmem:[%s7037_s20 + $0x180] sm:$0xc]  ;;  %v4838_v36 = vld [vmem:[%s7037_s20 + $0x184] sm:$0xf] }
 0x2b3   : > { %v4744_v38 = vcombine.low %v2046_v1, %v2049_v29  ;;  %v1728_v42 = vsel %vm7047_vm14, %v4657_v19, %v1727_v24  ;;  %v1729_v48 = vrot.slane %v1727_v24, 4  ;;  %v1730_v51 = vrot.slane %v4637_v17, 6  ;;  %v4839_v54 = vld [vmem:[%s7037_s20 + $0x188] sm:$0x3]  ;;  %v4675_v57 = vld [vmem:[%s7037_s20 + $0x94] sm:$0xe] }
 0x2b4   : > { %2752 = vrot.lane.b32.xlu0 %v4906_v25, %s5962_s19  ;;  %v2365_v62 = vsel %vm7017_vm10, %v2363_v32, %v2364_v16  ;;  %v4859_v0 = vrot.slane %v4837_v35, 10  ;;  %v2521_v8 = vrot.slane %v4838_v36, 6  ;;  %v2524_v13 = vrot.slane %v4839_v54, 6  ;;  %v4676_v27 = vld [vmem:[%s7037_s20 + $0x98] sm:$0xf]  ;;  %v5576_v36 = vld [vmem:[%s7037_s20 + $0x1e0] sm:$0xff]  }
 0x2b5   : > { %v4827_v33 = vcombine.low %v2362_v31, %v2365_v62  ;;  %v1731_v37 = vsel %vm7047_vm14, %v1729_v48, %v1730_v51  ;;  %v4677_v39 = vld [vmem:[%s7037_s20 + $0x9c] sm:$0x1]  ;;  %v4697_v40 = vrot.slane %v4675_v57, 9  ;;  %v1891_v41 = vrot.slane %v4676_v27, 5  ;;  %v4877_v43 = vld [vmem:[%s7037_s20 + $0x184] sm:$0xe]  ;;  %2123 = vrot.lane.b32.xlu1 %v4744_v38, %s5962_s19 }
 0x2b6   : > { %v4665_v44 = vcombine.low %v1728_v42, %v1731_v37  ;;  %v2522_v45 = vsel %vm7047_vm14, %v4859_v0, %v2521_v8  ;;  %v2523_v46 = vrot.slane %v2521_v8, 4  ;;  %v1894_v47 = vrot.slane %v4677_v39, 5  ;;  %v4878_v49 = vld [vmem:[%s7037_s20 + $0x188] sm:$0xf]  ;;  %v4879_v50 = vld [vmem:[%s7037_s20 + $0x18c] sm:$0x1] }
 0x2b7   : > { %v1892_v52 = vsel %vm7066_vm0, %v4697_v40, %v1891_v41  ;;  %v1893_v53 = vrot.slane %v1891_v41, 4  ;;  %v4899_v56 = vrot.slane %v4877_v43, 9  ;;  %v2681_v55 = vrot.slane %v4878_v49, 5  ;;  %v4715_v58 = vld [vmem:[%s7037_s20 + $0x104] sm:$0x8]  ;;  %v5577_v49 = vld [vmem:[%s7037_s20 + $0xc] sm:$0xff]  }
 0x2b8   : > { %2434 = vrot.lane.b32.xlu0 %v4827_v33, %s5960_s3  ;;  %v2525_v59 = vsel %vm7047_vm14, %v2523_v46, %v2524_v13  ;;  %v2684_v61 = vrot.slane %v4879_v50, 5  ;;  %v4716_v60 = vld [vmem:[%s7037_s20 + $0x108] sm:$0xf]  ;;  %v4717_v63 = vld [vmem:[%s7037_s20 + $0x10c] sm:$0x7]  ;;  %v4737_v6 = vrot.slane %v4715_v58, 11 }
 0x2b9   : > { %v4867_v10 = vcombine.low %v2522_v45, %v2525_v59  ;;  %v1895_v2 = vsel %vm7066_vm0, %v1893_v53, %v1894_v47  ;;  %v2682_v4 = vsel %vm7066_vm0, %v4899_v56, %v2681_v55  ;;  %v2683_v18 = vrot.slane %v2681_v55, 4  ;;  %1800 = vrot.lane.b32.xlu1 %v4665_v44, %s5960_s3  ;;  %v3170_v14 = vld [vmem:[%s7037_s20 + $0x4] sm:$0xc]  ;;  %v3171_v26 = vld [vmem:[%s7037_s20 + $0x8] sm:$0xf]  ;;  %v5578_v55 = vld [vmem:[%s7037_s20 + $0x1ec] sm:$0xff]  }
 0x2ba   : > { %v4705_v20 = vcombine.low %v1892_v52, %v1895_v2  ;;  %v2052_v21 = vrot.slane %v4716_v60, 7  ;;  %v2055_v28 = vrot.slane %v4717_v63, 7  ;;  %v3172_v34 = vld [vmem:[%s7037_s20 + $0xc] sm:$0x3]  ;;  %v4957_v1 = vrot.slane %v3170_v14, 10  ;;  %v5579_v14 = vld [vmem:[%s7037_s20 + $0xf0] sm:$0xff]  }
 0x2bb   : > { %v2685_v30 = vsel %vm7066_vm0, %v2683_v18, %v2684_v61  ;;  %v3220_v3 = vrot.slane %v3171_v26, 6  ;;  %v5055_v7 = vld [vmem:[%s7037_s20 + $0x1e4] sm:$0xc]  ;;  %v3223_v16 = vrot.slane %v3172_v34, 6  ;;  %v5056_v17 = vld [vmem:[%s7037_s20 + $0x1e8] sm:$0xf] }
 0x2bc   : > { %2594 = vrot.lane.b32.xlu0 %v4867_v10, %s5961_s4  ;;  %v4907_v9 = vcombine.low %v2682_v4, %v2685_v30  ;;  %v2053_v11 = vsel %vm7017_vm10, %v4737_v6, %v2052_v21  ;;  %v2054_v15 = vrot.slane %v2052_v21, 4  ;;  %v5057_v19 = vld [vmem:[%s7037_s20 + $0x1ec] sm:$0x3]  ;;  %v5079_v25 = vrot.slane %v5055_v7, 10  ;;  %v4800_v51 = vld [vmem:[%s7037_s20 + $0x190] sm:$0x8] }
 0x2bd   : > { %v3222_v24 = vrot.slane %v3220_v3, 4  ;;  %v3720_v29 = vrot.slane %v5056_v17, 6  ;;  %1964 = vrot.lane.b32.xlu1 %v4705_v20, %s5961_s4  ;;  %v3723_v32 = vrot.slane %v5057_v19, 6  ;;  %v3221_v38 = vsel %vm7047_vm14, %v4957_v1, %v3220_v3  ;;  %v4801_v54 = vld [vmem:[%s7037_s20 + $0x194] sm:$0xf] }
 0x2be   : > { %v2056_v31 = vsel %vm7017_vm10, %v2054_v15, %v2055_v28  ;;  %v4802_v0 = vld [vmem:[%s7037_s20 + $0x198] sm:$0x7]  ;;  %v4820_v8 = vrot.slane %v4800_v51, 11  ;;  %v2368_v13 = vrot.slane %v4801_v54, 7  ;;  %v4638_v33 = vld [vmem:[%s7037_s20 + $0xa4] sm:$0xc] }
 0x2bf   : > { %v4745_v35 = vcombine.low %v2053_v11, %v2056_v31  ;;  %v3224_v42 = vsel %vm7047_vm14, %v3222_v24, %v3223_v16  ;;  %v3722_v48 = vrot.slane %v3720_v29, 4  ;;  %v3721_v57 = vsel %vm7047_vm14, %v5079_v25, %v3720_v29  ;;  %v4639_v37 = vld [vmem:[%s7037_s20 + $0xa8] sm:$0xf]  ;;  %v4640_v39 = vld [vmem:[%s7037_s20 + $0xac] sm:$0x3] }
 0x2c0   : > { %2754 = vrot.lane.b32.xlu0 %v4907_v9, %s5962_s19  ;;  %v4965_v27 = vcombine.low %v3221_v38, %v3224_v42  ;;  %v2370_v40 = vrot.slane %v2368_v13, 4  ;;  %v2371_v41 = vrot.slane %v4802_v0, 7  ;;  %v1734_v43 = vrot.slane %v4639_v37, 6  ;;  %v4840_v44 = vld [vmem:[%s7037_s20 + $0x194] sm:$0xc] }
 0x2c1   : > { %v3724_v62 = vsel %vm7047_vm14, %v3722_v48, %v3723_v32  ;;  %2125 = vrot.lane.b32.xlu1 %v4745_v35, %s5962_s19  ;;  %v4841_v46 = vld [vmem:[%s7037_s20 + $0x198] sm:$0xf]  ;;  %v4842_v47 = vld [vmem:[%s7037_s20 + $0x19c] sm:$0x3]  ;;  %v4658_v50 = vrot.slane %v4638_v33, 10  ;;  %v1737_v52 = vrot.slane %v4640_v39, 6  ;;  %v2369_v63 = vsel %vm7017_vm10, %v4820_v8, %v2368_v13 }
 0x2c2   : > { %v5087_v45 = vcombine.low %v3721_v57, %v3724_v62  ;;  %v2528_v53 = vrot.slane %v4841_v46, 6  ;;  %v4679_v56 = vld [vmem:[%s7037_s20 + $0xac] sm:$0xf]  ;;  %v1736_v58 = vrot.slane %v1734_v43, 4  ;;  %v4860_v59 = vrot.slane %v4840_v44, 10 }
 0x2c3   : > { %v2531_v61 = vrot.slane %v4842_v47, 6  ;;  %v4678_v60 = vld [vmem:[%s7037_s20 + $0xa8] sm:$0xe]  ;;  %v2372_v6 = vsel %vm7017_vm10, %v2370_v40, %v2371_v41  ;;  %v4680_v2 = vld [vmem:[%s7037_s20 + $0xb0] sm:$0x1]  ;;  %v1898_v4 = vrot.slane %v4679_v56, 5  ;;  %v1735_v3 = vsel %vm7047_vm14, %v4658_v50, %v1734_v43 }
 0x2c4   : > { %3638 = vrot.lane.b32.xlu0 %v5576_v36, %s5960_s3  ;;  %v2530_v10 = vrot.slane %v2528_v53, 4  ;;  %v4881_v18 = vld [vmem:[%s7037_s20 + $0x19c] sm:$0xf]  ;;  %v4880_v20 = vld [vmem:[%s7037_s20 + $0x198] sm:$0xe]  ;;  %v4828_v1 = vcombine.low %v2369_v63, %v2372_v6  ;;  %v4698_v7 = vrot.slane %v4678_v60, 9  ;;  %v1738_v11 = vsel %vm7047_vm14, %v1736_v58, %v1737_v52 }
 0x2c5   : > { %3298 = vrot.lane.b32.xlu1 %v4965_v27, %s5960_s3  ;;  %v4882_v21 = vld [vmem:[%s7037_s20 + $0x1a0] sm:$0x1]  ;;  %v4718_v28 = vld [vmem:[%s7037_s20 + $0x118] sm:$0x8]  ;;  %v2688_v26 = vrot.slane %v4881_v18, 5  ;;  %v2529_v15 = vsel %vm7047_vm14, %v4860_v59, %v2528_v53  ;;  %v1900_v16 = vrot.slane %v1898_v4, 4  ;;  %v4666_v51 = vcombine.low %v1735_v3, %v1738_v11 }
 0x2c6   : > { %v4719_v30 = vld [vmem:[%s7037_s20 + $0x11c] sm:$0xf]  ;;  %v4720_v34 = vld [vmem:[%s7037_s20 + $0x120] sm:$0x7]  ;;  %v1901_v17 = vrot.slane %v4680_v2, 5  ;;  %v2532_v25 = vsel %vm7047_vm14, %v2530_v10, %v2531_v61  ;;  %v4900_v29 = vrot.slane %v4880_v20, 9  ;;  %v1899_v0 = vsel %vm7066_vm0, %v4698_v7, %v1898_v4 }
 0x2c7   : > { %v2059_v9 = vrot.slane %v4719_v30, 7  ;;  %v3173_v19 = vld [vmem:[%s7037_s20 + $0x18] sm:$0xc]  ;;  %v3174_v24 = vld [vmem:[%s7037_s20 + $0x1c] sm:$0xf]  ;;  %v2691_v31 = vrot.slane %v4882_v21, 5  ;;  %v4868_v33 = vcombine.low %v2529_v15, %v2532_v25 }
 0x2c8   : > { %3798 = vrot.lane.b32.xlu0 %v5087_v45, %s5961_s4  ;;  %v4738_v32 = vrot.slane %v4718_v28, 11  ;;  %v3175_v35 = vld [vmem:[%s7037_s20 + $0x20] sm:$0x3]  ;;  %v2690_v36 = vrot.slane %v2688_v26, 4  ;;  %v2062_v42 = vrot.slane %v4720_v34, 7  ;;  %v3227_v48 = vrot.slane %v3174_v24, 6 }
 0x2c9   : > { %3386 = vrot.lane.b32.xlu1 %v5577_v49, %s5961_s4  ;;  %v2061_v38 = vrot.slane %v2059_v9, 4  ;;  %v4958_v54 = vrot.slane %v3173_v19, 10  ;;  %v3230_v57 = vrot.slane %v3175_v35, 6  ;;  %v5059_v62 = vld [vmem:[%s7037_s20 + $0x1fc] sm:$0xf]  ;;  %v1902_v8 = vsel %vm7066_vm0, %v1900_v16, %v1901_v17  ;;  %v5580_v28 = vld [vmem:[%s7037_s20 + $0x1f4] sm:$0xff]  }
 0x2ca   : > { %v5058_v13 = vld [vmem:[%s7037_s20 + $0x1f8] sm:$0xc]  ;;  %v5060_v27 = vld [vmem:[%s7037_s20 + $0x200] sm:$0x3]  ;;  %v2689_v37 = vsel %vm7066_vm0, %v4900_v29, %v2688_v26  ;;  %v2692_v39 = vsel %vm7066_vm0, %v2690_v36, %v2691_v31  ;;  %v3229_v40 = vrot.slane %v3227_v48, 4  ;;  %v3727_v41 = vrot.slane %v5059_v62, 6 }
 0x2cb   : > { %v5584_v43 = vld [vmem:[#allocation8 + $0x4] ss:$16 sps:$4 sm:$0xff]   ;;  %v4706_v44 = vcombine.low %v1899_v0, %v1902_v8  ;;  %v2060_v46 = vsel %vm7017_vm10, %v4738_v32, %v2059_v9  ;;  %v2063_v47 = vsel %vm7017_vm10, %v2061_v38, %v2062_v42  ;;  %v5586_v49 = vld [vmem:[#allocation8] ss:$16 sps:$4 sm:$0xff]   ;;  %v4908_v50 = vcombine.low %v2689_v37, %v2692_v39  ;;  %v5601_v56 = vld [vmem:[#allocation13 + $0x40] sm:$0xff]  }
 0x2cc   : > { %3886 = vrot.lane.b32.xlu0 %v5578_v55, %s5962_s19  ;;  %v4804_v45 = vld [vmem:[%s7037_s20 + $0x1a8] sm:$0xf]  ;;  %1239 = vmatprep.subr.bf16.mxu0 %v5584_v43  ;;  %v5080_v52 = vrot.slane %v5058_v13, 10  ;;  %v3730_v53 = vrot.slane %v5060_v27, 6  ;;  %v3228_v55 = vsel %vm7047_vm14, %v4958_v54, %v3227_v48  ;;  %v3231_v58 = vsel %vm7047_vm14, %v3229_v40, %v3230_v57  ;;  %v4803_v61 = vld [vmem:[%s7037_s20 + $0x1a4] sm:$0x8] }
 0x2cd   : > { %3474 = vrot.lane.b32.xlu1 %v5579_v14, %s5962_s19  ;;  %v3729_v59 = vrot.slane %v3727_v41, 4  ;;  %v2375_v60 = vrot.slane %v4804_v45, 7  ;;  %1240 = vmatpush1.bf16.msra.mxu0 %v5586_v49  ;;  %v5587_v63 = vld [vmem:[#allocation8 + $0x24] ss:$16 sps:$4 sm:$0xff]   ;;  %v4746_v6 = vcombine.low %v2060_v46, %v2063_v47  ;;  %v4805_v10 = vld [vmem:[%s7037_s20 + $0x1ac] sm:$0x7]  ;;  %v4966_v14 = vcombine.low %v3228_v55, %v3231_v58 }
 0x2ce   : > { %v4641_v2 = vld [vmem:[%s7037_s20 + $0xb8] sm:$0xc]  ;;  %v4642_v4 = vld [vmem:[%s7037_s20 + $0xbc] sm:$0xf]  ;;  %v7235_v18 = vld [vmem:[%s7037_s20 + $0xc0] sm:$0x3]  ;;  %1241 = vmatprep.subr.bf16.mxu0 %v5587_v63  ;;  %v3728_v26 = vsel %vm7047_vm14, %v5080_v52, %v3727_v41 }
 0x2cf   : > { %v7238_v20 = vld [vmem:[%s7037_s20 + $0x1ac] sm:$0xf]  ;;  %v5589_v21 = vld [vmem:[#allocation8 + $0x20] ss:$16 sps:$4 sm:$0xff]   ;;  %v3731_v30 = vsel %vm7047_vm14, %v3729_v59, %v3730_v53  ;;  %v4821_v34 = vrot.slane %v4803_v61, 11  ;;  %v2378_v3 = vrot.slane %v4805_v10, 7 }
 0x2d0   : > { %2436 = vrot.lane.b32.xlu0 %v4828_v1, %s5960_s3  ;;  %v2377_v1 = vrot.slane %v2375_v60, 4  ;;  %v7247_v7 = vld [vmem:[%s7037_s20 + $0xc0] sm:$0xf]  ;;  %v4659_v9 = vrot.slane %v4641_v2, 10  ;;  %v1741_v11 = vrot.slane %v4642_v4, 6  ;;  %v1744_v15 = vrot.slane %v7235_v18, 6 }
 0x2d1   : > { %1802 = vrot.lane.b32.xlu1 %v4666_v51, %s5960_s3  ;;  %1242 = vmatpush1.bf16.msra.mxu0 %v5589_v21  ;;  %v7252_v16 = vld [vmem:[%s7037_s20 + $0x1a8] sm:$0xc]  ;;  %v2535_v17 = vrot.slane %v7238_v20, 6  ;;  %v4845_v19 = vld [vmem:[%s7037_s20 + $0x1b0] sm:$0x3]  ;;  %v5088_v31 = vcombine.low %v3728_v26, %v3731_v30  ;;  %v5581_v32 = vld [vmem:[%s7037_s20 + $0x20] sm:$0xff]   ;;  %v7273_v51 = vsel %vm7017_vm10, %v4821_v34, %v2375_v60 }
 0x2d2   : > { %5259 = vmatprep.subr.bf16.mxu0 %v5601_v56  ;;  %v7257_v24 = vld [vmem:[%s7037_s20 + $0xbc] sm:$0xe]  ;;  %v7260_v25 = vld [vmem:[%s7037_s20 + $0x1b0] sm:$0xf]  ;;  %v4509_v29 = vld [vmem:[%s7037_s20 + $0xf4] sm:$0xc]  ;;  %v2379_v37 = vsel %vm7017_vm10, %v2377_v1, %v2378_v3  ;;  %v7293_v39 = vsel %vm7047_vm14, %v4659_v9, %v1741_v11 }
 0x2d3   : > { %v7266_v35 = vld [vmem:[%s7037_s20 + $0xc4] sm:$0x1]  ;;  %v1905_v36 = vrot.slane %v7247_v7, 5  ;;  %v4510_v38 = vld [vmem:[%s7037_s20 + $0xf8] sm:$0xf]  ;;  %v4533_v48 = vrot.slane %v4509_v29, 10 }
 0x2d4   : > { %2596 = vrot.lane.b32.xlu0 %v4868_v33, %s5961_s4  ;;  %v4511_v42 = vld [vmem:[%s7037_s20 + $0xfc] sm:$0x3]  ;;  %v7276_v54 = vld [vmem:[%s7037_s20 + $0x1ac] sm:$0xe]  ;;  %v7279_v57 = vld [vmem:[%s7037_s20 + $0x1b4] sm:$0x1] }
 0x2d5   : > { %1966 = vrot.lane.b32.xlu1 %v4706_v44, %s5961_s4  ;;  %v7282_v62 = vld [vmem:[%s7037_s20 + $0x130] sm:$0xf]  ;;  %v1743_v0 = vrot.slane %v1741_v11, 4  ;;  %v2695_v8 = vrot.slane %v7260_v25, 5  ;;  %v1088_v13 = vrot.slane %v4510_v38, 6  ;;  %v1091_v27 = vrot.slane %v4511_v42, 6 }
 0x2d6   : > { %v7287_v33 = vld [vmem:[%s7037_s20 + $0x12c] sm:$0x8]  ;;  %v4861_v40 = vrot.slane %v7252_v16, 10  ;;  %v2066_v41 = vrot.slane %v7282_v62, 7  ;;  %v5582_v43 = vld [vmem:[%s7037_s20 + $0x200] sm:$0xff]   ;;  %v2538_v44 = vrot.slane %v4845_v19, 6 }
 0x2d7   : > { %v4699_v45 = vrot.slane %v7257_v24, 9  ;;  %v1089_v46 = vsel %vm7047_vm14, %v4533_v48, %v1088_v13  ;;  %v1090_v47 = vrot.slane %v1088_v13, 4  ;;  %v4723_v49 = vld [vmem:[%s7037_s20 + $0x134] sm:$0x7]  ;;  %v2537_v52 = vrot.slane %v2535_v17, 4  ;;  %v5603_v58 = vld [vmem:[#allocation13] sm:$0xff]  }
 0x2d8   : > { %2756 = vrot.lane.b32.xlu0 %v4908_v50, %s5962_s19  ;;  %v5583_v50 = vld [vmem:[%s7037_s20 + $0x104] sm:$0xff]   ;;  %v1907_v53 = vrot.slane %v1905_v36, 4  ;;  %v1908_v56 = vrot.slane %v7266_v35, 5  ;;  %v4901_v55 = vrot.slane %v7276_v54, 9  ;;  %v2697_v59 = vrot.slane %v2695_v8, 4 }
 0x2d9   : > { %2127 = vrot.lane.b32.xlu1 %v4746_v6, %s5962_s19  ;;  %v2698_v61 = vrot.slane %v7279_v57, 5  ;;  %v1092_v60 = vsel %vm7047_vm14, %v1090_v47, %v1091_v27  ;;  %v4739_v63 = vrot.slane %v7287_v33, 11  ;;  %v7312_v6 = vld [vmem:[%s7037_s20 + $0x2c] sm:$0xc]  ;;  %v5605_v10 = vld [vmem:[#allocation13 + $0x48] sm:$0xff]   ;;  %v1745_v2 = vsel %vm7047_vm14, %v1743_v0, %v1744_v15 }
 0x2da   : > { %v7316_v4 = vcombine.low %v1089_v46, %v1092_v60  ;;  %v2068_v18 = vrot.slane %v2066_v41, 4  ;;  %v2069_v20 = vrot.slane %v4723_v49, 7  ;;  %v7319_v21 = vld [vmem:[%s7037_s20 + $0x30] sm:$0xf]  ;;  %v7325_v26 = vld [vmem:[%s7037_s20 + $0x34] sm:$0x3]  ;;  %v2536_v1 = vsel %vm7047_vm14, %v4861_v40, %v2535_v17 }
 0x2db   : > { %v7328_v30 = vld [vmem:[%s7037_s20 + $0x210] sm:$0xf]  ;;  %v4513_v34 = vld [vmem:[%s7037_s20 + $0x10c] sm:$0xf]  ;;  %v2539_v3 = vsel %vm7047_vm14, %v2537_v52, %v2538_v44  ;;  %v5607_v15 = vld [vmem:[#allocation13 + $0x8] sm:$0xff]   ;;  %v4667_v16 = vcombine.low %v7293_v39, %v1745_v2  ;;  %v1906_v19 = vsel %vm7066_vm0, %v4699_v45, %v1905_v36  ;;  %v3234_v17 = vrot.slane %v7319_v21, 6 }
 0x2dc   : > { %3640 = vrot.lane.b32.xlu0 %v5580_v28, %s5960_s3  ;;  %v4512_v28 = vld [vmem:[%s7037_s20 + $0x108] sm:$0xc]  ;;  %4557 = vmatmul.mubr.msk.bf16.vlgmr.msra.gmra.mrb[0].mxu0 %vm1214_vm1, %v7316_v4  ;;  %v4514_v7 = vld [vmem:[%s7037_s20 + $0x110] sm:$0x3]  ;;  %v1095_v11 = vrot.slane %v4513_v34, 6  ;;  %v1909_v29 = vsel %vm7066_vm0, %v1907_v53, %v1908_v56  ;;  %v4869_v36 = vcombine.low %v2536_v1, %v2539_v3  ;;  %v2696_v42 = vsel %vm7066_vm0, %v4901_v55, %v2695_v8  ;;  %v5617_v21 = vld [vmem:[#allocation14 + $0x40] sm:$0xff]  }
 0x2dd   : > { %3300 = vrot.lane.b32.xlu1 %v4966_v14, %s5960_s3  ;;  %v4829_v14 = vcombine.low %v7273_v51, %v2379_v37  ;;  %v4534_v9 = vrot.slane %v4512_v28, 10  ;;  %1281 = vmatprep.mubr.bf16.mxu0 %v5959_v12  ;;  %v1098_v24 = vrot.slane %v4514_v7, 6  ;;  %v5608_v25 = vld [vmem:[#allocation13 + $0x50] sm:$0xff]   ;;  %v3237_v48 = vrot.slane %v7325_v26, 6  ;;  %v7357_v51 = vld [vmem:[%s7037_s20 + $0x214] sm:$0x3] }
 0x2de   : > { %v1097_v38 = vrot.slane %v1095_v11, 4  ;;  %5260 = vmatpush3.bf16.msra.mxu0 %v5603_v58  ;;  %v3734_v54 = vrot.slane %v7328_v30, 6  ;;  %v5594_v57 = vld [vmem:[#allocation8 + $0xc] ss:$16 sps:$4 sm:$0xff]   ;;  %v2699_v62 = vsel %vm7066_vm0, %v2697_v59, %v2698_v61  ;;  %v7364_v0 = vsel %vm7017_vm10, %v4739_v63, %v2066_v41  ;;  %v7373_v27 = vld [vmem:[%s7037_s20 + $0x1b8] sm:$0x8] }
 0x2df   : > { %v1096_v35 = vsel %vm7047_vm14, %v4534_v9, %v1095_v11  ;;  %5261 = vmatprep.subr.bf16.mxu0 %v5605_v10  ;;  %v7368_v8 = vsel %vm7017_vm10, %v2068_v18, %v2069_v20  ;;  %v7376_v33 = vld [vmem:[%s7037_s20 + $0x1bc] sm:$0xf]  ;;  %v7379_v37 = vld [vmem:[%s7037_s20 + $0x1c0] sm:$0x7]  ;;  %v5609_v39 = vld [vmem:[#allocation13 + $0x10] sm:$0xff]   ;;  %v4707_v40 = vcombine.low %v1906_v19, %v1909_v29  ;;  %v3236_v41 = vrot.slane %v3234_v17, 4  ;;  %1352 = vmatprep.subr.bf16.mxu1 %v5594_v57 }
 0x2e0   : > { %3800 = vrot.lane.b32.xlu0 %v5088_v31, %s5961_s4  ;;  %v4959_v31 = vrot.slane %v7312_v6, 10  ;;  %v1099_v13 = vsel %vm7047_vm14, %v1097_v38, %v1098_v24  ;;  %v2382_v44 = vrot.slane %v7376_v33, 7  ;;  %v4515_v45 = vld [vmem:[%s7037_s20 + $0x11c] sm:$0xc]  ;;  %v4516_v46 = vld [vmem:[%s7037_s20 + $0x120] sm:$0xf]  ;;  %v4909_v56 = vcombine.low %v2696_v42, %v2699_v62 }
 0x2e1   : > { %3388 = vrot.lane.b32.xlu1 %v5581_v32, %s5961_s4  ;;  %v7348_v32 = vld [vmem:[%s7037_s20 + $0x20c] sm:$0xc]  ;;  %v4517_v47 = vld [vmem:[%s7037_s20 + $0x124] sm:$0x3]  ;;  %v4535_v49 = vrot.slane %v4515_v45, 10  ;;  %v5610_v53 = vld [vmem:[#allocation13 + $0x58] sm:$0xff]   ;;  %v4747_v55 = vcombine.low %v7364_v0, %v7368_v8  ;;  %v3238_v11 = vsel %vm7047_vm14, %v3236_v41, %v3237_v48 }
 0x2e2   : > { %v5596_v52 = vld [vmem:[#allocation8 + $0x8] ss:$16 sps:$4 sm:$0xff]   ;;  %5262 = vmatpush3.bf16.msra.mxu0 %v5607_v15  ;;  %v5081_v58 = vrot.slane %v7348_v32, 10  ;;  %v1105_v59 = vrot.slane %v4517_v47, 6  ;;  %v7395_v61 = vld [vmem:[%s7037_s20 + $0xcc] sm:$0xc]  ;;  %v3235_v9 = vsel %vm7047_vm14, %v4959_v31, %v3234_v17 }
 0x2e3   : > { %v7398_v60 = vld [vmem:[%s7037_s20 + $0xd0] sm:$0xf]  ;;  %5263 = vmatprep.subr.bf16.mxu0 %v5608_v25  ;;  %v3736_v63 = vrot.slane %v3734_v54, 4  ;;  %v3737_v6 = vrot.slane %v7357_v51, 6  ;;  %v4822_v10 = vrot.slane %v7373_v27, 11  ;;  %1353 = vmatpush1.bf16.msra.mxu1 %v5596_v52  ;;  %v5590_v28 = vld [vmem:[%s7037_s20 + $0x208] sm:$0xff]   ;;  %v4967_v30 = vcombine.low %v3235_v9, %v3238_v11 }
 0x2e4   : > { %3888 = vrot.lane.b32.xlu0 %v5582_v43, %s5962_s19  ;;  %v7384_v43 = vcombine.low %v1096_v35, %v1099_v13  ;;  %v7407_v18 = vld [vmem:[%s7037_s20 + $0xd4] sm:$0x3]  ;;  %v2385_v26 = vrot.slane %v7379_v37, 7  ;;  %v1748_v1 = vrot.slane %v7398_v60, 6  ;;  %v5597_v3 = vld [vmem:[#allocation8 + $0x2c] ss:$16 sps:$4 sm:$0xff]   ;;  %v3735_v32 = vsel %vm7047_vm14, %v5081_v58, %v3734_v54 }
 0x2e5   : > { %3476 = vrot.lane.b32.xlu1 %v5583_v50, %s5962_s19  ;;  %v1102_v50 = vrot.slane %v4516_v46, 6  ;;  %v5611_v20 = vld [vmem:[#allocation13 + $0x18] sm:$0xff]   ;;  %v5612_v7 = vld [vmem:[#allocation13 + $0x60] sm:$0xff]   ;;  %v1751_v17 = vrot.slane %v7407_v18, 6  ;;  %1354 = vmatprep.subr.bf16.mxu1 %v5597_v3  ;;  %v7438_v25 = vld [vmem:[%s7037_s20 + $0x1c4] sm:$0x3]  ;;  %v3738_v35 = vsel %vm7047_vm14, %v3736_v63, %v3737_v6 }
 0x2e6   : > { %4558 = vmatmul.mubr.msk.bf16.gmra.mrb[4].mxu0 %vm1214_vm1, %v7384_v43  ;;  %v7430_v19 = vld [vmem:[%s7037_s20 + $0x1bc] sm:$0xc]  ;;  %v7433_v24 = vld [vmem:[%s7037_s20 + $0x1c0] sm:$0xf]  ;;  %v5599_v31 = vld [vmem:[#allocation8 + $0x28] ss:$16 sps:$4 sm:$0xff]   ;;  %v5089_v46 = vcombine.low %v3735_v32, %v3738_v35 }
 0x2e7   : > { %v1104_v2 = vrot.slane %v1102_v50, 4  ;;  %1291 = vmatprep.mubr.bf16.mxu0 %v5959_v12  ;;  %v1103_v34 = vsel %vm7047_vm14, %v4535_v49, %v1102_v50  ;;  %5264 = vmatpush3.bf16.msra.mxu0 %v5609_v39  ;;  %v2542_v29 = vrot.slane %v7433_v24, 6  ;;  %v7453_v42 = vld [vmem:[%s7037_s20 + $0xd4] sm:$0xf]  ;;  %v7456_v48 = vld [vmem:[%s7037_s20 + $0xd8] sm:$0x1] }
 0x2e8   : > { %2438 = vrot.lane.b32.xlu0 %v4829_v14, %s5960_s3  ;;  %v7414_v14 = vrot.slane %v2382_v44, 4  ;;  %5265 = vmatprep.subr.bf16.mxu0 %v5610_v53  ;;  %v5613_v51 = vld [vmem:[#allocation13 + $0x20] sm:$0xff]   ;;  %v7461_v54 = vrot.slane %v1748_v1, 4  ;;  %v4862_v57 = vrot.slane %v7430_v19, 10  ;;  %v7465_v62 = vld [vmem:[%s7037_s20 + $0x1c0] sm:$0xe] }
 0x2e9   : > { %1804 = vrot.lane.b32.xlu1 %v4667_v16, %s5960_s3  ;;  %v1106_v15 = vsel %vm7047_vm14, %v1104_v2, %v1105_v59  ;;  %v4660_v16 = vrot.slane %v7395_v61, 10  ;;  %1355 = vmatpush1.bf16.msra.mxu1 %v5599_v31  ;;  %v7468_v0 = vld [vmem:[%s7037_s20 + $0x1c4] sm:$0xf]  ;;  %v7472_v13 = vrot.slane %v2542_v29, 4  ;;  %v2545_v39 = vrot.slane %v7438_v25, 6  ;;  %v5591_v47 = vld [vmem:[%s7037_s20 + $0x34] sm:$0xff]  }
 0x2ea   : > { %v7447_v38 = vcombine.low %v1103_v34, %v1106_v15  ;;  %v5615_v8 = vld [vmem:[#allocation13 + $0x68] sm:$0xff]   ;;  %v2702_v45 = vrot.slane %v7468_v0, 5  ;;  %5323 = vmatprep.subr.bf16.mxu1 %v5617_v21  ;;  %v1915_v50 = vrot.slane %v7456_v48, 5  ;;  %v4518_v52 = vld [vmem:[%s7037_s20 + $0x130] sm:$0xc]  ;;  %v5592_v6 = vld [vmem:[%s7037_s20 + $0x214] sm:$0xff]  }
 0x2eb   : > { %v7477_v41 = vld [vmem:[%s7037_s20 + $0x1c8] sm:$0x1]  ;;  %5266 = vmatpush3.bf16.msra.mxu0 %v5611_v20  ;;  %v4519_v53 = vld [vmem:[%s7037_s20 + $0x134] sm:$0xf]  ;;  %v4520_v58 = vld [vmem:[%s7037_s20 + $0x138] sm:$0x3] }
 0x2ec   : > { %2598 = vrot.lane.b32.xlu0 %v4869_v36, %s5961_s4  ;;  %v7450_v36 = vld [vmem:[%s7037_s20 + $0xd0] sm:$0xe]  ;;  %5267 = vmatprep.subr.bf16.mxu0 %v5612_v7  ;;  %v7494_v59 = vld [vmem:[%s7037_s20 + $0x140] sm:$0x8]  ;;  %v4536_v20 = vrot.slane %v4518_v52, 10  ;;  %v1112_v34 = vrot.slane %v4520_v58, 6 }
 0x2ed   : > { %1968 = vrot.lane.b32.xlu1 %v4707_v40, %s5961_s4  ;;  %v1912_v40 = vrot.slane %v7453_v42, 5  ;;  %v4700_v49 = vrot.slane %v7450_v36, 9  ;;  %4565 = vmatmul.mubr.msk.bf16.vlgmr.msra.gmra.mrb[0].mxu1 %vm1214_vm1, %v7316_v4  ;;  %v5616_v63 = vld [vmem:[#allocation13 + $0x28] sm:$0xff]   ;;  %v5618_v7 = vld [vmem:[#allocation13 + $0x70] sm:$0xff]   ;;  %v7506_v4 = vrot.slane %v2702_v45, 4  ;;  %v5593_v15 = vld [vmem:[%s7037_s20 + $0x118] sm:$0xff]  }
 0x2ee   : > { %4559 = vmatmul.mubr.msk.bf16.gmra.mrb[8].mxu0 %vm1214_vm1, %v7447_v38  ;;  %v7502_v3 = vld [vmem:[%s7037_s20 + $0x144] sm:$0xf]  ;;  %v7509_v9 = vld [vmem:[%s7037_s20 + $0x148] sm:$0x7]  ;;  %1394 = vmatprep.mubr.bf16.mxu1 %v5959_v12  ;;  %v7518_v32 = vld [vmem:[%s7037_s20 + $0x40] sm:$0xc] }
 0x2ef   : > { %v1914_v2 = vrot.slane %v1912_v40, 4  ;;  %1301 = vmatprep.mubr.bf16.mxu0 %v5959_v12  ;;  %v2073_v11 = vrot.slane %v7502_v3, 7  ;;  %5268 = vmatpush3.bf16.msra.mxu0 %v5613_v51  ;;  %v5621_v35 = vld [vmem:[#allocation14] sm:$0xff]   ;;  %v2386_v51 = vsel %vm7017_vm10, %v7414_v14, %v2385_v26  ;;  %v7535_v52 = vld [vmem:[%s7037_s20 + $0x44] sm:$0xf]  ;;  %v2076_v37 = vrot.slane %v7509_v9, 7 }
 0x2f0   : > { %2758 = vrot.lane.b32.xlu0 %v4909_v56, %s5962_s19  ;;  %v4902_v56 = vrot.slane %v7465_v62, 9  ;;  %5269 = vmatprep.subr.bf16.mxu0 %v5615_v8  ;;  %v7538_v33 = vld [vmem:[%s7037_s20 + $0x48] sm:$0x3]  ;;  %v1749_v26 = vsel %vm7047_vm14, %v4660_v16, %v1748_v1  ;;  %v7560_v58 = vld [vmem:[%s7037_s20 + $0x220] sm:$0xc] }
 0x2f1   : > { %2129 = vrot.lane.b32.xlu1 %v4747_v55, %s5962_s19  ;;  %v2705_v55 = vrot.slane %v7477_v41, 5  ;;  %v2075_v8 = vrot.slane %v2073_v11, 4  ;;  %v5620_v14 = vld [vmem:[#allocation13 + $0x30] sm:$0xff]   ;;  %5324 = vmatpush3.bf16.msra.mxu1 %v5621_v35  ;;  %v3244_v18 = vrot.slane %v7538_v33, 6  ;;  %v4521_v16 = vld [vmem:[%s7037_s20 + $0x144] sm:$0xc] }
 0x2f2   : > { %v7572_v1 = vld [vmem:[%s7037_s20 + $0x228] sm:$0x3]  ;;  %v4523_v24 = vld [vmem:[%s7037_s20 + $0x14c] sm:$0x3]  ;;  %v4537_v25 = vrot.slane %v4521_v16, 10 }
 0x2f3   : > { %5270 = vmatpush3.bf16.msra.mxu0 %v5616_v63  ;;  %v5082_v63 = vrot.slane %v7560_v58, 10  ;;  %v2077_v41 = vsel %vm7017_vm10, %v2075_v8, %v2076_v37  ;;  %v5626_v37 = vld [vmem:[#allocation13 + $0x38] sm:$0xff]  }
 0x2f4   : > { %3642 = vrot.lane.b32.xlu0 %v5590_v28, %s5960_s3  ;;  %v1109_v28 = vrot.slane %v4519_v53, 6  ;;  %5271 = vmatprep.subr.bf16.mxu0 %v5618_v7 }
 0x2f5   : > { %3302 = vrot.lane.b32.xlu1 %v4967_v30, %s5960_s3  ;;  %v2383_v30 = vsel %vm7017_vm10, %v4822_v10, %v2382_v44  ;;  %v4960_v44 = vrot.slane %v7518_v32, 10  ;;  %v3241_v10 = vrot.slane %v7535_v52, 6  ;;  %4566 = vmatmul.mubr.msk.bf16.gmra.mrb[4].mxu1 %vm1214_vm1, %v7384_v43  ;;  %v1916_v43 = vsel %vm7066_vm0, %v1914_v2, %v1915_v50 }
 0x2f6   : > { %v1110_v21 = vsel %vm7047_vm14, %v4536_v20, %v1109_v28  ;;  %v1111_v31 = vrot.slane %v1109_v28, 4  ;;  %v4830_v61 = vcombine.low %v2383_v30, %v2386_v51  ;;  %v4522_v20 = vld [vmem:[%s7037_s20 + $0x148] sm:$0xf]  ;;  %v3744_v28 = vrot.slane %v7572_v1, 6  ;;  %1404 = vmatprep.mubr.bf16.mxu1 %v5959_v12  ;;  %v5600_v51 = vld [vmem:[%s7037_s20 + $0x21c] sm:$0xff]  }
 0x2f7   : > { %v7568_v60 = vrot.slane %v3241_v10, 4  ;;  %5272 = vmatpush3.bf16.msra.mxu0 %v5620_v14  ;;  %v2706_v50 = vsel %vm7066_vm0, %v7506_v4, %v2705_v55  ;;  %v7639_v55 = vld [vmem:[%s7037_s20 + $0x1d0] sm:$0xf]  ;;  %v4811_v4 = vld [vmem:[%s7037_s20 + $0x1d4] sm:$0x7]  ;;  %v3242_v14 = vsel %vm7047_vm14, %v4960_v44, %v3241_v10 }
 0x2f8   : > { %3802 = vrot.lane.b32.xlu0 %v5089_v46, %s5961_s4  ;;  %v4740_v46 = vrot.slane %v7494_v59, 11  ;;  %v1113_v27 = vsel %vm7047_vm14, %v1111_v31, %v1112_v34  ;;  %v7563_v59 = vld [vmem:[%s7037_s20 + $0x224] sm:$0xf]  ;;  %v2389_v3 = vrot.slane %v7639_v55, 7  ;;  %v4526_v31 = vld [vmem:[%s7037_s20 + $0x160] sm:$0x3] }
 0x2f9   : > { %3390 = vrot.lane.b32.xlu1 %v5591_v47, %s5961_s4  ;;  %v1752_v47 = vsel %vm7047_vm14, %v7461_v54, %v1751_v17  ;;  %v7557_v53 = vcombine.low %v1110_v21, %v1113_v27  ;;  %v2543_v17 = vsel %vm7047_vm14, %v4862_v57, %v2542_v29  ;;  %v2546_v54 = vsel %vm7047_vm14, %v7472_v13, %v2545_v39  ;;  %v5623_v13 = vld [vmem:[#allocation13 + $0x78] sm:$0xff]   ;;  %v5624_v34 = vld [vmem:[#allocation14 + $0x48] sm:$0xff]   ;;  %v4525_v21 = vld [vmem:[%s7037_s20 + $0x15c] sm:$0xf] }
 0x2fa   : > { %v4668_v19 = vcombine.low %v1749_v26, %v1752_v47  ;;  %v1116_v29 = vrot.slane %v4522_v20, 6  ;;  %v1119_v57 = vrot.slane %v4523_v24, 6  ;;  %v1913_v39 = vsel %vm7066_vm0, %v4700_v49, %v1912_v40  ;;  %5273 = vmatprep.subr.bf16.mxu0 %v5623_v13  ;;  %5325 = vmatprep.subr.bf16.mxu1 %v5624_v34  ;;  %v7667_v26 = vld [vmem:[%s7037_s20 + $0xe0] sm:$0xc]  ;;  %v7670_v47 = vld [vmem:[%s7037_s20 + $0xe4] sm:$0xf] }
 0x2fb   : > { %4560 = vmatmul.mubr.msk.bf16.gmra.mrb[12].mxu0 %vm1214_vm1, %v7557_v53  ;;  %v4870_v42 = vcombine.low %v2543_v17, %v2546_v54  ;;  %v2703_v49 = vsel %vm7066_vm0, %v4902_v56, %v2702_v45  ;;  %v4708_v2 = vcombine.low %v1913_v39, %v1916_v43  ;;  %v2074_v62 = vsel %vm7017_vm10, %v4740_v46, %v2073_v11  ;;  %v7636_v56 = vld [vmem:[%s7037_s20 + $0x1cc] sm:$0x8]  ;;  %v7677_v44 = vld [vmem:[%s7037_s20 + $0xe8] sm:$0x3]  ;;  %v4849_v1 = vld [vmem:[%s7037_s20 + $0x1d0] sm:$0xc] }
 0x2fc   : > { %3890 = vrot.lane.b32.xlu0 %v5592_v6, %s5962_s19  ;;  %v3741_v6 = vrot.slane %v7563_v59, 6  ;;  %1311 = vmatprep.mubr.bf16.mxu0 %v5959_v12  ;;  %v1117_v48 = vsel %vm7047_vm14, %v4537_v25, %v1116_v29  ;;  %v1118_v40 = vrot.slane %v1116_v29, 4  ;;  %v4910_v7 = vcombine.low %v2703_v49, %v2706_v50  ;;  %v4850_v59 = vld [vmem:[%s7037_s20 + $0x1d4] sm:$0xf]  ;;  %v4851_v17 = vld [vmem:[%s7037_s20 + $0x1d8] sm:$0x3] }
 0x2fd   : > { %3478 = vrot.lane.b32.xlu1 %v5593_v15, %s5962_s19  ;;  %v4823_v9 = vrot.slane %v7636_v56, 11  ;;  %v4524_v15 = vld [vmem:[%s7037_s20 + $0x158] sm:$0xc]  ;;  %v2392_v11 = vrot.slane %v4811_v4, 7  ;;  %4567 = vmatmul.mubr.msk.bf16.gmra.mrb[8].mxu1 %vm1214_vm1, %v7447_v38  ;;  %v4748_v30 = vcombine.low %v2074_v62, %v2077_v41  ;;  %v2391_v46 = vrot.slane %v2389_v3, 4  ;;  %v5602_v25 = vld [vmem:[%s7037_s20 + $0x48] sm:$0xff]  }
 0x2fe   : > { %v3743_v36 = vrot.slane %v3741_v6, 4  ;;  %v1120_v0 = vsel %vm7047_vm14, %v1118_v40, %v1119_v57  ;;  %v4538_v35 = vrot.slane %v4524_v15, 10  ;;  %v1123_v8 = vrot.slane %v4525_v21, 6  ;;  %1414 = vmatprep.mubr.bf16.mxu1 %v5959_v12  ;;  %5274 = vmatpush3.bf16.msra.mxu0 %v5626_v37  ;;  %v7701_v57 = vld [vmem:[%s7037_s20 + $0xe4] sm:$0xe]  ;;  %v5628_v39 = vld [vmem:[#allocation14 + $0x50] sm:$0xff]  }
 0x2ff   : > { %v7633_v45 = vcombine.low %v1117_v48, %v1120_v0  ;;  %v1126_v27 = vrot.slane %v4526_v31, 6  ;;  %v3245_v38 = vsel %vm7047_vm14, %v7568_v60, %v3244_v18  ;;  %v4661_v33 = vrot.slane %v7667_v26, 10  ;;  %v7704_v13 = vld [vmem:[%s7037_s20 + $0xe8] sm:$0xf]  ;;  %v4752_v50 = vld [vmem:[%s7037_s20 + $0xf8] sm:$0xe] }
 0x300   : > { %2440 = vrot.lane.b32.xlu0 %v4830_v61, %s5960_s3  ;;  %v1124_v32 = vsel %vm7047_vm14, %v4538_v35, %v1123_v8  ;;  %v1125_v52 = vrot.slane %v1123_v8, 4  ;;  %v3742_v10 = vsel %vm7047_vm14, %v5082_v63, %v3741_v6  ;;  %v3745_v61 = vsel %vm7047_vm14, %v3743_v36, %v3744_v28  ;;  %v5627_v63 = vld [vmem:[#allocation14 + $0x8] sm:$0xff]   ;;  %v7709_v28 = vld [vmem:[%s7037_s20 + $0xec] sm:$0x1]  ;;  %v4890_v4 = vld [vmem:[%s7037_s20 + $0x1d8] sm:$0xf] }
 0x301   : > { %1806 = vrot.lane.b32.xlu1 %v4668_v19, %s5960_s3  ;;  %v1755_v60 = vrot.slane %v7670_v47, 6  ;;  %v1758_v18 = vrot.slane %v7677_v44, 6  ;;  %v4968_v16 = vcombine.low %v3242_v14, %v3245_v38  ;;  %v4863_v54 = vrot.slane %v4849_v1, 10  ;;  %5326 = vmatpush3.bf16.msra.mxu1 %v5627_v63  ;;  %v5629_v62 = vld [vmem:[#allocation14 + $0x10] sm:$0xff]   ;;  %v4891_v15 = vld [vmem:[%s7037_s20 + $0x1dc] sm:$0x1] }
 0x302   : > { %v1127_v58 = vsel %vm7047_vm14, %v1125_v52, %v1126_v27  ;;  %v2549_v24 = vrot.slane %v4850_v59, 6  ;;  %v5090_v19 = vcombine.low %v3742_v10, %v3745_v61  ;;  %v2552_v29 = vrot.slane %v4851_v17, 6  ;;  %5327 = vmatprep.subr.bf16.mxu1 %v5628_v39  ;;  %v5606_v41 = vld [vmem:[%s7037_s20 + $0x12c] sm:$0xff]   ;;  %v4529_v26 = vld [vmem:[%s7037_s20 + $0x174] sm:$0x3] }
 0x303   : > { %4561 = vmatmul.mubr.msk.bf16.gmra.mrb[16].mxu0 %vm1214_vm1, %v7633_v45  ;;  %v7696_v6 = vcombine.low %v1124_v32, %v1127_v58  ;;  %v1757_v20 = vrot.slane %v1755_v60, 4  ;;  %v4701_v34 = vrot.slane %v7701_v57, 9  ;;  %v7718_v36 = vsel %vm7017_vm10, %v4823_v9, %v2389_v3  ;;  %v5630_v31 = vld [vmem:[#allocation14 + $0x58] sm:$0xff]   ;;  %v4527_v8 = vld [vmem:[%s7037_s20 + $0x16c] sm:$0xc] }
 0x304   : > { %2600 = vrot.lane.b32.xlu0 %v4870_v42, %s5961_s4  ;;  %1321 = vmatprep.mubr.bf16.mxu0 %v5959_v12  ;;  %v2551_v43 = vrot.slane %v2549_v24, 4  ;;  %v5604_v42 = vld [vmem:[%s7037_s20 + $0x228] sm:$0xff]   ;;  %v7722_v48 = vsel %vm7017_vm10, %v2391_v46, %v2392_v11  ;;  %v1919_v40 = vrot.slane %v7704_v13, 5  ;;  %v1922_v49 = vrot.slane %v7709_v28, 5  ;;  %v4528_v27 = vld [vmem:[%s7037_s20 + $0x170] sm:$0xf] }
 0x305   : > { %1970 = vrot.lane.b32.xlu1 %v4708_v2, %s5961_s4  ;;  %4568 = vmatmul.mubr.msk.bf16.gmra.mrb[12].mxu1 %vm1214_vm1, %v7557_v53  ;;  %v4753_v53 = vld [vmem:[%s7037_s20 + $0xfc] sm:$0xf]  ;;  %v4754_v2 = vld [vmem:[%s7037_s20 + $0x100] sm:$0x1]  ;;  %v4776_v0 = vrot.slane %v4752_v50, 9  ;;  %v4831_v9 = vcombine.low %v7718_v36, %v7722_v48  ;;  %v2709_v21 = vrot.slane %v4890_v4, 5  ;;  %v1756_v35 = vsel %vm7047_vm14, %v4661_v33, %v1755_v60 }
 0x306   : > { %1424 = vmatprep.mubr.bf16.mxu1 %v5959_v12  ;;  %v1921_v56 = vrot.slane %v1919_v40, 4  ;;  %v2206_v55 = vrot.slane %v4753_v53, 5  ;;  %v2209_v3 = vrot.slane %v4754_v2, 5  ;;  %5328 = vmatpush3.bf16.msra.mxu1 %v5629_v62  ;;  %v2712_v46 = vrot.slane %v4891_v15, 5  ;;  %v4727_v10 = vld [vmem:[%s7037_s20 + $0x154] sm:$0x8] }
 0x307   : > { %v1759_v37 = vsel %vm7047_vm14, %v1757_v20, %v1758_v18  ;;  %v2550_v14 = vsel %vm7047_vm14, %v4863_v54, %v2549_v24  ;;  %v2711_v38 = vrot.slane %v2709_v21, 4  ;;  %v4539_v47 = vrot.slane %v4527_v8, 10  ;;  %5329 = vmatprep.subr.bf16.mxu1 %v5630_v31  ;;  %v4728_v60 = vld [vmem:[%s7037_s20 + $0x158] sm:$0xf]  ;;  %v4729_v18 = vld [vmem:[%s7037_s20 + $0x15c] sm:$0x7] }
 0x308   : > { %2760 = vrot.lane.b32.xlu0 %v4910_v7, %s5962_s19  ;;  %v4889_v7 = vld [vmem:[%s7037_s20 + $0x1d4] sm:$0xe]  ;;  %v2553_v32 = vsel %vm7047_vm14, %v2551_v43, %v2552_v29  ;;  %v1130_v44 = vrot.slane %v4528_v27, 6  ;;  %v1133_v33 = vrot.slane %v4529_v26, 6  ;;  %v4741_v1 = vrot.slane %v4727_v10, 11  ;;  %v5634_v10 = vld [vmem:[#allocation14 + $0x60] sm:$0xff]  }
 0x309   : > { %2131 = vrot.lane.b32.xlu1 %v4748_v30, %s5962_s19  ;;  %v4903_v11 = vrot.slane %v4889_v7, 9  ;;  %v2207_v30 = vsel %vm7066_vm0, %v4776_v0, %v2206_v55  ;;  %v4669_v58 = vcombine.low %v1756_v35, %v1759_v37  ;;  %v2080_v54 = vrot.slane %v4728_v60, 7  ;;  %v4594_v39 = vld [vmem:[%s7037_s20 + $0x80] sm:$0x7]  ;;  %v3183_v50 = vld [vmem:[%s7037_s20 + $0x58] sm:$0xf] }
 0x30a   : > { %v1131_v59 = vsel %vm7047_vm14, %v4539_v47, %v1130_v44  ;;  %v1132_v17 = vrot.slane %v1130_v44, 4  ;;  %v4871_v63 = vcombine.low %v2550_v14, %v2553_v32  ;;  %v1920_v20 = vsel %vm7066_vm0, %v4701_v34, %v1919_v40  ;;  %v3184_v62 = vld [vmem:[%s7037_s20 + $0x5c] sm:$0x3]  ;;  %v4532_v37 = vld [vmem:[%s7037_s20 + $0x188] sm:$0x3] }
 0x30b   : > { %4562 = vmatmul.mubr.msk.bf16.gmra.mrb[20].mxu0 %vm1214_vm1, %v7696_v6  ;;  %v2083_v24 = vrot.slane %v4729_v18, 7  ;;  %v2710_v29 = vsel %vm7066_vm0, %v4903_v11, %v2709_v21  ;;  %v2082_v13 = vrot.slane %v2080_v54, 4  ;;  %v2713_v28 = vsel %vm7066_vm0, %v2711_v38, %v2712_v46  ;;  %v5069_v35 = vld [vmem:[%s7037_s20 + $0x23c] sm:$0x3]  ;;  %v5614_v38 = vld [vmem:[%s7037_s20 + $0x230] sm:$0xff]  }
 0x30c   : > { %3644 = vrot.lane.b32.xlu0 %v5600_v51, %s5960_s3  ;;  %1331 = vmatprep.mubr.bf16.mxu0 %v5959_v12  ;;  %v2208_v51 = vrot.slane %v2206_v55, 4  ;;  %v1134_v57 = vsel %vm7047_vm14, %v1132_v17, %v1133_v33  ;;  %v1579_v36 = vrot.slane %v4594_v39, 7  ;;  %v2081_v40 = vsel %vm7017_vm10, %v4741_v1, %v2080_v54 }
 0x30d   : > { %3304 = vrot.lane.b32.xlu1 %v4968_v16, %s5960_s3  ;;  %4569 = vmatmul.mubr.msk.bf16.gmra.mrb[16].mxu1 %vm1214_vm1, %v7633_v45  ;;  %v5631_v16 = vld [vmem:[#allocation14 + $0x18] sm:$0xff]   ;;  %v1923_v45 = vsel %vm7066_vm0, %v1921_v56, %v1922_v49  ;;  %v7781_v34 = vcombine.low %v1131_v59, %v1134_v57  ;;  %v2084_v53 = vsel %vm7017_vm10, %v2082_v13, %v2083_v24  ;;  %v3248_v55 = vrot.slane %v3183_v50, 6  ;;  %v4595_v13 = vld [vmem:[%s7037_s20 + $0x8c] sm:$0x8] }
 0x30e   : > { %v2210_v52 = vsel %vm7066_vm0, %v2208_v51, %v2209_v3  ;;  %1434 = vmatprep.mubr.bf16.mxu1 %v5959_v12  ;;  %5330 = vmatpush3.bf16.msra.mxu1 %v5631_v16  ;;  %v4709_v48 = vcombine.low %v1920_v20, %v1923_v45  ;;  %v3182_v49 = vld [vmem:[%s7037_s20 + $0x54] sm:$0xc]  ;;  %v4911_v56 = vcombine.low %v2710_v29, %v2713_v28  ;;  %v3251_v7 = vrot.slane %v3184_v62, 6  ;;  %v5068_v3 = vld [vmem:[%s7037_s20 + $0x238] sm:$0xf] }
 0x30f   : > { %v4784_v61 = vcombine.low %v2207_v30, %v2210_v52  ;;  %v4749_v11 = vcombine.low %v2081_v40, %v2084_v53  ;;  %v3250_v31 = vrot.slane %v3248_v55, 4  ;;  %v4530_v51 = vld [vmem:[%s7037_s20 + $0x180] sm:$0xc]  ;;  %v3748_v8 = vrot.slane %v5068_v3, 6  ;;  %v5635_v16 = vld [vmem:[#allocation14 + $0x20] sm:$0xff]   ;;  %5331 = vmatprep.subr.bf16.mxu1 %v5634_v10  ;;  %v5641_v10 = vld [vmem:[#allocation14 + $0x30] sm:$0xff]  }
 0x310   : > { %3804 = vrot.lane.b32.xlu0 %v5090_v19, %s5961_s4  ;;  %v4592_v19 = vld [vmem:[%s7037_s20 + $0x78] sm:$0x8]  ;;  %v3751_v27 = vrot.slane %v5069_v35, 6  ;;  %v4540_v47 = vrot.slane %v4530_v51, 10  ;;  %v1140_v52 = vrot.slane %v4532_v37, 6  ;;  %v5638_v53 = vld [vmem:[#allocation14 + $0x28] sm:$0xff]  }
 0x311   : > { %3392 = vrot.lane.b32.xlu1 %v5602_v25, %s5961_s4  ;;  %2292 = vst.msk [vmem:[#allocation4 + $0x8] sm:$0xff] %vm1214_vm1, %v4784_v61  ;;  %v4593_v25 = vld [vmem:[%s7037_s20 + $0x7c] sm:$0xf]  ;;  %v4616_v43 = vrot.slane %v4592_v19, 11  ;;  %v3252_v26 = vsel %vm7047_vm14, %v3250_v31, %v3251_v7  ;;  %v3750_v33 = vrot.slane %v3748_v8, 4 }
 0x312   : > { %v4756_v20 = vld [vmem:[%s7037_s20 + $0x110] sm:$0xf]  ;;  %v4757_v45 = vld [vmem:[%s7037_s20 + $0x114] sm:$0x1]  ;;  %5332 = vmatpush3.bf16.msra.mxu1 %v5635_v16  ;;  %v5619_v19 = vld [vmem:[%s7037_s20 + $0x5c] sm:$0xff]  }
 0x313   : > { %4563 = vmatmul.mubr.msk.bf16.gmra.mrb[24].mxu0 %vm1214_vm1, %v7781_v34  ;;  %v2213_v29 = vrot.slane %v4756_v20, 5  ;;  %v2216_v57 = vrot.slane %v4757_v45, 5  ;;  %v4597_v28 = vld [vmem:[%s7037_s20 + $0x94] sm:$0x7]  ;;  %v4814_v31 = vld [vmem:[%s7037_s20 + $0x1e8] sm:$0x7] }
 0x314   : > { %3892 = vrot.lane.b32.xlu0 %v5604_v42, %s5962_s19  ;;  %v1576_v42 = vrot.slane %v4593_v25, 7  ;;  %1341 = vmatprep.mubr.bf16.mxu0 %v5959_v12  ;;  %v1586_v50 = vrot.slane %v4597_v28, 7  ;;  %v2399_v51 = vrot.slane %v4814_v31, 7  ;;  %v4690_v45 = vld [vmem:[%s7037_s20 + $0xf8] sm:$0xe] }
 0x315   : > { %3480 = vrot.lane.b32.xlu1 %v5606_v41, %s5962_s19  ;;  %v4961_v41 = vrot.slane %v3182_v49, 10  ;;  %4570 = vmatmul.mubr.msk.bf16.gmra.mrb[20].mxu1 %vm1214_vm1, %v7696_v6  ;;  %v4531_v6 = vld [vmem:[%s7037_s20 + $0x184] sm:$0xf]  ;;  %v4732_v31 = vld [vmem:[%s7037_s20 + $0x170] sm:$0x7] }
 0x316   : > { %v1577_v2 = vsel %vm7017_vm10, %v4616_v43, %v1576_v42  ;;  %v1578_v0 = vrot.slane %v1576_v42, 4  ;;  %1444 = vmatprep.mubr.bf16.mxu1 %v5959_v12  ;;  %v1137_v32 = vrot.slane %v4531_v6, 6  ;;  %v4596_v43 = vld [vmem:[%s7037_s20 + $0x90] sm:$0xf]  ;;  %v4617_v42 = vrot.slane %v4595_v13, 11 }
 0x317   : > { %v3249_v46 = vsel %vm7047_vm14, %v4961_v41, %v3248_v55  ;;  %v1583_v49 = vrot.slane %v4596_v43, 7  ;;  %v5639_v55 = vld [vmem:[#allocation14 + $0x70] sm:$0xff]   ;;  %v4650_v6 = vld [vmem:[%s7037_s20 + $0xf4] sm:$0xc] }
 0x318   : > { %2442 = vrot.lane.b32.xlu0 %v4831_v9, %s5960_s3  ;;  %v1580_v4 = vsel %vm7017_vm10, %v1578_v0, %v1579_v36  ;;  %v5067_v9 = vld [vmem:[%s7037_s20 + $0x234] sm:$0xc]  ;;  %v4969_v60 = vcombine.low %v3249_v46, %v3252_v26  ;;  %v1138_v18 = vsel %vm7047_vm14, %v4540_v47, %v1137_v32  ;;  %v1139_v1 = vrot.slane %v1137_v32, 4  ;;  %v5622_v36 = vld [vmem:[%s7037_s20 + $0x23c] sm:$0xff]  }
 0x319   : > { %1808 = vrot.lane.b32.xlu1 %v4669_v58, %s5960_s3  ;;  %v4624_v21 = vcombine.low %v1577_v2, %v1580_v4  ;;  %v5083_v30 = vrot.slane %v5067_v9, 10  ;;  %v3752_v58 = vsel %vm7047_vm14, %v3750_v33, %v3751_v27  ;;  %v5625_v0 = vld [vmem:[%s7037_s20 + $0x140] sm:$0xff]   ;;  %v1584_v62 = vsel %vm7017_vm10, %v4617_v42, %v1583_v49  ;;  %v4652_v26 = vld [vmem:[%s7037_s20 + $0xfc] sm:$0x3] }
 0x31a   : > { %v1141_v54 = vsel %vm7047_vm14, %v1139_v1, %v1140_v52  ;;  %v1585_v41 = vrot.slane %v1583_v49, 4  ;;  %v5633_v46 = vld [vmem:[%s7037_s20] sm:$0xff]   ;;  %v4662_v47 = vrot.slane %v4650_v6, 10  ;;  %v1765_v33 = vrot.slane %v4652_v26, 6 }
 0x31b   : > { %1662 = vst.msk [vmem:[#allocation4] sm:$0xff] %vm1214_vm1, %v4624_v21  ;;  %v3749_v44 = vsel %vm7047_vm14, %v5083_v30, %v3748_v8  ;;  %v4548_v24 = vcombine.low %v1138_v18, %v1141_v54  ;;  %v4813_v21 = vld [vmem:[%s7037_s20 + $0x1e4] sm:$0xf]  ;;  %v4853_v18 = vld [vmem:[%s7037_s20 + $0x1e8] sm:$0xf] }
 0x31c   : > { %2602 = vrot.lane.b32.xlu0 %v4871_v63, %s5961_s4  ;;  %v5091_v17 = vcombine.low %v3749_v44, %v3752_v58  ;;  %v4755_v63 = vld [vmem:[%s7037_s20 + $0x10c] sm:$0xe]  ;;  %v1587_v9 = vsel %vm7017_vm10, %v1585_v41, %v1586_v50  ;;  %v2396_v30 = vrot.slane %v4813_v21, 7 }
 0x31d   : > { %1972 = vrot.lane.b32.xlu1 %v4709_v48, %s5961_s4  ;;  %v2433_v15 = vpop.permute.xlu0 %2432  ;;  %v4777_v25 = vrot.slane %v4755_v63, 9  ;;  %4571 = vmatmul.mubr.msk.bf16.gmra.mrb[24].mxu1 %vm1214_vm1, %v7781_v34  ;;  %v5637_v48 = vld [vmem:[#allocation14 + $0x68] sm:$0xff]   ;;  %v2215_v34 = vrot.slane %v2213_v29, 4  ;;  %v2556_v63 = vrot.slane %v4853_v18, 6 }
 0x31e   : > { %2456 = vst.msk [vmem:[#allocation4 + $0x8] sm:$0xff] %vm1822_vm2, %v2433_v15  ;;  %1454 = vmatprep.mubr.bf16.mxu1 %v5959_v12  ;;  %4564 = vmatmul.mubr.msk.bf16.gmra.mrb[28].mxu0 %vm1214_vm1, %v4548_v24  ;;  %v4625_v15 = vcombine.low %v1584_v62, %v1587_v9  ;;  %v4730_v9 = vld [vmem:[%s7037_s20 + $0x168] sm:$0x8] }
 0x31f   : > { %v2593_v14 = vpop.permute.xlu1 %2592  ;;  %v2214_v40 = vsel %vm7066_vm0, %v4777_v25, %v2213_v29  ;;  %5333 = vmatprep.subr.bf16.mxu1 %v5637_v48  ;;  %v2217_v12 = vsel %vm7066_vm0, %v2215_v34, %v2216_v57  ;;  %v4691_v25 = vld [vmem:[%s7037_s20 + $0xfc] sm:$0xf]  ;;  %v4692_v29 = vld [vmem:[%s7037_s20 + $0x100] sm:$0x1]  ;;  %v4702_v57 = vrot.slane %v4690_v45, 9  ;;  %v2558_v43 = vrot.slane %v2556_v63, 4 }
 0x320   : > { %2762 = vrot.lane.b32.xlu0 %v4911_v56, %s5962_s19  ;;  %2616 = vst.msk [vmem:[#allocation4 + $0x8] sm:$0xff] %vm1986_vm3, %v2593_v14  ;;  %v5632_v56 = vld [vmem:[%s7037_s20 + $0xfc] sm:$0xff]   ;;  %5334 = vmatpush3.bf16.msra.mxu1 %v5638_v53  ;;  %v4785_v7 = vcombine.low %v2214_v40, %v2217_v12  ;;  %v2398_v14 = vrot.slane %v2396_v30, 4  ;;  %v1926_v28 = vrot.slane %v4691_v25, 5  ;;  %v1929_v42 = vrot.slane %v4692_v29, 5  ;;  %v5643_v48 = vld [vmem:[#allocation14 + $0x78] sm:$0xff]  }
 0x321   : > { %2133 = vrot.lane.b32.xlu1 %v4749_v11, %s5962_s19  ;;  %5335 = vmatprep.subr.bf16.mxu1 %v5639_v55  ;;  %v4812_v11 = vld [vmem:[%s7037_s20 + $0x1e0] sm:$0x8]  ;;  %1663 = vst.msk [vmem:[#allocation4 + $0x10] sm:$0xff] %vm1214_vm1, %v4625_v15  ;;  %v4894_v12 = vld [vmem:[%s7037_s20 + $0x1f0] sm:$0x1] }
 0x322   : > { %v1799_v61 = vpop.permute.xlu0 %1798  ;;  %2293 = vst.msk [vmem:[#allocation4 + $0x18] sm:$0xff] %vm1214_vm1, %v4785_v7  ;;  %v4824_v35 = vrot.slane %v4812_v11, 11  ;;  %v1927_v34 = vsel %vm7066_vm0, %v4702_v57, %v1926_v28  ;;  %v1928_v49 = vrot.slane %v1926_v28, 4  ;;  %v2719_v55 = vrot.slane %v4894_v12, 5  ;;  %v5645_v7 = vld [vmem:[#allocation14 + $0x38] sm:$0xff]  }
 0x323   : > { %1823 = vst.msk [vmem:[#allocation4] sm:$0xff] %vm1822_vm2, %v1799_v61  ;;  %v1963_v59 = vpop.permute.xlu1 %1962  ;;  %v2400_v61 = vsel %vm7017_vm10, %v2398_v14, %v2399_v51  ;;  %v5640_v28 = vld [vmem:[%s7037_s20 + $0x70] sm:$0xff]   ;;  %v4599_v12 = vld [vmem:[%s7037_s20 + $0xa4] sm:$0xf] }
 0x324   : > { %3646 = vrot.lane.b32.xlu0 %v5614_v38, %s5960_s3  ;;  %1987 = vst.msk [vmem:[#allocation4] sm:$0xff] %vm1986_vm3, %v1963_v59  ;;  %v2397_v37 = vsel %vm7017_vm10, %v4824_v35, %v2396_v30  ;;  %v4651_v38 = vld [vmem:[%s7037_s20 + $0xf8] sm:$0xf]  ;;  %5336 = vmatpush3.bf16.msra.mxu1 %v5641_v10  ;;  %v1930_v62 = vsel %vm7066_vm0, %v1928_v49, %v1929_v42  ;;  %v4742_v35 = vrot.slane %v4730_v9, 11  ;;  %v3187_v10 = vld [vmem:[%s7037_s20 + $0x70] sm:$0x3] }
 0x325   : > { %3306 = vrot.lane.b32.xlu1 %v4969_v60, %s5960_s3  ;;  %4572 = vmatmul.mubr.msk.bf16.gmra.mrb[28].mxu1 %vm1214_vm1, %v4548_v24  ;;  %v1762_v44 = vrot.slane %v4651_v38, 6  ;;  %v4852_v60 = vld [vmem:[%s7037_s20 + $0x1e4] sm:$0xc]  ;;  %v4832_v1 = vcombine.low %v2397_v37, %v2400_v61  ;;  %v5646_v38 = vld [vmem:[%s7037_s20 + $0x110] sm:$0xff]   ;;  %v4758_v42 = vld [vmem:[%s7037_s20 + $0x120] sm:$0xe] }
 0x326   : > { %v2753_v39 = vpop.permute.xlu0 %2752  ;;  %v4864_v54 = vrot.slane %v4852_v60, 10  ;;  %5337 = vmatprep.subr.bf16.mxu1 %v5643_v48  ;;  %v5647_v60 = vld [vmem:[%s7037_s20 + $0x14] sm:$0xff]  }
 0x327   : > { %2776 = vst.msk [vmem:[#allocation4 + $0x8] sm:$0xff] %vm2147_vm4, %v2753_v39  ;;  %v2124_v2 = vpop.permute.xlu1 %2123  ;;  %v1763_v16 = vsel %vm7047_vm14, %v4662_v47, %v1762_v44  ;;  %v1764_v58 = vrot.slane %v1762_v44, 4  ;;  %v5636_v47 = vld [vmem:[%s7037_s20 + $0x244] sm:$0xff]  }
 0x328   : > { %3806 = vrot.lane.b32.xlu0 %v5091_v17, %s5961_s4  ;;  %2148 = vst.msk [vmem:[#allocation4] sm:$0xff] %vm2147_vm4, %v2124_v2  ;;  %v4854_v17 = vld [vmem:[%s7037_s20 + $0x1ec] sm:$0x3]  ;;  %v2557_v39 = vsel %vm7047_vm14, %v4864_v54, %v2556_v63  ;;  %v4892_v2 = vld [vmem:[%s7037_s20 + $0x1e8] sm:$0xe]  ;;  %5338 = vmatpush3.bf16.msra.mxu1 %v5645_v7 }
 0x329   : > { %3394 = vrot.lane.b32.xlu1 %v5619_v19, %s5961_s4  ;;  %v2559_v20 = vrot.slane %v4854_v17, 6  ;;  %v1766_v24 = vsel %vm7047_vm14, %v1764_v58, %v1765_v33  ;;  %v4904_v41 = vrot.slane %v4892_v2, 9  ;;  %v3186_v33 = vld [vmem:[%s7037_s20 + $0x6c] sm:$0xf]  ;;  %v5072_v54 = vld [vmem:[%s7037_s20 + $0x250] sm:$0x3] }
 0x32a   : > { %v2435_v4 = vpop.permute.xlu0 %2434  ;;  %v4670_v13 = vcombine.low %v1763_v16, %v1766_v24  ;;  %v3258_v16 = vrot.slane %v3187_v10, 6  ;;  %v5071_v17 = vld [vmem:[%s7037_s20 + $0x24c] sm:$0xf]  ;;  %v3758_v25 = vrot.slane %v5072_v54, 6 }
 0x32b   : > { %v1801_v3 = vpop.permute.xlu1 %1800  ;;  %2457 = vst.msk [vmem:[#allocation4 + $0x18] sm:$0xff] %vm1822_vm2, %v2435_v4  ;;  %v2560_v40 = vsel %vm7047_vm14, %v2558_v43, %v2559_v20  ;;  %v4710_v4 = vcombine.low %v1927_v34, %v1930_v62  ;;  %v3755_v24 = vrot.slane %v5071_v17, 6  ;;  %v4778_v34 = vrot.slane %v4758_v42, 9  ;;  %v4600_v62 = vld [vmem:[%s7037_s20 + $0xa8] sm:$0x7] }
 0x32c   : > { %3894 = vrot.lane.b32.xlu0 %v5622_v36, %s5962_s19  ;;  %1824 = vst.msk [vmem:[#allocation4 + $0x10] sm:$0xff] %vm1822_vm2, %v1801_v3  ;;  %v4872_v50 = vcombine.low %v2557_v39, %v2560_v40  ;;  %v4731_v3 = vld [vmem:[%s7037_s20 + $0x16c] sm:$0xf]  ;;  %v4760_v40 = vld [vmem:[%s7037_s20 + $0x128] sm:$0x1]  ;;  %v1593_v9 = vrot.slane %v4600_v62, 7 }
 0x32d   : > { %3482 = vrot.lane.b32.xlu1 %v5625_v0, %s5962_s19  ;;  %v4893_v0 = vld [vmem:[%s7037_s20 + $0x1ec] sm:$0xf]  ;;  %v2087_v30 = vrot.slane %v4731_v3, 7  ;;  %v4857_v17 = vld [vmem:[%s7037_s20 + $0x200] sm:$0x3] }
 0x32e   : > { %v2595_v8 = vpop.permute.xlu0 %2594  ;;  %v2785_v27 = vld [vmem:[#allocation4 + $0x8] sm:$0xff] }
 0x32f   : > { %2617 = vst.msk [vmem:[#allocation4 + $0x18] sm:$0xff] %vm1986_vm3, %v2595_v8  ;;  %2960 = vmatprep.mubr.bf16.mxu0 %v2785_v27  ;;  %v1965_v32 = vpop.permute.xlu1 %1964  ;;  %v2784_v52 = vld [vmem:[#allocation4] sm:$0xff]  ;;  %v2088_v37 = vsel %vm7017_vm10, %v4742_v35, %v2087_v30  ;;  %v2089_v14 = vrot.slane %v2087_v30, 4 }
 0x330   : > { %3570 = vst.msk [vmem:[#allocation4 + $0x8] sm:$0xff] %vm1214_vm1, %v5632_v56  ;;  %2961 = vmatmul.mubr.bf16.vlgmr.msra.gmra.mrb[32].mxu0 %v2784_v52  ;;  %3162 = vst.msk [vmem:[#allocation4] sm:$0xff] %vm1214_vm1, %v5633_v46  ;;  %2444 = vrot.lane.b32.xlu0 %v4832_v1, %s5960_s3  ;;  %v2716_v56 = vrot.slane %v4893_v0, 5  ;;  %v2090_v46 = vrot.slane %v4732_v31, 7  ;;  %v3255_v1 = vrot.slane %v3186_v33, 6  ;;  %v2223_v0 = vrot.slane %v4760_v40, 5 }
 0x331   : > { %1988 = vst.msk [vmem:[#allocation4 + $0x10] sm:$0xff] %vm1986_vm3, %v1965_v32  ;;  %1810 = vrot.lane.b32.xlu1 %v4670_v13, %s5960_s3  ;;  %v3185_v32 = vld [vmem:[%s7037_s20 + $0x68] sm:$0xc]  ;;  %v3757_v13 = vrot.slane %v3755_v24, 4  ;;  %v4655_v33 = vld [vmem:[%s7037_s20 + $0x110] sm:$0x3] }
 0x332   : > { %v2755_v59 = vpop.permute.xlu0 %2754  ;;  %v2717_v11 = vsel %vm7066_vm0, %v4904_v41, %v2716_v56  ;;  %v2718_v21 = vrot.slane %v2716_v56, 4  ;;  %v2091_v44 = vsel %vm7017_vm10, %v2089_v14, %v2090_v46  ;;  %v4962_v61 = vrot.slane %v3185_v32, 10  ;;  %v5642_v56 = vld [vmem:[%s7037_s20 + $0x250] sm:$0xff]  }
 0x333   : > { %2777 = vst.msk [vmem:[#allocation4 + $0x18] sm:$0xff] %vm2147_vm4, %v2755_v59  ;;  %v2126_v19 = vpop.permute.xlu1 %2125  ;;  %v4750_v18 = vcombine.low %v2088_v37, %v2091_v44  ;;  %v5070_v59 = vld [vmem:[%s7037_s20 + $0x248] sm:$0xc]  ;;  %v3257_v20 = vrot.slane %v3255_v1, 4  ;;  %v3759_v48 = vsel %vm7047_vm14, %v3757_v13, %v3758_v25  ;;  %v4817_v37 = vld [vmem:[%s7037_s20 + $0x1fc] sm:$0x7] }
 0x334   : > { %2149 = vst.msk [vmem:[#allocation4 + $0x10] sm:$0xff] %vm2147_vm4, %v2126_v19  ;;  %2604 = vrot.lane.b32.xlu0 %v4872_v50, %s5961_s4  ;;  %v2720_v6 = vsel %vm7066_vm0, %v2718_v21, %v2719_v55  ;;  %v3256_v63 = vsel %vm7047_vm14, %v4962_v61, %v3255_v1  ;;  %v5084_v45 = vrot.slane %v5070_v59, 10  ;;  %v4598_v50 = vld [vmem:[%s7037_s20 + $0xa0] sm:$0x8]  ;;  %v2406_v32 = vrot.slane %v4817_v37, 7 }
 0x335   : > { %1974 = vrot.lane.b32.xlu1 %v4710_v4, %s5961_s4  ;;  %v4912_v26 = vcombine.low %v2717_v11, %v2720_v6  ;;  %v3259_v29 = vsel %vm7047_vm14, %v3257_v20, %v3258_v16  ;;  %v4618_v41 = vrot.slane %v4598_v50, 11  ;;  %v1590_v4 = vrot.slane %v4599_v12, 7  ;;  %v5644_v11 = vld [vmem:[%s7037_s20 + $0x154] sm:$0xff]   ;;  %v4654_v44 = vld [vmem:[%s7037_s20 + $0x10c] sm:$0xf] }
 0x336   : > { %v3639_v36 = vpop.permute.xlu0 %3638  ;;  %v3756_v57 = vsel %vm7047_vm14, %v5084_v45, %v3755_v24  ;;  %v4970_v43 = vcombine.low %v3256_v63, %v3259_v29  ;;  %v4816_v6 = vld [vmem:[%s7037_s20 + $0x1f8] sm:$0xf]  ;;  %v1769_v61 = vrot.slane %v4654_v44, 6  ;;  %v4856_v59 = vld [vmem:[%s7037_s20 + $0x1fc] sm:$0xf]  ;;  %v2566_v29 = vrot.slane %v4857_v17, 6 }
 0x337   : > { %3662 = vst.msk [vmem:[#allocation4 + $0x8] sm:$0xff] %vm1822_vm2, %v3639_v36  ;;  %v3299_v53 = vpop.permute.xlu1 %3298  ;;  %v4759_v36 = vld [vmem:[%s7037_s20 + $0x124] sm:$0xf]  ;;  %v5092_v2 = vcombine.low %v3756_v57, %v3759_v48  ;;  %v1591_v31 = vsel %vm7017_vm10, %v4618_v41, %v1590_v4  ;;  %v1592_v35 = vrot.slane %v1590_v4, 4  ;;  %v2563_v45 = vrot.slane %v4856_v59, 6 }
 0x338   : > { %3322 = vst.msk [vmem:[#allocation4] sm:$0xff] %vm1822_vm2, %v3299_v53  ;;  %2764 = vrot.lane.b32.xlu0 %v4912_v26, %s5962_s19  ;;  %v2220_v49 = vrot.slane %v4759_v36, 5  ;;  %v1771_v63 = vrot.slane %v1769_v61, 4  ;;  %v4693_v24 = vld [vmem:[%s7037_s20 + $0x10c] sm:$0xe] }
 0x339   : > { %2135 = vrot.lane.b32.xlu1 %v4750_v18, %s5962_s19  ;;  %v4694_v57 = vld [vmem:[%s7037_s20 + $0x110] sm:$0xf]  ;;  %v4695_v13 = vld [vmem:[%s7037_s20 + $0x114] sm:$0x1]  ;;  %v2565_v36 = vrot.slane %v2563_v45, 4 }
 0x33a   : > { %v3799_v15 = vpop.permute.xlu0 %3798  ;;  %v2787_v51 = vld [vmem:[#allocation4 + $0x18] sm:$0xff]  ;;  %v2221_v55 = vsel %vm7066_vm0, %v4778_v34, %v2220_v49  ;;  %v2222_v7 = vrot.slane %v2220_v49, 4  ;;  %v1933_v34 = vrot.slane %v4694_v57, 5  ;;  %v1936_v49 = vrot.slane %v4695_v13, 5  ;;  %v4761_v13 = vld [vmem:[%s7037_s20 + $0x134] sm:$0xe] }
 0x33b   : > { %3822 = vst.msk [vmem:[#allocation4 + $0x8] sm:$0xff] %vm1986_vm3, %v3799_v15  ;;  %v3387_v8 = vpop.permute.xlu1 %3386  ;;  %2968 = vmatprep.mubr.bf16.mxu0 %v2787_v51  ;;  %v2786_v27 = vld [vmem:[#allocation4 + $0x10] sm:$0xff]  ;;  %v2567_v50 = vsel %vm7047_vm14, %v2565_v36, %v2566_v29  ;;  %v4734_v4 = vld [vmem:[%s7037_s20 + $0x180] sm:$0xf] }
 0x33c   : > { %3410 = vst.msk [vmem:[#allocation4] sm:$0xff] %vm1986_vm3, %v3387_v8  ;;  %2969 = vmatmul.mubr.bf16.gmra.mrb[36].mxu0 %v2786_v27  ;;  %3648 = vrot.lane.b32.xlu0 %v5636_v47, %s5960_s3  ;;  %v2224_v21 = vsel %vm7066_vm0, %v2222_v7, %v2223_v0  ;;  %v4815_v8 = vld [vmem:[%s7037_s20 + $0x1f4] sm:$0x8]  ;;  %v1594_v27 = vsel %vm7017_vm10, %v1592_v35, %v1593_v9  ;;  %v2403_v47 = vrot.slane %v4816_v6, 7  ;;  %v4897_v0 = vld [vmem:[%s7037_s20 + $0x204] sm:$0x1] }
 0x33d   : > { %3571 = vst.msk [vmem:[#allocation4 + $0x18] sm:$0xff] %vm1214_vm1, %v5646_v38  ;;  %3163 = vst.msk [vmem:[#allocation4 + $0x10] sm:$0xff] %vm1214_vm1, %v5647_v60  ;;  %3308 = vrot.lane.b32.xlu1 %v4970_v43, %s5960_s3  ;;  %v4786_v46 = vcombine.low %v2221_v55, %v2224_v21  ;;  %v4825_v14 = vrot.slane %v4815_v8, 11  ;;  %v4626_v26 = vcombine.low %v1591_v31, %v1594_v27  ;;  %v4855_v60 = vld [vmem:[%s7037_s20 + $0x1f8] sm:$0xc]  ;;  %v2094_v21 = vrot.slane %v4734_v4, 7 }
 0x33e   : > { %v3887_v52 = vpop.permute.xlu0 %3886  ;;  %v2405_v16 = vrot.slane %v2403_v47, 4  ;;  %v4865_v20 = vrot.slane %v4855_v60, 10  ;;  %v4733_v7 = vld [vmem:[%s7037_s20 + $0x17c] sm:$0x8]  ;;  %v3189_v37 = vld [vmem:[%s7037_s20 + $0x80] sm:$0xf] }
 0x33f   : > { %3910 = vst.msk [vmem:[#allocation4 + $0x8] sm:$0xff] %vm2147_vm4, %v3887_v52  ;;  %v3475_v58 = vpop.permute.xlu1 %3474  ;;  %v4653_v52 = vld [vmem:[%s7037_s20 + $0x108] sm:$0xc]  ;;  %v2404_v1 = vsel %vm7017_vm10, %v4825_v14, %v2403_v47  ;;  %v3188_v6 = vld [vmem:[%s7037_s20 + $0x7c] sm:$0xc]  ;;  %v2096_v47 = vrot.slane %v2094_v21, 4 }
 0x340   : > { %3498 = vst.msk [vmem:[#allocation4] sm:$0xff] %vm2147_vm4, %v3475_v58  ;;  %3808 = vrot.lane.b32.xlu0 %v5092_v2, %s5961_s4  ;;  %v4663_v10 = vrot.slane %v4653_v52, 10  ;;  %v1772_v58 = vrot.slane %v4655_v33, 6  ;;  %v2407_v25 = vsel %vm7017_vm10, %v2405_v16, %v2406_v32  ;;  %v2564_v42 = vsel %vm7047_vm14, %v4865_v20, %v2563_v45  ;;  %v4896_v2 = vld [vmem:[%s7037_s20 + $0x200] sm:$0xf]  ;;  %v5655_v16 = vld [vmem:[%s7037_s20 + $0x28] sm:$0xff]  }
 0x341   : > { %3396 = vrot.lane.b32.xlu1 %v5640_v28, %s5961_s4  ;;  %2294 = vst.msk [vmem:[#allocation4 + $0x28] sm:$0xff] %vm1214_vm1, %v4786_v46  ;;  %1664 = vst.msk [vmem:[#allocation4 + $0x20] sm:$0xff] %vm1214_vm1, %v4626_v26  ;;  %v4833_v43 = vcombine.low %v2404_v1, %v2407_v25  ;;  %v4873_v62 = vcombine.low %v2564_v42, %v2567_v50  ;;  %v2723_v9 = vrot.slane %v4896_v2, 5  ;;  %v3190_v52 = vld [vmem:[%s7037_s20 + $0x84] sm:$0x3]  ;;  %v4963_v44 = vrot.slane %v3188_v6, 10 }
 0x342   : > { %v2437_v19 = vpop.permute.xlu0 %2436  ;;  %v1770_v54 = vsel %vm7047_vm14, %v4663_v10, %v1769_v61  ;;  %v1773_v28 = vsel %vm7047_vm14, %v1771_v63, %v1772_v58  ;;  %v3262_v33 = vrot.slane %v3189_v37, 6  ;;  %v3265_v61 = vrot.slane %v3190_v52, 6  ;;  %v5073_v60 = vld [vmem:[%s7037_s20 + $0x25c] sm:$0xc]  ;;  %v5075_v63 = vld [vmem:[%s7037_s20 + $0x264] sm:$0x3] }
 0x343   : > { %v7943_v39 = vpop.permute.xlu1 %1802  ;;  %2458 = vst.msk [vmem:[#allocation4 + $0x28] sm:$0xff] %vm1822_vm2, %v2437_v19  ;;  %v4671_v40 = vcombine.low %v1770_v54, %v1773_v28  ;;  %v2725_v27 = vrot.slane %v2723_v9, 4  ;;  %v5648_v45 = vld [vmem:[%s7037_s20 + $0x258] sm:$0xff]   ;;  %v3765_v25 = vrot.slane %v5075_v63, 6  ;;  %v5651_v52 = vld [vmem:[%s7037_s20 + $0x168] sm:$0xff]  }
 0x344   : > { %3896 = vrot.lane.b32.xlu0 %v5642_v56, %s5962_s19  ;;  %1825 = vst.msk [vmem:[#allocation4 + $0x20] sm:$0xff] %vm1822_vm2, %v7943_v39  ;;  %v4703_v39 = vrot.slane %v4693_v24, 9  ;;  %v1935_v56 = vrot.slane %v1933_v34, 4  ;;  %v3263_v17 = vsel %vm7047_vm14, %v4963_v44, %v3262_v33  ;;  %v3264_v54 = vrot.slane %v3262_v33, 4  ;;  %v4603_v2 = vld [vmem:[%s7037_s20 + $0xbc] sm:$0x7] }
 0x345   : > { %3484 = vrot.lane.b32.xlu1 %v5644_v11, %s5962_s19  ;;  %v4743_v11 = vrot.slane %v4733_v7, 11  ;;  %v5085_v24 = vrot.slane %v5073_v60, 10  ;;  %v5078_v33 = vld [vmem:[%s7037_s20 + $0x278] sm:$0x3] }
 0x346   : > { %v2597_v53 = vpop.permute.xlu0 %2596  ;;  %v3919_v15 = vld [vmem:[#allocation4 + $0x8] sm:$0xff]  ;;  %v1934_v41 = vsel %vm7066_vm0, %v4703_v39, %v1933_v34  ;;  %v1937_v35 = vsel %vm7066_vm0, %v1935_v56, %v1936_v49  ;;  %v3266_v57 = vsel %vm7047_vm14, %v3264_v54, %v3265_v61  ;;  %v4762_v39 = vld [vmem:[%s7037_s20 + $0x138] sm:$0xf] }
 0x347   : > { %v1967_v3 = vpop.permute.xlu1 %1966  ;;  %4094 = vmatprep.mubr.bf16.mxu1 %v3919_v15  ;;  %v3918_v30 = vld [vmem:[#allocation4] sm:$0xff]  ;;  %2618 = vst.msk [vmem:[#allocation4 + $0x28] sm:$0xff] %vm1986_vm3, %v2597_v53  ;;  %v4895_v53 = vld [vmem:[%s7037_s20 + $0x1fc] sm:$0xe]  ;;  %v4711_v46 = vcombine.low %v1934_v41, %v1937_v35  ;;  %v2095_v26 = vsel %vm7017_vm10, %v4743_v11, %v2094_v21  ;;  %v4971_v28 = vcombine.low %v3263_v17, %v3266_v57  ;;  %v4602_v34 = vld [vmem:[%s7037_s20 + $0xb8] sm:$0xf] }
 0x348   : > { %4095 = vmatmul.mubr.bf16.vlgmr.msra.gmra.mrb[32].mxu1 %v3918_v30  ;;  %1989 = vst.msk [vmem:[#allocation4 + $0x20] sm:$0xff] %vm1986_vm3, %v1967_v3  ;;  %2446 = vrot.lane.b32.xlu0 %v4833_v43, %s5960_s3  ;;  %v4905_v55 = vrot.slane %v4895_v53, 9  ;;  %v2726_v3 = vrot.slane %v4897_v0, 5  ;;  %v4735_v15 = vld [vmem:[%s7037_s20 + $0x184] sm:$0x7]  ;;  %v2227_v50 = vrot.slane %v4762_v39, 5 }
 0x349   : > { %1812 = vrot.lane.b32.xlu1 %v4671_v40, %s5960_s3  ;;  %v2097_v30 = vrot.slane %v4735_v15, 7  ;;  %v4763_v43 = vld [vmem:[%s7037_s20 + $0x13c] sm:$0x1]  ;;  %v4601_v40 = vld [vmem:[%s7037_s20 + $0xb4] sm:$0x8]  ;;  %v1600_v41 = vrot.slane %v4603_v2, 7 }
 0x34a   : > { %v2757_v51 = vpop.permute.xlu0 %2756  ;;  %v2724_v8 = vsel %vm7066_vm0, %v4905_v55, %v2723_v9  ;;  %v2727_v10 = vsel %vm7066_vm0, %v2725_v27, %v2726_v3  ;;  %v2230_v53 = vrot.slane %v4763_v43, 5  ;;  %v4619_v0 = vrot.slane %v4601_v40, 11  ;;  %v5649_v15 = vld [vmem:[%s7037_s20 + $0x84] sm:$0xff]  }
 0x34b   : > { %v2128_v38 = vpop.permute.xlu1 %2127  ;;  %2778 = vst.msk [vmem:[#allocation4 + $0x28] sm:$0xff] %vm2147_vm4, %v2757_v51  ;;  %v4913_v58 = vcombine.low %v2724_v8, %v2727_v10  ;;  %v2098_v59 = vsel %vm7017_vm10, %v2096_v47, %v2097_v30  ;;  %v2229_v9 = vrot.slane %v2227_v50, 4  ;;  %v5650_v30 = vld [vmem:[%s7037_s20 + $0x264] sm:$0xff]   ;;  %v3193_v8 = vld [vmem:[%s7037_s20 + $0x98] sm:$0x3] }
 0x34c   : > { %2150 = vst.msk [vmem:[#allocation4 + $0x20] sm:$0xff] %vm2147_vm4, %v2128_v38  ;;  %2606 = vrot.lane.b32.xlu0 %v4873_v62, %s5961_s4  ;;  %v5654_v38 = vld [vmem:[%s7037_s20 + $0x124] sm:$0xff]   ;;  %v4751_v20 = vcombine.low %v2095_v26, %v2098_v59  ;;  %v5076_v26 = vld [vmem:[%s7037_s20 + $0x270] sm:$0xc]  ;;  %v5077_v47 = vld [vmem:[%s7037_s20 + $0x274] sm:$0xf] }
 0x34d   : > { %1976 = vrot.lane.b32.xlu1 %v4711_v46, %s5961_s4  ;;  %v2231_v35 = vsel %vm7066_vm0, %v2229_v9, %v2230_v53  ;;  %v3192_v46 = vld [vmem:[%s7037_s20 + $0x94] sm:$0xf]  ;;  %v3272_v44 = vrot.slane %v3193_v8, 6  ;;  %v5086_v10 = vrot.slane %v5076_v26, 10  ;;  %v3769_v61 = vrot.slane %v5077_v47, 6  ;;  %v5657_v9 = vld [vmem:[%s7037_s20 + $0x17c] sm:$0xff]  }
 0x34e   : > { %v3641_v18 = vpop.permute.xlu0 %3640  ;;  %v4604_v39 = vld [vmem:[%s7037_s20 + $0xc8] sm:$0x8]  ;;  %v4607_v8 = vld [vmem:[%s7037_s20 + $0xdc] sm:$0x8]  ;;  %v4609_v26 = vld [vmem:[%s7037_s20 + $0xe4] sm:$0x7] }
 0x34f   : > { %3663 = vst.msk [vmem:[#allocation4 + $0x18] sm:$0xff] %vm1822_vm2, %v3641_v18  ;;  %v3301_v19 = vpop.permute.xlu1 %3300  ;;  %v5074_v18 = vld [vmem:[%s7037_s20 + $0x260] sm:$0xf]  ;;  %v3771_v17 = vrot.slane %v3769_v61, 4  ;;  %v3770_v63 = vsel %vm7047_vm14, %v5086_v10, %v3769_v61  ;;  %v4620_v40 = vrot.slane %v4604_v39, 11  ;;  %v4621_v47 = vrot.slane %v4607_v8, 11 }
 0x350   : > { %3323 = vst.msk [vmem:[#allocation4 + $0x10] sm:$0xff] %vm1822_vm2, %v3301_v19  ;;  %v3762_v19 = vrot.slane %v5074_v18, 6  ;;  %2766 = vrot.lane.b32.xlu0 %v4913_v58, %s5962_s19  ;;  %v3772_v18 = vrot.slane %v5078_v33, 6  ;;  %v5652_v58 = vld [vmem:[%s7037_s20 + $0x26c] sm:$0xff]   ;;  %v4771_v61 = vld [vmem:[%s7037_s20 + $0x174] sm:$0xf] }
 0x351   : > { %2137 = vrot.lane.b32.xlu1 %v4751_v20, %s5962_s19  ;;  %v4770_v10 = vld [vmem:[%s7037_s20 + $0x170] sm:$0xe] }
 0x352   : > { %v3801_v48 = vpop.permute.xlu0 %3800  ;;  %v2789_v51 = vld [vmem:[#allocation4 + $0x28] sm:$0xff]  ;;  %v3763_v42 = vsel %vm7047_vm14, %v5085_v24, %v3762_v19  ;;  %v3764_v36 = vrot.slane %v3762_v19, 4  ;;  %v3773_v20 = vsel %vm7047_vm14, %v3771_v17, %v3772_v18  ;;  %v4610_v17 = vld [vmem:[%s7037_s20 + $0xf0] sm:$0x8] }
 0x353   : > { %3823 = vst.msk [vmem:[#allocation4 + $0x18] sm:$0xff] %vm1986_vm3, %v3801_v48  ;;  %v3389_v12 = vpop.permute.xlu1 %3388  ;;  %2976 = vmatprep.mubr.bf16.mxu0 %v2789_v51  ;;  %v2788_v32 = vld [vmem:[#allocation4 + $0x20] sm:$0xff]  ;;  %v4779_v48 = vrot.slane %v4761_v13, 9  ;;  %v3191_v51 = vld [vmem:[%s7037_s20 + $0x90] sm:$0xc]  ;;  %v5094_v43 = vcombine.low %v3770_v63, %v3773_v20  ;;  %v2248_v63 = vrot.slane %v4771_v61, 5 }
 0x354   : > { %3411 = vst.msk [vmem:[#allocation4 + $0x10] sm:$0xff] %vm1986_vm3, %v3389_v12  ;;  %2977 = vmatmul.mubr.bf16.gmra.mrb[40].mxu0 %v2788_v32  ;;  %v1597_v12 = vrot.slane %v4602_v34, 7  ;;  %v3766_v62 = vsel %vm7047_vm14, %v3764_v36, %v3765_v25  ;;  %3650 = vrot.lane.b32.xlu0 %v5648_v45, %s5960_s3  ;;  %v4964_v37 = vrot.slane %v3191_v51, 10  ;;  %v4764_v19 = vld [vmem:[%s7037_s20 + $0x148] sm:$0xe]  ;;  %v5658_v34 = vld [vmem:[%s7037_s20 + $0x138] sm:$0xff]  }
 0x355   : > { %3572 = vst.msk [vmem:[#allocation4 + $0x28] sm:$0xff] %vm1214_vm1, %v5654_v38  ;;  %3164 = vst.msk [vmem:[#allocation4 + $0x20] sm:$0xff] %vm1214_vm1, %v5655_v16  ;;  %v5093_v7 = vcombine.low %v3763_v42, %v3766_v62  ;;  %v2228_v4 = vsel %vm7066_vm0, %v4779_v48, %v2227_v50  ;;  %3310 = vrot.lane.b32.xlu1 %v4971_v28, %s5960_s3  ;;  %v4765_v25 = vld [vmem:[%s7037_s20 + $0x14c] sm:$0xf]  ;;  %v4780_v57 = vrot.slane %v4764_v19, 9  ;;  %v5653_v28 = vld [vmem:[%s7037_s20 + $0x98] sm:$0xff]  }
 0x356   : > { %v3889_v31 = vpop.permute.xlu0 %3888  ;;  %v1598_v11 = vsel %vm7017_vm10, %v4619_v0, %v1597_v12  ;;  %v1599_v21 = vrot.slane %v1597_v12, 4  ;;  %v4787_v27 = vcombine.low %v2228_v4, %v2231_v35  ;;  %v2234_v22 = vrot.slane %v4765_v25, 5  ;;  %v4605_v36 = vld [vmem:[%s7037_s20 + $0xcc] sm:$0xf]  ;;  %v4606_v48 = vld [vmem:[%s7037_s20 + $0xd0] sm:$0x7] }
 0x357   : > { %3911 = vst.msk [vmem:[#allocation4 + $0x18] sm:$0xff] %vm2147_vm4, %v3889_v31  ;;  %v3477_v14 = vpop.permute.xlu1 %3476  ;;  %v1604_v53 = vrot.slane %v4605_v36, 7  ;;  %v1607_v2 = vrot.slane %v4606_v48, 7  ;;  %v5659_v0 = vld [vmem:[%s7037_s20 + $0x3c] sm:$0xff]   ;;  %v4612_v25 = vld [vmem:[%s7037_s20 + $0xf8] sm:$0x7] }
 0x358   : > { %3499 = vst.msk [vmem:[#allocation4 + $0x10] sm:$0xff] %vm2147_vm4, %v3477_v14  ;;  %v1601_v6 = vsel %vm7017_vm10, %v1599_v21, %v1600_v41  ;;  %v3269_v14 = vrot.slane %v3192_v46, 6  ;;  %3810 = vrot.lane.b32.xlu0 %v5093_v7, %s5961_s4  ;;  %v2236_v50 = vrot.slane %v2234_v22, 4  ;;  %v5656_v62 = vld [vmem:[%s7037_s20 + $0x278] sm:$0xff]   ;;  %v4768_v4 = vld [vmem:[%s7037_s20 + $0x160] sm:$0xf] }
 0x359   : > { %v4627_v32 = vcombine.low %v1598_v11, %v1601_v6  ;;  %3398 = vrot.lane.b32.xlu1 %v5649_v15, %s5961_s4  ;;  %2295 = vst.msk [vmem:[#allocation4 + $0x38] sm:$0xff] %vm1214_vm1, %v4787_v27  ;;  %v4767_v7 = vld [vmem:[%s7037_s20 + $0x15c] sm:$0xe]  ;;  %v4769_v21 = vld [vmem:[%s7037_s20 + $0x164] sm:$0x1]  ;;  %v2241_v35 = vrot.slane %v4768_v4, 5 }
 0x35a   : > { %v8034_v1 = vpop.permute.xlu0 %2438  ;;  %v3271_v60 = vrot.slane %v3269_v14, 4  ;;  %v3270_v59 = vsel %vm7047_vm14, %v4964_v37, %v3269_v14  ;;  %v2244_v46 = vrot.slane %v4769_v21, 5  ;;  %v4608_v27 = vld [vmem:[%s7037_s20 + $0xe0] sm:$0xf]  ;;  %v4615_v4 = vld [vmem:[%s7037_s20 + $0x10c] sm:$0x7] }
 0x35b   : > { %v8044_v29 = vpop.permute.xlu1 %1804  ;;  %2459 = vst.msk [vmem:[#allocation4 + $0x38] sm:$0xff] %vm1822_vm2, %v8034_v1  ;;  %v1628_v21 = vrot.slane %v4615_v4, 7 }
 0x35c   : > { %1665 = vst.msk [vmem:[#allocation4 + $0x30] sm:$0xff] %vm1214_vm1, %v4627_v32  ;;  %v3273_v1 = vsel %vm7047_vm14, %v3271_v60, %v3272_v44  ;;  %3898 = vrot.lane.b32.xlu0 %v5650_v30, %s5962_s19  ;;  %v1611_v32 = vrot.slane %v4608_v27, 7 }
 0x35d   : > { %1826 = vst.msk [vmem:[#allocation4 + $0x30] sm:$0xff] %vm1822_vm2, %v8044_v29  ;;  %3486 = vrot.lane.b32.xlu1 %v5651_v52, %s5962_s19  ;;  %v4972_v45 = vcombine.low %v3270_v59, %v3273_v1  ;;  %v4766_v29 = vld [vmem:[%s7037_s20 + $0x150] sm:$0x1]  ;;  %v1614_v52 = vrot.slane %v4609_v26, 7  ;;  %v4782_v59 = vrot.slane %v4770_v10, 9 }
 0x35e   : > { %v2599_v49 = vpop.permute.xlu0 %2598  ;;  %v3921_v55 = vld [vmem:[#allocation4 + $0x18] sm:$0xff]  ;;  %v2237_v13 = vrot.slane %v4766_v29, 5  ;;  %v1612_v18 = vsel %vm7017_vm10, %v4621_v47, %v1611_v32 }
 0x35f   : > { %v1969_v56 = vpop.permute.xlu1 %1968  ;;  %4102 = vmatprep.mubr.bf16.mxu1 %v3921_v55  ;;  %v3920_v3 = vld [vmem:[#allocation4 + $0x10] sm:$0xff]  ;;  %2619 = vst.msk [vmem:[#allocation4 + $0x38] sm:$0xff] %vm1986_vm3, %v2599_v49  ;;  %v2235_v49 = vsel %vm7066_vm0, %v4780_v57, %v2234_v22  ;;  %v1606_v55 = vrot.slane %v1604_v53, 4  ;;  %v2249_v39 = vsel %vm7066_vm0, %v4782_v59, %v2248_v63  ;;  %v5662_v59 = vld [vmem:[%s7037_s20 + $0x160] sm:$0xff]  }
 0x360   : > { %4103 = vmatmul.mubr.bf16.gmra.mrb[36].mxu1 %v3920_v3  ;;  %1990 = vst.msk [vmem:[#allocation4 + $0x30] sm:$0xff] %vm1986_vm3, %v1969_v56  ;;  %3652 = vrot.lane.b32.xlu0 %v5652_v58, %s5960_s3  ;;  %v2238_v41 = vsel %vm7066_vm0, %v2236_v50, %v2237_v13  ;;  %v1605_v56 = vsel %vm7017_vm10, %v4620_v40, %v1604_v53  ;;  %v4772_v58 = vld [vmem:[%s7037_s20 + $0x178] sm:$0x1]  ;;  %v4775_v50 = vld [vmem:[%s7037_s20 + $0x18c] sm:$0x1] }
 0x361   : > { %3312 = vrot.lane.b32.xlu1 %v4972_v45, %s5960_s3  ;;  %v4788_v11 = vcombine.low %v2235_v49, %v2238_v41  ;;  %v1608_v51 = vsel %vm7017_vm10, %v1606_v55, %v1607_v2  ;;  %v2251_v20 = vrot.slane %v4772_v58, 5  ;;  %v4611_v45 = vld [vmem:[%s7037_s20 + $0xf4] sm:$0xf]  ;;  %v4774_v49 = vld [vmem:[%s7037_s20 + $0x188] sm:$0xf] }
 0x362   : > { %v2759_v31 = vpop.permute.xlu0 %2758  ;;  %v4628_v37 = vcombine.low %v1605_v56, %v1608_v51  ;;  %v1618_v29 = vrot.slane %v4611_v45, 7  ;;  %v4614_v41 = vld [vmem:[%s7037_s20 + $0x108] sm:$0xf] }
 0x363   : > { %v2130_v38 = vpop.permute.xlu1 %2129  ;;  %2779 = vst.msk [vmem:[#allocation4 + $0x38] sm:$0xff] %vm2147_vm4, %v2759_v31  ;;  %v4781_v31 = vrot.slane %v4767_v7, 9  ;;  %v2258_v7 = vrot.slane %v4775_v50, 5 }
 0x364   : > { %2151 = vst.msk [vmem:[#allocation4 + $0x30] sm:$0xff] %vm2147_vm4, %v2130_v38  ;;  %3812 = vrot.lane.b32.xlu0 %v5094_v43, %s5961_s4  ;;  %v2243_v38 = vrot.slane %v2241_v35, 4  ;;  %v2250_v43 = vrot.slane %v2248_v63, 4  ;;  %v1620_v36 = vrot.slane %v1618_v29, 4 }
 0x365   : > { %3400 = vrot.lane.b32.xlu1 %v5653_v28, %s5961_s4  ;;  %2296 = vst.msk [vmem:[#allocation4 + $0x48] sm:$0xff] %vm1214_vm1, %v4788_v11  ;;  %v2242_v14 = vsel %vm7066_vm0, %v4781_v31, %v2241_v35  ;;  %1666 = vst.msk [vmem:[#allocation4 + $0x40] sm:$0xff] %vm1214_vm1, %v4628_v37  ;;  %v1621_v28 = vrot.slane %v4612_v25, 7  ;;  %v5660_v35 = vld [vmem:[%s7037_s20 + $0x14c] sm:$0xff]  }
 0x366   : > { %v3643_v16 = vpop.permute.xlu0 %3642  ;;  %v2245_v33 = vsel %vm7066_vm0, %v2243_v38, %v2244_v46  ;;  %v2252_v40 = vsel %vm7066_vm0, %v2250_v43, %v2251_v20  ;;  %v5661_v37 = vld [vmem:[%s7037_s20 + $0x50] sm:$0xff]  }
 0x367   : > { %3664 = vst.msk [vmem:[#allocation4 + $0x28] sm:$0xff] %vm1822_vm2, %v3643_v16  ;;  %v3303_v54 = vpop.permute.xlu1 %3302  ;;  %v4789_v60 = vcombine.low %v2242_v14, %v2245_v33  ;;  %v1613_v16 = vrot.slane %v1611_v32, 4  ;;  %v4790_v53 = vcombine.low %v2249_v39, %v2252_v40  ;;  %v1622_v2 = vsel %vm7017_vm10, %v1620_v36, %v1621_v28  ;;  %v8224_v36 = vld [vmem:[#allocation11 + $0x1] ss:$0 sm:$0xff] }
 0x368   : > { %3324 = vst.msk [vmem:[#allocation4 + $0x20] sm:$0xff] %vm1822_vm2, %v3303_v54  ;;  %3900 = vrot.lane.b32.xlu0 %v5656_v62, %s5962_s19  ;;  %v4613_v62 = vld [vmem:[%s7037_s20 + $0x104] sm:$0x8] }
 0x369   : > { %3488 = vrot.lane.b32.xlu1 %v5657_v9, %s5962_s19  ;;  %2297 = vst.msk [vmem:[#allocation4 + $0x58] sm:$0xff] %vm1214_vm1, %v4789_v60  ;;  %v1615_v19 = vsel %vm7017_vm10, %v1613_v16, %v1614_v52  ;;  %v4623_v9 = vrot.slane %v4613_v62, 11  ;;  %2298 = vst.msk [vmem:[#allocation4 + $0x68] sm:$0xff] %vm1214_vm1, %v4790_v53 }
 0x36a   : > { %v3803_v24 = vpop.permute.xlu0 %3802  ;;  %v2791_v3 = vld [vmem:[#allocation4 + $0x38] sm:$0xff]  ;;  %v4629_v13 = vcombine.low %v1612_v18, %v1615_v19 }
 0x36b   : > { %3824 = vst.msk [vmem:[#allocation4 + $0x28] sm:$0xff] %vm1986_vm3, %v3803_v24  ;;  %v3391_v42 = vpop.permute.xlu1 %3390  ;;  %2984 = vmatprep.mubr.bf16.mxu0 %v2791_v3  ;;  %v2790_v30 = vld [vmem:[#allocation4 + $0x30] sm:$0xff]  ;;  %v4622_v24 = vrot.slane %v4610_v17, 11  ;;  %v1625_v3 = vrot.slane %v4614_v41, 7 }
 0x36c   : > { %3412 = vst.msk [vmem:[#allocation4 + $0x20] sm:$0xff] %vm1986_vm3, %v3391_v42  ;;  %2985 = vmatmul.mubr.bf16.gmra.mrb[44].mxu0 %v2790_v30 }
 0x36d   : > { %3573 = vst.msk [vmem:[#allocation4 + $0x38] sm:$0xff] %vm1214_vm1, %v5658_v34  ;;  %3165 = vst.msk [vmem:[#allocation4 + $0x30] sm:$0xff] %vm1214_vm1, %v5659_v0  ;;  %v1619_v42 = vsel %vm7017_vm10, %v4622_v24, %v1618_v29  ;;  %v4773_v34 = vld [vmem:[%s7037_s20 + $0x184] sm:$0xe]  ;;  %v1626_v30 = vsel %vm7017_vm10, %v4623_v9, %v1625_v3  ;;  %v1627_v51 = vrot.slane %v1625_v3, 4 }
 0x36e   : > { %v3891_v12 = vpop.permute.xlu0 %3890  ;;  %1667 = vst.msk [vmem:[#allocation4 + $0x50] sm:$0xff] %vm1214_vm1, %v4629_v13  ;;  %v4783_v0 = vrot.slane %v4773_v34, 9  ;;  %v4630_v55 = vcombine.low %v1619_v42, %v1622_v2 }
 0x36f   : > { %3912 = vst.msk [vmem:[#allocation4 + $0x28] sm:$0xff] %vm2147_vm4, %v3891_v12  ;;  %v3479_v15 = vpop.permute.xlu1 %3478  ;;  %v2255_v12 = vrot.slane %v4774_v49, 5  ;;  %v5665_v49 = vld [vmem:[%s7037_s20 + $0x78] sm:$0xff]  }
 0x370   : > { %3500 = vst.msk [vmem:[#allocation4 + $0x20] sm:$0xff] %vm2147_vm4, %v3479_v15 }
 0x371   : > { %v2256_v15 = vsel %vm7066_vm0, %v4783_v0, %v2255_v12  ;;  %v2257_v11 = vrot.slane %v2255_v12, 4  ;;  %1668 = vst.msk [vmem:[#allocation4 + $0x60] sm:$0xff] %vm1214_vm1, %v4630_v55 }
 0x372   : > { %v2441_v6 = vpop.permute.xlu0 %2440 }
 0x373   : > { %2460 = vst.msk [vmem:[#allocation4 + $0x48] sm:$0xff] %vm1822_vm2, %v2441_v6  ;;  %v1807_v44 = vpop.permute.xlu1 %1806  ;;  %v2259_v46 = vsel %vm7066_vm0, %v2257_v11, %v2258_v7  ;;  %v1629_v6 = vsel %vm7017_vm10, %v1627_v51, %v1628_v21 }
 0x374   : > { %1827 = vst.msk [vmem:[#allocation4 + $0x40] sm:$0xff] %vm1822_vm2, %v1807_v44  ;;  %v4791_v27 = vcombine.low %v2256_v15, %v2259_v46  ;;  %v4631_v14 = vcombine.low %v1626_v30, %v1629_v6 }
 0x376   : > { %v2601_v1 = vpop.permute.xlu0 %2600  ;;  %v3923_v54 = vld [vmem:[#allocation4 + $0x28] sm:$0xff]  ;;  %2299 = vst.msk [vmem:[#allocation4 + $0x78] sm:$0xff] %vm1214_vm1, %v4791_v27  ;;  %1669 = vst.msk [vmem:[#allocation4 + $0x70] sm:$0xff] %vm1214_vm1, %v4631_v14 }
 0x377   : > { %2620 = vst.msk [vmem:[#allocation4 + $0x48] sm:$0xff] %vm1986_vm3, %v2601_v1  ;;  %4110 = vmatprep.mubr.bf16.mxu1 %v3923_v54  ;;  %v1971_v57 = vpop.permute.xlu1 %1970  ;;  %v3922_v22 = vld [vmem:[#allocation4 + $0x20] sm:$0xff] }
 0x378   : > { %1991 = vst.msk [vmem:[#allocation4 + $0x40] sm:$0xff] %vm1986_vm3, %v1971_v57  ;;  %4111 = vmatmul.mubr.bf16.gmra.mrb[40].mxu1 %v3922_v22  ;;  %v5663_v1 = vld [vmem:[%s7037_s20 + $0x64] sm:$0xff]  }
 0x37a   : > { %v2761_v48 = vpop.permute.xlu0 %2760 }
 0x37b   : > { %2780 = vst.msk [vmem:[#allocation4 + $0x48] sm:$0xff] %vm2147_vm4, %v2761_v48  ;;  %v2132_v56 = vpop.permute.xlu1 %2131  ;;  %v5664_v48 = vld [vmem:[%s7037_s20 + $0x174] sm:$0xff]  }
 0x37c   : > { %2152 = vst.msk [vmem:[#allocation4 + $0x40] sm:$0xff] %vm2147_vm4, %v2132_v56 }
 0x37e   : > { %v3645_v31 = vpop.permute.xlu0 %3644 }
 0x37f   : > { %3665 = vst.msk [vmem:[#allocation4 + $0x38] sm:$0xff] %vm1822_vm2, %v3645_v31  ;;  %v3305_v8 = vpop.permute.xlu1 %3304 }
 0x380   : > { %3325 = vst.msk [vmem:[#allocation4 + $0x30] sm:$0xff] %vm1822_vm2, %v3305_v8 }
 0x382   : > { %v3805_v38 = vpop.permute.xlu0 %3804  ;;  %v2793_v26 = vld [vmem:[#allocation4 + $0x48] sm:$0xff] }
 0x383   : > { %3825 = vst.msk [vmem:[#allocation4 + $0x38] sm:$0xff] %vm1986_vm3, %v3805_v38  ;;  %2992 = vmatprep.mubr.bf16.mxu0 %v2793_v26  ;;  %v3393_v23 = vpop.permute.xlu1 %3392  ;;  %v2792_v47 = vld [vmem:[#allocation4 + $0x40] sm:$0xff] }
 0x384   : > { %3574 = vst.msk [vmem:[#allocation4 + $0x48] sm:$0xff] %vm1214_vm1, %v5660_v35  ;;  %2993 = vmatmul.mubr.bf16.gmra.mrb[48].mxu0 %v2792_v47  ;;  %3166 = vst.msk [vmem:[#allocation4 + $0x40] sm:$0xff] %vm1214_vm1, %v5661_v37  ;;  %v8253_v37 = vld [vmem:[#allocation11 + $0x4] ss:$0 sm:$0xff] }
 0x385   : > { %3413 = vst.msk [vmem:[#allocation4 + $0x30] sm:$0xff] %vm1986_vm3, %v3393_v23 }
 0x386   : > { %v3893_v5 = vpop.permute.xlu0 %3892 }
 0x387   : > { %3913 = vst.msk [vmem:[#allocation4 + $0x38] sm:$0xff] %vm2147_vm4, %v3893_v5  ;;  %v3481_v32 = vpop.permute.xlu1 %3480 }
 0x388   : > { %3501 = vst.msk [vmem:[#allocation4 + $0x30] sm:$0xff] %vm2147_vm4, %v3481_v32 }
 0x38a   : > { %v2443_v52 = vpop.permute.xlu0 %2442 }
 0x38b   : > { %2461 = vst.msk [vmem:[#allocation4 + $0x58] sm:$0xff] %vm1822_vm2, %v2443_v52  ;;  %v1809_v44 = vpop.permute.xlu1 %1808 }
 0x38c   : > { %1828 = vst.msk [vmem:[#allocation4 + $0x50] sm:$0xff] %vm1822_vm2, %v1809_v44 }
 0x38e   : > { %v2603_v33 = vpop.permute.xlu0 %2602  ;;  %v3925_v10 = vld [vmem:[#allocation4 + $0x38] sm:$0xff] }
 0x38f   : > { %2621 = vst.msk [vmem:[#allocation4 + $0x58] sm:$0xff] %vm1986_vm3, %v2603_v33  ;;  %4118 = vmatprep.mubr.bf16.mxu1 %v3925_v10  ;;  %v1973_v61 = vpop.permute.xlu1 %1972  ;;  %v3924_v60 = vld [vmem:[#allocation4 + $0x30] sm:$0xff] }
 0x390   : > { %1992 = vst.msk [vmem:[#allocation4 + $0x50] sm:$0xff] %vm1986_vm3, %v1973_v61  ;;  %4119 = vmatmul.mubr.bf16.gmra.mrb[44].mxu1 %v3924_v60 }
 0x392   : > { %v2763_v18 = vpop.permute.xlu0 %2762 }
 0x393   : > { %2781 = vst.msk [vmem:[#allocation4 + $0x58] sm:$0xff] %vm2147_vm4, %v2763_v18  ;;  %v2134_v16 = vpop.permute.xlu1 %2133 }
 0x394   : > { %2153 = vst.msk [vmem:[#allocation4 + $0x50] sm:$0xff] %vm2147_vm4, %v2134_v16 }
 0x396   : > { %v3647_v58 = vpop.permute.xlu0 %3646 }
 0x397   : > { %3666 = vst.msk [vmem:[#allocation4 + $0x48] sm:$0xff] %vm1822_vm2, %v3647_v58  ;;  %v3307_v17 = vpop.permute.xlu1 %3306 }
 0x398   : > { %3326 = vst.msk [vmem:[#allocation4 + $0x40] sm:$0xff] %vm1822_vm2, %v3307_v17 }
 0x39a   : > { %v3807_v54 = vpop.permute.xlu0 %3806  ;;  %v2795_v63 = vld [vmem:[#allocation4 + $0x58] sm:$0xff] }
 0x39b   : > { %3826 = vst.msk [vmem:[#allocation4 + $0x48] sm:$0xff] %vm1986_vm3, %v3807_v54  ;;  %3000 = vmatprep.mubr.bf16.mxu0 %v2795_v63  ;;  %v3395_v20 = vpop.permute.xlu1 %3394  ;;  %v2794_v45 = vld [vmem:[#allocation4 + $0x50] sm:$0xff] }
 0x39c   : > { %3575 = vst.msk [vmem:[#allocation4 + $0x58] sm:$0xff] %vm1214_vm1, %v5662_v59  ;;  %3001 = vmatmul.mubr.bf16.gmra.mrb[52].mxu0 %v2794_v45  ;;  %3167 = vst.msk [vmem:[#allocation4 + $0x50] sm:$0xff] %vm1214_vm1, %v5663_v1 }
 0x39d   : > { %3414 = vst.msk [vmem:[#allocation4 + $0x40] sm:$0xff] %vm1986_vm3, %v3395_v20 }
 0x39e   : > { %v3895_v24 = vpop.permute.xlu0 %3894 }
 0x39f   : > { %3914 = vst.msk [vmem:[#allocation4 + $0x48] sm:$0xff] %vm2147_vm4, %v3895_v24  ;;  %v3483_v19 = vpop.permute.xlu1 %3482 }
 0x3a0   : > { %3502 = vst.msk [vmem:[#allocation4 + $0x40] sm:$0xff] %vm2147_vm4, %v3483_v19 }
 0x3a2   : > { %v2445_v25 = vpop.permute.xlu0 %2444 }
 0x3a3   : > { %2462 = vst.msk [vmem:[#allocation4 + $0x68] sm:$0xff] %vm1822_vm2, %v2445_v25  ;;  %v1811_v22 = vpop.permute.xlu1 %1810 }
 0x3a4   : > { %1829 = vst.msk [vmem:[#allocation4 + $0x60] sm:$0xff] %vm1822_vm2, %v1811_v22 }
 0x3a6   : > { %v3927_v29 = vld [vmem:[#allocation4 + $0x48] sm:$0xff]  ;;  %v2605_v13 = vpop.permute.xlu0 %2604 }
 0x3a7   : > { %4126 = vmatprep.mubr.bf16.mxu1 %v3927_v29  ;;  %v3926_v57 = vld [vmem:[#allocation4 + $0x40] sm:$0xff]  ;;  %2622 = vst.msk [vmem:[#allocation4 + $0x68] sm:$0xff] %vm1986_vm3, %v2605_v13  ;;  %v1975_v39 = vpop.permute.xlu1 %1974 }
 0x3a8   : > { %4127 = vmatmul.mubr.bf16.gmra.mrb[48].mxu1 %v3926_v57  ;;  %1993 = vst.msk [vmem:[#allocation4 + $0x60] sm:$0xff] %vm1986_vm3, %v1975_v39 }
 0x3aa   : > { %v2765_v43 = vpop.permute.xlu0 %2764 }
 0x3ab   : > { %2782 = vst.msk [vmem:[#allocation4 + $0x68] sm:$0xff] %vm2147_vm4, %v2765_v43  ;;  %v2136_v28 = vpop.permute.xlu1 %2135 }
 0x3ac   : > { %2154 = vst.msk [vmem:[#allocation4 + $0x60] sm:$0xff] %vm2147_vm4, %v2136_v28 }
 0x3ae   : > { %v3649_v42 = vpop.permute.xlu0 %3648 }
 0x3af   : > { %3667 = vst.msk [vmem:[#allocation4 + $0x58] sm:$0xff] %vm1822_vm2, %v3649_v42  ;;  %v1273_v40 = vpop.f32.mrb[0].mxu0  ;;  %v3309_v34 = vpop.permute.xlu1 %3308  ;;  %v5666_v42 = vld [vmem:[%s7037_s20 + $0x188] sm:$0xff]  }
 0x3b0   : > { %v1470_v50 = vadd.f32 %v8224_v36, %v1273_v40  ;;  %v8230_v53 = vpop.f32.mrb[1].mxu0  ;;  %3327 = vst.msk [vmem:[#allocation4 + $0x50] sm:$0xff] %vm1822_vm2, %v3309_v34  ;;  %v5667_v40 = vld [vmem:[%s7037_s20 + $0x8c] sm:$0xff]  }
 0x3b1   : > { %v1277_v0 = vpop.f32.mrb[2].mxu0 }
 0x3b2   : > { %v2797_v2 = vld [vmem:[#allocation4 + $0x68] sm:$0xff]  ;;  %v3809_v12 = vpop.permute.xlu0 %3808  ;;  %v1486_v62 = vmax.f32 %v1470_v50, 0.0  ;;  %v1471_v41 = vadd.f32 %v8224_v36, %v1277_v0  ;;  %v8235_v56 = vpop.f32.mrb[3].mxu0 }
 0x3b3   : > { %3008 = vmatprep.mubr.bf16.mxu0 %v2797_v2  ;;  %3576 = vst.msk [vmem:[#allocation4 + $0x68] sm:$0xff] %vm1214_vm1, %v5664_v48  ;;  %v2796_v55 = vld [vmem:[#allocation4 + $0x60] sm:$0xff]  ;;  %v3397_v7 = vpop.permute.xlu1 %3396 }
 0x3b4   : > { %3827 = vst.msk [vmem:[#allocation4 + $0x58] sm:$0xff] %vm1986_vm3, %v3809_v12  ;;  %3009 = vmatmul.mubr.bf16.gmra.mrb[56].mxu0 %v2796_v55  ;;  %4574 = vst [vmem:[%s6336_s13 + $0x80] sm:$0xff] %v1486_v62  ;;  %v1487_v4 = vmax.f32 %v1471_v41, 0.0 }
 0x3b5   : > { %3168 = vst.msk [vmem:[#allocation4 + $0x60] sm:$0xff] %vm1214_vm1, %v5665_v49 }
 0x3b6   : > { %3415 = vst.msk [vmem:[#allocation4 + $0x50] sm:$0xff] %vm1986_vm3, %v3397_v7  ;;  %v3897_v9 = vpop.permute.xlu0 %3896  ;;  %4575 = vst [vmem:[%s6336_s13 + $0x88] sm:$0xff] %v1487_v4 }
 0x3b7   : > { %3915 = vst.msk [vmem:[#allocation4 + $0x58] sm:$0xff] %vm2147_vm4, %v3897_v9  ;;  %v3485_v15 = vpop.permute.xlu1 %3484 }
 0x3b8   : > { %3503 = vst.msk [vmem:[#allocation4 + $0x50] sm:$0xff] %vm2147_vm4, %v3485_v15 }
 0x3b9   : > { %v1283_v3 = vpop.f32.mrb[4].mxu0 }
 0x3ba   : > { %v1472_v11 = vadd.f32 %v8224_v36, %v1283_v3  ;;  %v8244_v21 = vpop.f32.mrb[5].mxu0  ;;  %v2447_v8 = vpop.permute.xlu0 %2446 }
 0x3bb   : > { %v1287_v31 = vpop.f32.mrb[6].mxu0  ;;  %2463 = vst.msk [vmem:[#allocation4 + $0x78] sm:$0xff] %vm1822_vm2, %v2447_v8  ;;  %v1813_v27 = vpop.permute.xlu1 %1812 }
 0x3bc   : > { %v1488_v35 = vmax.f32 %v1472_v11, 0.0  ;;  %v1473_v30 = vadd.f32 %v8224_v36, %v1287_v31  ;;  %v8248_v51 = vpop.f32.mrb[7].mxu0  ;;  %1830 = vst.msk [vmem:[#allocation4 + $0x70] sm:$0xff] %vm1822_vm2, %v1813_v27 }
 0x3be   : > { %4576 = vst [vmem:[%s6336_s13 + $0x90] sm:$0xff] %v1488_v35  ;;  %v1489_v46 = vmax.f32 %v1473_v30, 0.0  ;;  %v3929_v6 = vld [vmem:[#allocation4 + $0x58] sm:$0xff]  ;;  %v2607_v32 = vpop.permute.xlu0 %2606 }
 0x3bf   : > { %4134 = vmatprep.mubr.bf16.mxu1 %v3929_v6  ;;  %v3928_v26 = vld [vmem:[#allocation4 + $0x50] sm:$0xff]  ;;  %2623 = vst.msk [vmem:[#allocation4 + $0x78] sm:$0xff] %vm1986_vm3, %v2607_v32  ;;  %v1977_v18 = vpop.permute.xlu1 %1976 }
 0x3c0   : > { %4577 = vst [vmem:[%s6336_s13 + $0x98] sm:$0xff] %v1489_v46  ;;  %v8256_v38 = vpop.f32.mrb[0].mxu1  ;;  %4135 = vmatmul.mubr.bf16.gmra.mrb[52].mxu1 %v3928_v26  ;;  %1994 = vst.msk [vmem:[#allocation4 + $0x70] sm:$0xff] %vm1986_vm3, %v1977_v18 }
 0x3c1   : > { %v1293_v14 = vpop.f32.mrb[8].mxu0  ;;  %v1388_v5 = vpop.f32.mrb[1].mxu1 }
 0x3c2   : > { %v1474_v23 = vadd.f32 %v8224_v36, %v1293_v14  ;;  %v8259_v47 = vpop.f32.mrb[9].mxu0  ;;  %v4234_v44 = vadd.f32 %v8253_v37, %v1388_v5  ;;  %v8266_v60 = vpop.f32.mrb[2].mxu1 }
 0x3c3   : > { %v1297_v52 = vpop.f32.mrb[10].mxu0  ;;  %v1392_v58 = vpop.f32.mrb[3].mxu1 }
 0x3c4   : > { %v1490_v33 = vmax.f32 %v1474_v23, 0.0  ;;  %v1475_v10 = vadd.f32 %v8224_v36, %v1297_v52  ;;  %v8264_v61 = vpop.f32.mrb[11].mxu0  ;;  %v4250_v16 = vmax.f32 %v4234_v44, 0.0  ;;  %v4235_v17 = vadd.f32 %v8253_v37, %v1392_v58  ;;  %v2767_v1 = vpop.permute.xlu0 %2766 }
 0x3c5   : > { %2783 = vst.msk [vmem:[#allocation4 + $0x78] sm:$0xff] %vm2147_vm4, %v2767_v1  ;;  %v2138_v63 = vpop.permute.xlu1 %2137 }
 0x3c6   : > { %4578 = vst [vmem:[%s6336_s13 + $0xa0] sm:$0xff] %v1490_v33  ;;  %v1491_v59 = vmax.f32 %v1475_v10, 0.0  ;;  %5153 = vst [vmem:[%s6336_s13 + $0x200] sm:$0xff] %v4250_v16  ;;  %v4251_v54 = vmax.f32 %v4235_v17, 0.0 }
 0x3c7   : > { %2155 = vst.msk [vmem:[#allocation4 + $0x70] sm:$0xff] %vm2147_vm4, %v2138_v63 }
 0x3c8   : > { %4579 = vst [vmem:[%s6336_s13 + $0xa8] sm:$0xff] %v1491_v59  ;;  %5154 = vst [vmem:[%s6336_s13 + $0x208] sm:$0xff] %v4251_v54  ;;  %v8279_v19 = vpop.f32.mrb[4].mxu1  ;;  %v3651_v57 = vpop.permute.xlu0 %3650 }
 0x3c9   : > { %v1398_v29 = vpop.f32.mrb[5].mxu1  ;;  %3668 = vst.msk [vmem:[#allocation4 + $0x68] sm:$0xff] %vm1822_vm2, %v3651_v57  ;;  %v3311_v28 = vpop.permute.xlu1 %3310 }
 0x3ca   : > { %v4236_v43 = vadd.f32 %v8253_v37, %v1398_v29  ;;  %v8287_v48 = vpop.f32.mrb[6].mxu1  ;;  %3328 = vst.msk [vmem:[#allocation4 + $0x60] sm:$0xff] %vm1822_vm2, %v3311_v28 }
 0x3cb   : > { %v1402_v50 = vpop.f32.mrb[7].mxu1 }
 0x3cc   : > { %v4252_v49 = vmax.f32 %v4236_v43, 0.0  ;;  %v4237_v2 = vadd.f32 %v8253_v37, %v1402_v50  ;;  %v3811_v0 = vpop.permute.xlu0 %3810  ;;  %v2799_v12 = vld [vmem:[#allocation4 + $0x78] sm:$0xff] }
 0x3cd   : > { %3828 = vst.msk [vmem:[#allocation4 + $0x68] sm:$0xff] %vm1986_vm3, %v3811_v0  ;;  %v3399_v62 = vpop.permute.xlu1 %3398  ;;  %3016 = vmatprep.mubr.bf16.mxu0 %v2799_v12 }
 0x3ce   : > { %v1303_v20 = vpop.f32.mrb[12].mxu0  ;;  %5155 = vst [vmem:[%s6336_s13 + $0x210] sm:$0xff] %v4252_v49  ;;  %v2798_v41 = vld [vmem:[#allocation4 + $0x70] sm:$0xff]  ;;  %3577 = vst.msk [vmem:[#allocation4 + $0x78] sm:$0xff] %vm1214_vm1, %v5666_v42  ;;  %v4253_v7 = vmax.f32 %v4237_v2, 0.0 }
 0x3cf   : > { %v1476_v45 = vadd.f32 %v8224_v36, %v1303_v20  ;;  %v8276_v24 = vpop.f32.mrb[13].mxu0  ;;  %3416 = vst.msk [vmem:[#allocation4 + $0x60] sm:$0xff] %vm1986_vm3, %v3399_v62  ;;  %3017 = vmatmul.mubr.bf16.gmra.mrb[60].mxu0 %v2798_v41 }
 0x3d0   : > { %v1307_v25 = vpop.f32.mrb[14].mxu0  ;;  %3169 = vst.msk [vmem:[#allocation4 + $0x70] sm:$0xff] %vm1214_vm1, %v5667_v40  ;;  %v8302_v3 = vpop.f32.mrb[8].mxu1  ;;  %5156 = vst [vmem:[%s6336_s13 + $0x218] sm:$0xff] %v4253_v7 }
 0x3d1   : > { %v1492_v22 = vmax.f32 %v1476_v45, 0.0  ;;  %v1477_v13 = vadd.f32 %v8224_v36, %v1307_v25  ;;  %v8282_v39 = vpop.f32.mrb[15].mxu0  ;;  %v1408_v11 = vpop.f32.mrb[9].mxu1 }
 0x3d2   : > { %v3899_v31 = vpop.permute.xlu0 %3898  ;;  %v4238_v8 = vadd.f32 %v8253_v37, %v1408_v11  ;;  %v3487_v27 = vpop.permute.xlu1 %3486 }
 0x3d3   : > { %4580 = vst [vmem:[%s6336_s13 + $0xb0] sm:$0xff] %v1492_v22  ;;  %v1493_v34 = vmax.f32 %v1477_v13, 0.0  ;;  %3916 = vst.msk [vmem:[#allocation4 + $0x68] sm:$0xff] %vm2147_vm4, %v3899_v31  ;;  %v8310_v6 = vpop.f32.mrb[10].mxu1 }
 0x3d4   : > { %3504 = vst.msk [vmem:[#allocation4 + $0x60] sm:$0xff] %vm2147_vm4, %v3487_v27  ;;  %v4254_v26 = vmax.f32 %v4238_v8, 0.0  ;;  %v1412_v23 = vpop.f32.mrb[11].mxu1 }
 0x3d5   : > { %4581 = vst [vmem:[%s6336_s13 + $0xb8] sm:$0xff] %v1493_v34  ;;  %v4239_v5 = vadd.f32 %v8253_v37, %v1412_v23 }
 0x3d6   : > { %v1313_v55 = vpop.f32.mrb[16].mxu0  ;;  %v3653_v32 = vpop.permute.xlu0 %3652  ;;  %5157 = vst [vmem:[%s6336_s13 + $0x220] sm:$0xff] %v4254_v26 }
 0x3d7   : > { %v1478_v4 = vadd.f32 %v8224_v36, %v1313_v55  ;;  %v8300_v9 = vpop.f32.mrb[17].mxu0  ;;  %3669 = vst.msk [vmem:[#allocation4 + $0x78] sm:$0xff] %vm1822_vm2, %v3653_v32  ;;  %v3313_v52 = vpop.permute.xlu1 %3312  ;;  %v4255_v33 = vmax.f32 %v4239_v5, 0.0 }
 0x3d8   : > { %v1317_v15 = vpop.f32.mrb[18].mxu0  ;;  %3329 = vst.msk [vmem:[#allocation4 + $0x70] sm:$0xff] %vm1822_vm2, %v3313_v52  ;;  %v8322_v16 = vpop.f32.mrb[12].mxu1 }
 0x3d9   : > { %v1494_v35 = vmax.f32 %v1478_v4, 0.0  ;;  %v1479_v30 = vadd.f32 %v8224_v36, %v1317_v15  ;;  %v8306_v46 = vpop.f32.mrb[19].mxu0  ;;  %5158 = vst [vmem:[%s6336_s13 + $0x228] sm:$0xff] %v4255_v33  ;;  %v1418_v59 = vpop.f32.mrb[13].mxu1 }
 0x3da   : > { %v3813_v17 = vpop.permute.xlu0 %3812  ;;  %v3931_v1 = vld [vmem:[#allocation4 + $0x68] sm:$0xff]  ;;  %v4240_v45 = vadd.f32 %v8253_v37, %v1418_v59  ;;  %v8330_v57 = vpop.f32.mrb[14].mxu1 }
 0x3db   : > { %4582 = vst [vmem:[%s6336_s13 + $0xc0] sm:$0xff] %v1494_v35  ;;  %v1495_v14 = vmax.f32 %v1479_v30, 0.0  ;;  %3829 = vst.msk [vmem:[#allocation4 + $0x78] sm:$0xff] %vm1986_vm3, %v3813_v17  ;;  %v3401_v25 = vpop.permute.xlu1 %3400  ;;  %4142 = vmatprep.mubr.bf16.mxu1 %v3931_v1  ;;  %v3930_v29 = vld [vmem:[#allocation4 + $0x60] sm:$0xff]  ;;  %v1422_v43 = vpop.f32.mrb[15].mxu1 }
 0x3dc   : > { %3417 = vst.msk [vmem:[#allocation4 + $0x70] sm:$0xff] %vm1986_vm3, %v3401_v25  ;;  %4143 = vmatmul.mubr.bf16.gmra.mrb[56].mxu1 %v3930_v29  ;;  %v4256_v13 = vmax.f32 %v4240_v45, 0.0  ;;  %v4241_v28 = vadd.f32 %v8253_v37, %v1422_v43 }
 0x3dd   : > { %4583 = vst [vmem:[%s6336_s13 + $0xc8] sm:$0xff] %v1495_v14 }
 0x3de   : > { %v1323_v44 = vpop.f32.mrb[20].mxu0  ;;  %v3901_v42 = vpop.permute.xlu0 %3900  ;;  %5159 = vst [vmem:[%s6336_s13 + $0x230] sm:$0xff] %v4256_v13  ;;  %v4257_v34 = vmax.f32 %v4241_v28, 0.0 }
 0x3df   : > { %v1480_v10 = vadd.f32 %v8224_v36, %v1323_v44  ;;  %v8320_v18 = vpop.f32.mrb[21].mxu0  ;;  %3917 = vst.msk [vmem:[#allocation4 + $0x78] sm:$0xff] %vm2147_vm4, %v3901_v42  ;;  %v3489_v40 = vpop.permute.xlu1 %3488 }
 0x3e0   : > { %v1327_v58 = vpop.f32.mrb[22].mxu0  ;;  %v8338_v49 = vpop.f32.mrb[16].mxu1  ;;  %3505 = vst.msk [vmem:[#allocation4 + $0x70] sm:$0xff] %vm2147_vm4, %v3489_v40  ;;  %5160 = vst [vmem:[%s6336_s13 + $0x238] sm:$0xff] %v4257_v34 }
 0x3e1   : > { %v1496_v54 = vmax.f32 %v1480_v10, 0.0  ;;  %v1481_v63 = vadd.f32 %v8224_v36, %v1327_v58  ;;  %v8326_v20 = vpop.f32.mrb[23].mxu0  ;;  %v1428_v50 = vpop.f32.mrb[17].mxu1 }
 0x3e2   : > { %v4242_v2 = vadd.f32 %v8253_v37, %v1428_v50  ;;  %v8343_v0 = vpop.f32.mrb[18].mxu1 }
 0x3e3   : > { %4584 = vst [vmem:[%s6336_s13 + $0xd0] sm:$0xff] %v1496_v54  ;;  %v1497_v22 = vmax.f32 %v1481_v63, 0.0  ;;  %v1432_v12 = vpop.f32.mrb[19].mxu1 }
 0x3e4   : > { %v4258_v62 = vmax.f32 %v4242_v2, 0.0  ;;  %v4243_v41 = vadd.f32 %v8253_v37, %v1432_v12 }
 0x3e5   : > { %4585 = vst [vmem:[%s6336_s13 + $0xd8] sm:$0xff] %v1497_v22 }
 0x3e6   : > { %v1333_v55 = vpop.f32.mrb[24].mxu0  ;;  %5161 = vst [vmem:[%s6336_s13 + $0x240] sm:$0xff] %v4258_v62  ;;  %v4259_v7 = vmax.f32 %v4243_v41, 0.0  ;;  %v3933_v4 = vld [vmem:[#allocation4 + $0x78] sm:$0xff] }
 0x3e7   : > { %v1482_v15 = vadd.f32 %v8224_v36, %v1333_v55  ;;  %v8348_v11 = vpop.f32.mrb[25].mxu0  ;;  %4150 = vmatprep.mubr.bf16.mxu1 %v3933_v4  ;;  %v3932_v31 = vld [vmem:[#allocation4 + $0x70] sm:$0xff] }
 0x3e8   : > { %v1337_v35 = vpop.f32.mrb[26].mxu0  ;;  %5162 = vst [vmem:[%s6336_s13 + $0x248] sm:$0xff] %v4259_v7  ;;  %v8351_v30 = vpop.f32.mrb[20].mxu1  ;;  %4151 = vmatmul.mubr.bf16.gmra.mrb[60].mxu1 %v3932_v31 }
 0x3e9   : > { %v1498_v8 = vmax.f32 %v1482_v15, 0.0  ;;  %v1483_v27 = vadd.f32 %v8224_v36, %v1337_v35  ;;  %v8354_v14 = vpop.f32.mrb[27].mxu0  ;;  %v1438_v26 = vpop.f32.mrb[21].mxu1 }
 0x3ea   : > { %v4244_v23 = vadd.f32 %v8253_v37, %v1438_v26  ;;  %v8357_v5 = vpop.f32.mrb[22].mxu1 }
 0x3eb   : > { %4586 = vst [vmem:[%s6336_s13 + $0xe0] sm:$0xff] %v1498_v8  ;;  %v1499_v32 = vmax.f32 %v1483_v27, 0.0  ;;  %v1442_v52 = vpop.f32.mrb[23].mxu1  ;;  %v8387_v8 = vld [vmem:[#allocation11 + $0x2] ss:$0 sm:$0xff] }
 0x3ec   : > { %v4260_v44 = vmax.f32 %v4244_v23, 0.0  ;;  %v4245_v33 = vadd.f32 %v8253_v37, %v1442_v52 }
 0x3ed   : > { %4587 = vst [vmem:[%s6336_s13 + $0xe8] sm:$0xff] %v1499_v32 }
 0x3ee   : > { %5163 = vst [vmem:[%s6336_s13 + $0x250] sm:$0xff] %v4260_v44  ;;  %v4261_v10 = vmax.f32 %v4245_v33, 0.0 }
 0x3f0   : > { %5164 = vst [vmem:[%s6336_s13 + $0x258] sm:$0xff] %v4261_v10  ;;  %v8364_v58 = vpop.f32.mrb[24].mxu1 }
 0x3f1   : > { %v1448_v59 = vpop.f32.mrb[25].mxu1  ;;  %v1343_v17 = vpop.f32.mrb[28].mxu0 }
 0x3f2   : > { %v4246_v1 = vadd.f32 %v8253_v37, %v1448_v59  ;;  %v8367_v54 = vpop.f32.mrb[26].mxu1  ;;  %v1484_v63 = vadd.f32 %v8224_v36, %v1343_v17  ;;  %v8370_v45 = vpop.f32.mrb[29].mxu0 }
 0x3f3   : > { %v1452_v25 = vpop.f32.mrb[27].mxu1  ;;  %v1347_v29 = vpop.f32.mrb[30].mxu0 }
 0x3f4   : > { %v4262_v22 = vmax.f32 %v4246_v1, 0.0  ;;  %v4247_v13 = vadd.f32 %v8253_v37, %v1452_v25  ;;  %v1500_v43 = vmax.f32 %v1484_v63, 0.0  ;;  %v1485_v28 = vadd.f32 %v8224_v36, %v1347_v29  ;;  %v8374_v42 = vpop.f32.mrb[31].mxu0 }
 0x3f6   : > { %5165 = vst [vmem:[%s6336_s13 + $0x260] sm:$0xff] %v4262_v22  ;;  %v4263_v40 = vmax.f32 %v4247_v13, 0.0  ;;  %4588 = vst [vmem:[%s6336_s13 + $0xf0] sm:$0xff] %v1500_v43  ;;  %v1501_v34 = vmax.f32 %v1485_v28, 0.0 }
 0x3f8   : > { %5166 = vst [vmem:[%s6336_s13 + $0x268] sm:$0xff] %v4263_v40  ;;  %v8379_v50 = vpop.f32.mrb[28].mxu1  ;;  %4589 = vst [vmem:[%s6336_s13 + $0xf8] sm:$0xff] %v1501_v34 }
 0x3f9   : > { %v1458_v2 = vpop.f32.mrb[29].mxu1 }
 0x3fa   : > { %v4248_v12 = vadd.f32 %v8253_v37, %v1458_v2  ;;  %v8383_v62 = vpop.f32.mrb[30].mxu1 }
 0x3fb   : > { %v1462_v41 = vpop.f32.mrb[31].mxu1 }
 0x3fc   : > { %v4264_v36 = vmax.f32 %v4248_v12, 0.0  ;;  %v4249_v7 = vadd.f32 %v8253_v37, %v1462_v41  ;;  %v8402_v12 = vld [vmem:[#allocation11 + $0x3] ss:$0 sm:$0xff] }
 0x3fe   : > { %5167 = vst [vmem:[%s6336_s13 + $0x270] sm:$0xff] %v4264_v36  ;;  %v4265_v35 = vmax.f32 %v4249_v7, 0.0 }
 0x400   : > { %5168 = vst [vmem:[%s6336_s13 + $0x278] sm:$0xff] %v4265_v35 }
 0x403   : > { %v5275_v55 = vpop.f32.mrb[32].mxu0 }
 0x404   : > { %v5276_v4 = vpop.f32.mrb[33].mxu0 }
 0x405   : > { %v5277_v15 = vadd.f32 %v5276_v4, %v5275_v55  ;;  %v5278_v31 = vpop.f32.mrb[34].mxu0 }
 0x406   : > { %v5279_v27 = vpop.f32.mrb[35].mxu0 }
 0x407   : > { %v3025_v26 = vadd.f32 %v5277_v15, %v8230_v53  ;;  %v5280_v23 = vadd.f32 %v5279_v27, %v5278_v31 }
 0x409   : > { %v3046_v32 = vadd.f32 %v8387_v8, %v3025_v26  ;;  %v3026_v52 = vadd.f32 %v5280_v23, %v8235_v56 }
 0x40b   : > { %v3062_v44 = vmax.f32 %v3046_v32, 0.0  ;;  %v3047_v37 = vadd.f32 %v8387_v8, %v3026_v52 }
 0x40d   : > { %4931 = vst [vmem:[%s6336_s13 + $0x100] sm:$0xff] %v3062_v44  ;;  %v3063_v33 = vmax.f32 %v3047_v37, 0.0 }
 0x40f   : > { %4932 = vst [vmem:[%s6336_s13 + $0x108] sm:$0xff] %v3063_v33  ;;  %v5281_v10 = vpop.f32.mrb[36].mxu0 }
 0x410   : > { %v5282_v59 = vpop.f32.mrb[37].mxu0 }
 0x411   : > { %v5283_v17 = vadd.f32 %v5282_v59, %v5281_v10  ;;  %v5284_v1 = vpop.f32.mrb[38].mxu0 }
 0x412   : > { %v5285_v63 = vpop.f32.mrb[39].mxu0 }
 0x413   : > { %v3027_v53 = vadd.f32 %v5283_v17, %v8244_v21  ;;  %v5286_v25 = vadd.f32 %v5285_v63, %v5284_v1 }
 0x415   : > { %v3048_v29 = vadd.f32 %v8387_v8, %v3027_v53  ;;  %v3028_v56 = vadd.f32 %v5286_v25, %v8248_v51 }
 0x417   : > { %v3064_v22 = vmax.f32 %v3048_v29, 0.0  ;;  %v3049_v13 = vadd.f32 %v8387_v8, %v3028_v56 }
 0x419   : > { %4933 = vst [vmem:[%s6336_s13 + $0x110] sm:$0xff] %v3064_v22  ;;  %v3065_v43 = vmax.f32 %v3049_v13, 0.0 }
 0x41b   : > { %4934 = vst [vmem:[%s6336_s13 + $0x118] sm:$0xff] %v3065_v43  ;;  %v5339_v28 = vpop.f32.mrb[32].mxu1 }
 0x41c   : > { %v5340_v40 = vpop.f32.mrb[33].mxu1 }
 0x41d   : > { %v5341_v34 = vadd.f32 %v5340_v40, %v5339_v28  ;;  %v5342_v2 = vpop.f32.mrb[34].mxu1 }
 0x41e   : > { %v5343_v21 = vpop.f32.mrb[35].mxu1 }
 0x41f   : > { %v4159_v41 = vadd.f32 %v5341_v34, %v8256_v38  ;;  %v5344_v55 = vadd.f32 %v5343_v21, %v5342_v2 }
 0x421   : > { %v4180_v51 = vadd.f32 %v8402_v12, %v4159_v41  ;;  %v4160_v36 = vadd.f32 %v5344_v55, %v8266_v60 }
 0x423   : > { %v4196_v7 = vmax.f32 %v4180_v51, 0.0  ;;  %v4181_v4 = vadd.f32 %v8402_v12, %v4160_v36 }
 0x425   : > { %5136 = vst [vmem:[%s6336_s13 + $0x180] sm:$0xff] %v4196_v7  ;;  %v4197_v15 = vmax.f32 %v4181_v4, 0.0 }
 0x427   : > { %5137 = vst [vmem:[%s6336_s13 + $0x188] sm:$0xff] %v4197_v15  ;;  %v5287_v31 = vpop.f32.mrb[40].mxu0 }
 0x428   : > { %v5288_v35 = vpop.f32.mrb[41].mxu0 }
 0x429   : > { %v5289_v27 = vadd.f32 %v5288_v35, %v5287_v31  ;;  %v5290_v26 = vpop.f32.mrb[42].mxu0 }
 0x42a   : > { %v5291_v23 = vpop.f32.mrb[43].mxu0 }
 0x42b   : > { %v3029_v38 = vadd.f32 %v5289_v27, %v8259_v47  ;;  %v5292_v32 = vadd.f32 %v5291_v23, %v5290_v26 }
 0x42d   : > { %v3050_v52 = vadd.f32 %v8387_v8, %v3029_v38  ;;  %v3030_v60 = vadd.f32 %v5292_v32, %v8264_v61 }
 0x42f   : > { %v3066_v44 = vmax.f32 %v3050_v52, 0.0  ;;  %v3051_v37 = vadd.f32 %v8387_v8, %v3030_v60 }
 0x431   : > { %4935 = vst [vmem:[%s6336_s13 + $0x120] sm:$0xff] %v3066_v44  ;;  %v3067_v59 = vmax.f32 %v3051_v37, 0.0 }
 0x433   : > { %v5345_v33 = vpop.f32.mrb[36].mxu1  ;;  %4936 = vst [vmem:[%s6336_s13 + $0x128] sm:$0xff] %v3067_v59 }
 0x434   : > { %v5346_v10 = vpop.f32.mrb[37].mxu1 }
 0x435   : > { %v5347_v17 = vadd.f32 %v5346_v10, %v5345_v33  ;;  %v5348_v1 = vpop.f32.mrb[38].mxu1 }
 0x436   : > { %v5349_v63 = vpop.f32.mrb[39].mxu1 }
 0x437   : > { %v4161_v47 = vadd.f32 %v5347_v17, %v8279_v19  ;;  %v5350_v53 = vadd.f32 %v5349_v63, %v5348_v1 }
 0x439   : > { %v4182_v25 = vadd.f32 %v8402_v12, %v4161_v47  ;;  %v4162_v61 = vadd.f32 %v5350_v53, %v8287_v48 }
 0x43b   : > { %v4198_v29 = vmax.f32 %v4182_v25, 0.0  ;;  %v4183_v56 = vadd.f32 %v8402_v12, %v4162_v61 }
 0x43d   : > { %5138 = vst [vmem:[%s6336_s13 + $0x190] sm:$0xff] %v4198_v29  ;;  %v4199_v22 = vmax.f32 %v4183_v56, 0.0 }
 0x43f   : > { %5139 = vst [vmem:[%s6336_s13 + $0x198] sm:$0xff] %v4199_v22  ;;  %v5293_v13 = vpop.f32.mrb[44].mxu0 }
 0x440   : > { %v5294_v43 = vpop.f32.mrb[45].mxu0 }
 0x441   : > { %v5295_v28 = vadd.f32 %v5294_v43, %v5293_v13  ;;  %v5296_v40 = vpop.f32.mrb[46].mxu0 }
 0x442   : > { %v5297_v34 = vpop.f32.mrb[47].mxu0 }
 0x443   : > { %v3031_v19 = vadd.f32 %v5295_v28, %v8276_v24  ;;  %v5298_v2 = vadd.f32 %v5297_v34, %v5296_v40 }
 0x445   : > { %v3052_v21 = vadd.f32 %v8387_v8, %v3031_v19  ;;  %v3032_v48 = vadd.f32 %v5298_v2, %v8282_v39 }
 0x447   : > { %v3068_v55 = vmax.f32 %v3052_v21, 0.0  ;;  %v3053_v51 = vadd.f32 %v8387_v8, %v3032_v48 }
 0x449   : > { %4937 = vst [vmem:[%s6336_s13 + $0x130] sm:$0xff] %v3068_v55  ;;  %v3069_v15 = vmax.f32 %v3053_v51, 0.0 }
 0x44b   : > { %v5351_v41 = vpop.f32.mrb[40].mxu1  ;;  %4938 = vst [vmem:[%s6336_s13 + $0x138] sm:$0xff] %v3069_v15 }
 0x44c   : > { %v5352_v36 = vpop.f32.mrb[41].mxu1 }
 0x44d   : > { %v5353_v7 = vadd.f32 %v5352_v36, %v5351_v41  ;;  %v5354_v4 = vpop.f32.mrb[42].mxu1 }
 0x44e   : > { %v5355_v31 = vpop.f32.mrb[43].mxu1 }
 0x44f   : > { %v4163_v35 = vadd.f32 %v5353_v7, %v8302_v3  ;;  %v5356_v24 = vadd.f32 %v5355_v31, %v5354_v4 }
 0x451   : > { %v4184_v27 = vadd.f32 %v8402_v12, %v4163_v35  ;;  %v4164_v39 = vadd.f32 %v5356_v24, %v8310_v6 }
 0x453   : > { %v4200_v26 = vmax.f32 %v4184_v27, 0.0  ;;  %v4185_v23 = vadd.f32 %v8402_v12, %v4164_v39 }
 0x455   : > { %5140 = vst [vmem:[%s6336_s13 + $0x1a0] sm:$0xff] %v4200_v26  ;;  %v4201_v38 = vmax.f32 %v4185_v23, 0.0 }
 0x457   : > { %5141 = vst [vmem:[%s6336_s13 + $0x1a8] sm:$0xff] %v4201_v38  ;;  %v5299_v32 = vpop.f32.mrb[48].mxu0 }
 0x458   : > { %v5300_v52 = vpop.f32.mrb[49].mxu0 }
 0x459   : > { %v5301_v60 = vadd.f32 %v5300_v52, %v5299_v32  ;;  %v5302_v44 = vpop.f32.mrb[50].mxu0 }
 0x45a   : > { %v5303_v37 = vpop.f32.mrb[51].mxu0 }
 0x45b   : > { %v3033_v3 = vadd.f32 %v5301_v60, %v8300_v9  ;;  %v5304_v33 = vadd.f32 %v5303_v37, %v5302_v44 }
 0x45d   : > { %v3054_v10 = vadd.f32 %v8387_v8, %v3033_v3  ;;  %v3034_v6 = vadd.f32 %v5304_v33, %v8306_v46 }
 0x45f   : > { %v3070_v59 = vmax.f32 %v3054_v10, 0.0  ;;  %v3055_v17 = vadd.f32 %v8387_v8, %v3034_v6 }
 0x461   : > { %4939 = vst [vmem:[%s6336_s13 + $0x140] sm:$0xff] %v3070_v59  ;;  %v3071_v1 = vmax.f32 %v3055_v17, 0.0 }
 0x463   : > { %4940 = vst [vmem:[%s6336_s13 + $0x148] sm:$0xff] %v3071_v1  ;;  %v5357_v63 = vpop.f32.mrb[44].mxu1 }
 0x464   : > { %v5358_v47 = vpop.f32.mrb[45].mxu1 }
 0x465   : > { %v5359_v53 = vadd.f32 %v5358_v47, %v5357_v63  ;;  %v5360_v25 = vpop.f32.mrb[46].mxu1 }
 0x466   : > { %v5361_v61 = vpop.f32.mrb[47].mxu1 }
 0x467   : > { %v4165_v9 = vadd.f32 %v5359_v53, %v8322_v16  ;;  %v5362_v29 = vadd.f32 %v5361_v61, %v5360_v25 }
 0x469   : > { %v4186_v56 = vadd.f32 %v8402_v12, %v4165_v9  ;;  %v4166_v46 = vadd.f32 %v5362_v29, %v8330_v57 }
 0x46b   : > { %v4202_v22 = vmax.f32 %v4186_v56, 0.0  ;;  %v4187_v13 = vadd.f32 %v8402_v12, %v4166_v46 }
 0x46d   : > { %5142 = vst [vmem:[%s6336_s13 + $0x1b0] sm:$0xff] %v4202_v22  ;;  %v4203_v43 = vmax.f32 %v4187_v13, 0.0 }
 0x46f   : > { %5143 = vst [vmem:[%s6336_s13 + $0x1b8] sm:$0xff] %v4203_v43  ;;  %v5305_v28 = vpop.f32.mrb[52].mxu0 }
 0x470   : > { %v5306_v40 = vpop.f32.mrb[53].mxu0 }
 0x471   : > { %v5307_v34 = vadd.f32 %v5306_v40, %v5305_v28  ;;  %v5308_v19 = vpop.f32.mrb[54].mxu0 }
 0x472   : > { %v5309_v2 = vpop.f32.mrb[55].mxu0 }
 0x473   : > { %v3035_v16 = vadd.f32 %v5307_v34, %v8320_v18  ;;  %v5310_v21 = vadd.f32 %v5309_v2, %v5308_v19 }
 0x475   : > { %v3056_v48 = vadd.f32 %v8387_v8, %v3035_v16  ;;  %v3036_v57 = vadd.f32 %v5310_v21, %v8326_v20 }
 0x477   : > { %v3072_v41 = vmax.f32 %v3056_v48, 0.0  ;;  %v3057_v55 = vadd.f32 %v8387_v8, %v3036_v57 }
 0x479   : > { %4941 = vst [vmem:[%s6336_s13 + $0x150] sm:$0xff] %v3072_v41  ;;  %v3073_v51 = vmax.f32 %v3057_v55, 0.0 }
 0x47b   : > { %4942 = vst [vmem:[%s6336_s13 + $0x158] sm:$0xff] %v3073_v51  ;;  %v5363_v36 = vpop.f32.mrb[48].mxu1 }
 0x47c   : > { %v5364_v7 = vpop.f32.mrb[49].mxu1 }
 0x47d   : > { %v5365_v4 = vadd.f32 %v5364_v7, %v5363_v36  ;;  %v5366_v15 = vpop.f32.mrb[50].mxu1 }
 0x47e   : > { %v5367_v31 = vpop.f32.mrb[51].mxu1 }
 0x47f   : > { %v4167_v18 = vadd.f32 %v5365_v4, %v8338_v49  ;;  %v5368_v35 = vadd.f32 %v5367_v31, %v5366_v15 }
 0x481   : > { %v4188_v24 = vadd.f32 %v8402_v12, %v4167_v18  ;;  %v4168_v20 = vadd.f32 %v5368_v35, %v8343_v0 }
 0x483   : > { %v4204_v27 = vmax.f32 %v4188_v24, 0.0  ;;  %v4189_v39 = vadd.f32 %v8402_v12, %v4168_v20 }
 0x485   : > { %5144 = vst [vmem:[%s6336_s13 + $0x1c0] sm:$0xff] %v4204_v27  ;;  %v4205_v26 = vmax.f32 %v4189_v39, 0.0 }
 0x487   : > { %5145 = vst [vmem:[%s6336_s13 + $0x1c8] sm:$0xff] %v4205_v26  ;;  %v5311_v23 = vpop.f32.mrb[56].mxu0 }
 0x488   : > { %v5312_v38 = vpop.f32.mrb[57].mxu0 }
 0x489   : > { %v5313_v32 = vadd.f32 %v5312_v38, %v5311_v23  ;;  %v5314_v52 = vpop.f32.mrb[58].mxu0 }
 0x48a   : > { %v5315_v60 = vpop.f32.mrb[59].mxu0 }
 0x48b   : > { %v3037_v49 = vadd.f32 %v5313_v32, %v8348_v11  ;;  %v5316_v44 = vadd.f32 %v5315_v60, %v5314_v52 }
 0x48d   : > { %v3058_v37 = vadd.f32 %v8387_v8, %v3037_v49  ;;  %v3038_v0 = vadd.f32 %v5316_v44, %v8354_v14 }
 0x48f   : > { %v3074_v3 = vmax.f32 %v3058_v37, 0.0  ;;  %v3059_v33 = vadd.f32 %v8387_v8, %v3038_v0 }
 0x491   : > { %4943 = vst [vmem:[%s6336_s13 + $0x160] sm:$0xff] %v3074_v3  ;;  %v3075_v10 = vmax.f32 %v3059_v33, 0.0 }
 0x493   : > { %4944 = vst [vmem:[%s6336_s13 + $0x168] sm:$0xff] %v3075_v10  ;;  %v5369_v6 = vpop.f32.mrb[52].mxu1 }
 0x494   : > { %v5370_v59 = vpop.f32.mrb[53].mxu1 }
 0x495   : > { %v5371_v17 = vadd.f32 %v5370_v59, %v5369_v6  ;;  %v5372_v1 = vpop.f32.mrb[54].mxu1 }
 0x496   : > { %v5373_v63 = vpop.f32.mrb[55].mxu1 }
 0x497   : > { %v4169_v11 = vadd.f32 %v5371_v17, %v8351_v30  ;;  %v5374_v47 = vadd.f32 %v5373_v63, %v5372_v1 }
 0x499   : > { %v4190_v53 = vadd.f32 %v8402_v12, %v4169_v11  ;;  %v4170_v14 = vadd.f32 %v5374_v47, %v8357_v5 }
 0x49b   : > { %v4206_v25 = vmax.f32 %v4190_v53, 0.0  ;;  %v4191_v61 = vadd.f32 %v8402_v12, %v4170_v14 }
 0x49d   : > { %5146 = vst [vmem:[%s6336_s13 + $0x1d0] sm:$0xff] %v4206_v25  ;;  %v4207_v9 = vmax.f32 %v4191_v61, 0.0 }
 0x49f   : > { %5147 = vst [vmem:[%s6336_s13 + $0x1d8] sm:$0xff] %v4207_v9 }
 0x4a2   : > { %v5317_v29 = vpop.f32.mrb[60].mxu0 }
 0x4a3   : > { %v5318_v56 = vpop.f32.mrb[61].mxu0 }
 0x4a4   : > { %v5319_v46 = vadd.f32 %v5318_v56, %v5317_v29  ;;  %v5320_v22 = vpop.f32.mrb[62].mxu0 }
 0x4a5   : > { %v5321_v13 = vpop.f32.mrb[63].mxu0 }
 0x4a6   : > { %v3039_v30 = vadd.f32 %v5319_v46, %v8370_v45  ;;  %v5322_v43 = vadd.f32 %v5321_v13, %v5320_v22 }
 0x4a8   : > { %v3060_v28 = vadd.f32 %v8387_v8, %v3039_v30  ;;  %v3040_v5 = vadd.f32 %v5322_v43, %v8374_v42 }
 0x4aa   : > { %v3076_v40 = vmax.f32 %v3060_v28, 0.0  ;;  %v3061_v34 = vadd.f32 %v8387_v8, %v3040_v5 }
 0x4ac   : > { %4945 = vst [vmem:[%s6336_s13 + $0x170] sm:$0xff] %v3076_v40  ;;  %v3077_v19 = vmax.f32 %v3061_v34, 0.0 }
 0x4ae   : > { %4946 = vst [vmem:[%s6336_s13 + $0x178] sm:$0xff] %v3077_v19 }
 0x4af   : > { %v5375_v2 = vpop.f32.mrb[56].mxu1 }
 0x4b0   : > { %v5376_v16 = vpop.f32.mrb[57].mxu1 }
 0x4b1   : > { %v5377_v21 = vadd.f32 %v5376_v16, %v5375_v2  ;;  %v5378_v48 = vpop.f32.mrb[58].mxu1 }
 0x4b2   : > { %v5379_v57 = vpop.f32.mrb[59].mxu1 }
 0x4b3   : > { %v4171_v45 = vadd.f32 %v5377_v21, %v8364_v58  ;;  %v5380_v41 = vadd.f32 %v5379_v57, %v5378_v48 }
 0x4b5   : > { %v4192_v55 = vadd.f32 %v8402_v12, %v4171_v45  ;;  %v4172_v42 = vadd.f32 %v5380_v41, %v8367_v54 }
 0x4b7   : > { %v4208_v51 = vmax.f32 %v4192_v55, 0.0  ;;  %v4193_v8 = vadd.f32 %v8402_v12, %v4172_v42 }
 0x4b9   : > { %5148 = vst [vmem:[%s6336_s13 + $0x1e0] sm:$0xff] %v4208_v51  ;;  %v4209_v36 = vmax.f32 %v4193_v8, 0.0 }
 0x4bb   : > { %5149 = vst [vmem:[%s6336_s13 + $0x1e8] sm:$0xff] %v4209_v36  ;;  %v5381_v7 = vpop.f32.mrb[60].mxu1 }
 0x4bc   : > { %v5382_v4 = vpop.f32.mrb[61].mxu1 }
 0x4bd   : > { %v5383_v15 = vadd.f32 %v5382_v4, %v5381_v7  ;;  %v5384_v31 = vpop.f32.mrb[62].mxu1 }
 0x4be   : > { %v5385_v18 = vpop.f32.mrb[63].mxu1 }
 0x4bf   : > { %v4173_v58 = vadd.f32 %v5383_v15, %v8379_v50  ;;  %v5386_v35 = vadd.f32 %v5385_v18, %v5384_v31 }
 0x4c1   : > { %v4194_v24 = vadd.f32 %v8402_v12, %v4173_v58  ;;  %v4174_v54 = vadd.f32 %v5386_v35, %v8383_v62 }
 0x4c3   : > { %v4210_v20 = vmax.f32 %v4194_v24, 0.0  ;;  %v4195_v27 = vadd.f32 %v8402_v12, %v4174_v54 }
 0x4c5   : > { %5150 = vst [vmem:[%s6336_s13 + $0x1f0] sm:$0xff] %v4210_v20  ;;  %v4211_v39 = vmax.f32 %v4195_v27, 0.0 }
 0x4c7   : > { %5151 = vst [vmem:[%s6336_s13 + $0x1f8] sm:$0xff] %v4211_v39 }
 0x4c8   : > { %s8609_s12 = sld [smem:[#allocation25_spill]]  ;;  %s5176_s24 = sshll.u32 %s8602_s9, 4 }
 0x4c9   : > { %s4316_s27 = sshll.u32 %s6336_s13, 4  ;;  %s5963_s16 = smov 2048   ;;  %s4317_s27 = int_to_ptr.vmem [resolvable:$true] %s4316_s27 }
 0x4ca   : > { %p8610_p1 = scmp.ne.s32.totalorder %s8590_s18, 0  ;;  %s8611_s3 = sld [smem:[#allocation34_spill]] }
 0x4cb   : > { %s5964_s19 = smov 4096   ;;  %s5965_s5 = smov 16  }
 0x4cc   : > { %5419 = sst [smem:[#allocation18]] (%p8610_p1), %s5963_s16  ;;  %s5966_s9 = smov 128  }
 0x4cd   : > { %5420 = sst [smem:[#allocation18 + $0x1]] (%p8610_p1), %s5964_s19  ;;  %s5967_s13 = smov 8  }
 0x4ce   : > { %s5396_s1 = smul.u32 160, %s8609_s12  ;;  %5421 = sst [smem:[#allocation18 + $0x2]] (%p8610_p1), %s5965_s5 }
 0x4cf   : > { %5422 = sst [smem:[#allocation18 + $0x3]] (%p8610_p1), %s5966_s9  ;;  %s5968_s12 = smov [#allocation17]  }
 0x4d0   : > { %s4297_s15 = sadd.s32 %s5396_s1, %s5176_s24  ;;  %5423 = sst [smem:[#allocation18 + $0x4]] (%p8610_p1), %s5966_s9 }
 0x4d1   : > { %s5171_s28 = sshll.u32 %s4297_s15, 7  ;;  %5424 = sst [smem:[#allocation18 + $0x5]] (%p8610_p1), %s5967_s13 }
 0x4d2   : > { %s4299_s4 = scalar_lea.hbm %s8611_s3, %s5171_s28  ;;  %s5969_s24 = smov 0  }
 0x4d3   : > { %5425 = dma.general (%p8610_p1), %s4317_s27, 10240, %s4299_s4, %s4284_s17, %s5968_s12, [#allocation18], %s5969_s24, 0  }
 0x4d4 PF: > { %p5462_p6 = scmp.ge.s32.totalorder %s5944_s7, 2  ;;  %s4344_s1 = sand.u32 1, %s5904_s21  }
 0x4d5   : > { %p8612_p9 = scmp.ne.s32.totalorder %s8591_s6, 0  ;;  %s4345_s5 = scalar_lea.sflag [#allocation7], %s4344_s1 }
 0x4d7   : > { %p5448_p11 = pnand %p5462_p6, %p8612_p9 }
 0x4d9   : > { %5899 = dma.done.wait (!%p5448_p11), %s4345_s5, 10240  }
 0x4da   : > { %5901 = vsyncadd (!%p5448_p11), %s4345_s5, 4294957056  ;;  %s25_s7 = sadd.s32 1, %s5944_s7   ;;  %s8613_s21 = smov %s5908_s22 }
 0x4db   : > { %p22_p8 = scmp.ge.s32.totalorder %s25_s7, 6   ;;  %s8614_s22 = smov %s5912_s23 }
 0x4dc   : > { %s8615_s23 = smov %s6259_s0  ;;  %s8616_s24 = smov %s5920_s25 }
 0x4dd   : > { %s8617_s25 = smov %s5924_s26  ;;  %s8618_s26 = smov %s6256_s10 }
 0x4de   : > { %s8619_s27 = smov %s5936_s29  ;;  %s8620_s28 = smov %s5940_s30 }
 0x4df   : > { %s8621_s29 = smov %s8624_s14  ;;  %s8622_s30 = smov %s8628_s11 }
 0x4e0   :  { %24 = sbr.rel (!%p22_p8) target bundleno = 20 (0x14), region = 128 }
 0x4e7   :  { %4350 = vsyncpa [#allocation6], 1 }
 0x4e8   :  { %4352 = vsyncpa [#allocation6 + $0x1], 1 }
 0x4e9   :  { %4353 = vsyncpa [#allocation9], 1 }
 0x4ea   :  { %4354 = vsyncpa [#allocation12], 1 }
 0x4eb   :  { %4355 = vsyncpa [#allocation15], 1 }
 0x4ec   :  { %4356 = vsyncpa [#allocation7], 1 }
 0x4ed   :  { %4358 = vsyncpa [#allocation7 + $0x1], 1 }

</bundles_post_ra>
